<compile_context>
chip_gen: v6e
topology: v6e:2x2x1
jax: 0.10.0
libtpu: 0.0.40
codegen_flags: <defaults>
</compile_context>

<pallas_src>
import functools
import math

import jax
import jax.numpy as jnp
from jax import lax
from jax.experimental import pallas as pl
from jax.experimental.pallas import tpu as pltpu


def _block_dec_kernel(x_ref, qm_ref, vmask_ref, wstk_ref, vecs_ref,
                      w1_ref, b1_ref, w2_ref, o_ref,
                      *, batch_block, seq, num_heads, eps):
    """One grid step processes `batch_block` batch elements folded into rows.

    x_ref:     (batch_block*seq, C)  tokens of this batch block
    qm_ref:    (H*seq, C)            hoisted, scaled, per-head channel-masked queries (head-major rows)
    vmask_ref: (H, 1, C)             per-head channel masks (1.0 inside head h, 0.0 outside)
    wstk_ref:  (3, C, C)             [Wk^T, Wv^T, Wproj^T]  (in_features, out_features)
    vecs_ref:  (6, C)                [ln1_w, ln1_b, ln2_w, ln2_b, proj_b, fc2_b]
    w1_ref:    (C, hidden)           fc1 weight (pre-transposed);  b1_ref: (1, hidden)
    w2_ref:    (hidden, C)           fc2 weight (pre-transposed)
    """
    H = num_heads
    x = x_ref[...]                                     # (BN, C) f32
    C = x.shape[-1]

    n1w = vecs_ref[0]; n1b = vecs_ref[1]
    n2w = vecs_ref[2]; n2b = vecs_ref[3]
    bp = vecs_ref[4]; b2 = vecs_ref[5]

    def layernorm(y, w, b):
        mu = jnp.mean(y, axis=-1, keepdims=True)
        var = jnp.mean((y - mu) ** 2, axis=-1, keepdims=True)
        return (y - mu) * lax.rsqrt(var + eps) * w + b

    # ---- LayerNorm 1 ----
    x1 = layernorm(x, n1w, n1b)

    # ---- Attention_dec: queries come from the (hoisted) task_query projection; K/V from norm1(x) ----
    k = jnp.dot(x1, wstk_ref[0], preferred_element_type=jnp.float32)   # (BN, C)
    v = jnp.dot(x1, wstk_ref[1], preferred_element_type=jnp.float32)   # (BN, C)

    qm = qm_ref[...]                                   # (H*Nq, C), scale folded in, head-masked
    vmask = vmask_ref[...]                             # (H, 1, C)

    ctx_blocks = []
    for b in range(batch_block):                       # static unroll; attention is per-batch
        kb = k[b * seq:(b + 1) * seq]                  # (Nk, C) sublane slice (multiple of 8)
        vb = v[b * seq:(b + 1) * seq]                  # (Nk, C)

        # all-head scores in one full-width MXU op: (H*Nq, C) x (Nk, C)^T -> (H*Nq, Nk)
        s = lax.dot_general(qm, kb, (((1,), (1,)), ((), ())),
                            preferred_element_type=jnp.float32)
        s = s - jnp.max(s, axis=-1, keepdims=True)
        p = jnp.exp(s)                                 # unnormalised probabilities
        # deferred softmax normalisation: only the (H*Nq, 1) row sums hit the EUP reciprocal
        inv = pl.reciprocal(jnp.sum(p, axis=-1, keepdims=True), approx=True)

        # single context matmul against the UNmasked V; per-head channel selection and the
        # normalisation are applied post-hoc on the small (H, Nq, C) context (leading-dim
        # reshapes only -> layout-preserving, no relayouts).
        ctx_h = jnp.dot(p, vb, preferred_element_type=jnp.float32)     # (H*Nq, C)
        ctx_h = ctx_h.reshape(H, seq, C) * inv.reshape(H, seq, 1) * vmask
        ctx_blocks.append(jnp.sum(ctx_h, axis=0))                      # (Nq, C)

    ctx = jnp.concatenate(ctx_blocks, axis=0) if batch_block > 1 else ctx_blocks[0]
    attn_out = jnp.dot(ctx, wstk_ref[2], preferred_element_type=jnp.float32) + bp

    x = x + attn_out                                   # residual 1 (dropout / droppath = identity)

    # ---- LayerNorm 2 + MLP (exact erf-GELU, matching torch.nn.GELU default) ----
    x2 = layernorm(x, n2w, n2b)
    hdn = jnp.dot(x2, w1_ref[...], preferred_element_type=jnp.float32) + b1_ref[0]
    hdn = 0.5 * hdn * (1.0 + lax.erf(hdn * (1.0 / math.sqrt(2.0))))
    mlp_out = jnp.dot(hdn, w2_ref[...], preferred_element_type=jnp.float32) + b2

    o_ref[...] = (x + mlp_out).astype(o_ref.dtype)


def block_dec_forward(x, params, num_heads, batch_block=None):
    B, N, C = x.shape
    H = num_heads
    hd = C // H
    scale = hd ** (-0.5)
    f32 = jnp.float32

    task_q = params["task_q"].astype(f32)
    assert task_q.shape[0] == N, "Attention_dec requires N == input_resolution**2"

    if batch_block is None:
        # Fold the whole batch into a single grid step (biggest win for v5e/v6e).
        # On v7x, pass batch_block=B//2 to keep both TensorCores busy via the parallel grid axis.
        batch_block = B
    assert B % batch_block == 0
    grid = (B // batch_block,)
    BN = batch_block * N

    # ---- host-side one-off precompute: hoisted q, per-head masks, packed / pre-transposed weights ----
    head_ids = jnp.arange(C, dtype=jnp.int32) // hd
    vmask = (head_ids[None, :] == jnp.arange(H, dtype=jnp.int32)[:, None]).astype(f32)  # (H, C)
    q = jnp.dot(task_q, params["wq"].astype(f32).T) * scale                              # (N, C)
    qm = (q[None, :, :] * vmask[:, None, :]).reshape(H * N, C)       # (H*N, C) masked + scaled
    vmask3 = vmask[:, None, :]                                       # (H, 1, C)

    wkv = params["wkv"].astype(f32)
    wstack = jnp.stack([wkv[:C].T, wkv[C:].T, params["wp"].astype(f32).T])   # (3, C, C)
    vecs = jnp.concatenate([params["n1w"], params["n1b"],
                            params["n2w"], params["n2b"],
                            params["bp"], params["b2"]], axis=0).astype(f32)  # (6, C)
    w1_t = params["w1"].astype(f32).T        # (C, hidden)
    b1 = params["b1"].astype(f32)            # (1, hidden)
    w2_t = params["w2"].astype(f32).T        # (hidden, C)

    consts = [qm, vmask3, wstack, vecs, w1_t, b1, w2_t]

    x2d = x.reshape(B * N, C)

    def full_spec(a):
        zeros = (0,) * a.ndim
        return pl.BlockSpec(a.shape, lambda i, _z=zeros: _z)

    kernel = functools.partial(_block_dec_kernel,
                               batch_block=batch_block, seq=N, num_heads=H, eps=1e-5)

    out2d = pl.pallas_call(
        kernel,
        out_shape=jax.ShapeDtypeStruct((B * N, C), x.dtype),
        grid_spec=pltpu.PrefetchScalarGridSpec(
            num_scalar_prefetch=0,
            grid=grid,
            in_specs=[pl.BlockSpec((BN, C), lambda i: (i, 0))]
                     + [full_spec(a) for a in consts],
            out_specs=pl.BlockSpec((BN, C), lambda i: (i, 0)),
        ),
        compiler_params=pltpu.CompilerParams(dimension_semantics=("parallel",)),
    )(x2d, *consts)
    return out2d.reshape(B, N, C)


def block_dec_reference(x, p, num_heads):
    """Pure-JAX reference matching the PyTorch forward."""
    def ln(y, w, b):
        mu = y.mean(-1, keepdims=True)
        var = ((y - mu) ** 2).mean(-1, keepdims=True)
        return (y - mu) / jnp.sqrt(var + 1e-5) * w + b

    B, N, C = x.shape
    hd = C // num_heads
    scale = hd ** (-0.5)

    x1 = ln(x, p["n1w"][0], p["n1b"][0])
    tq = jnp.broadcast_to(p["task_q"], (B, N, C))
    q = tq @ p["wq"].T
    kv = x1 @ p["wkv"].T
    k, v = kv[..., :C], kv[..., C:]
    qh = q.reshape(B, N, num_heads, hd).transpose(0, 2, 1, 3)
    kh = k.reshape(B, N, num_heads, hd).transpose(0, 2, 1, 3)
    vh = v.reshape(B, N, num_heads, hd).transpose(0, 2, 1, 3)
    a = jax.nn.softmax(qh @ kh.transpose(0, 1, 3, 2) * scale, axis=-1)
    ctx = (a @ vh).transpose(0, 2, 1, 3).reshape(B, N, C)
    x = x + (ctx @ p["wp"].T + p["bp"][0])
    x2 = ln(x, p["n2w"][0], p["n2b"][0])
    h = x2 @ p["w1"].T + p["b1"][0]
    h = 0.5 * h * (1.0 + lax.erf(h / math.sqrt(2.0)))
    return x + (h @ p["w2"].T + p["b2"][0])


if __name__ == "__main__":
    # dim=32, num_heads=8, mlp_ratio=4, sr_ratio=1, input_resolution=8 -> N must be 64
    B, N, C = 2, 64, 32
    num_heads = 8
    hidden = int(C * 4.0)
    std = 0.02

    key = jax.random.PRNGKey(0)
    ks = jax.random.split(key, 8)
    params = dict(
        task_q=jax.random.normal(ks[0], (N, C), jnp.float32),          # torch.randn
        n1w=jnp.ones((1, C), jnp.float32), n1b=jnp.zeros((1, C), jnp.float32),
        wq=std * jax.random.normal(ks[1], (C, C), jnp.float32),        # qkv_bias=False
        wkv=std * jax.random.normal(ks[2], (2 * C, C), jnp.float32),
        wp=std * jax.random.normal(ks[3], (C, C), jnp.float32),
        bp=jnp.zeros((1, C), jnp.float32),
        n2w=jnp.ones((1, C), jnp.float32), n2b=jnp.zeros((1, C), jnp.float32),
        w1=std * jax.random.normal(ks[4], (hidden, C), jnp.float32),
        b1=jnp.zeros((1, hidden), jnp.float32),
        w2=std * jax.random.normal(ks[5], (C, hidden), jnp.float32),
        b2=jnp.zeros((1, C), jnp.float32),
    )
    x = jax.random.normal(ks[6], (B, N, C), jnp.float32)

    out = jax.block_until_ready(block_dec_forward(x, params, num_heads))
    ref = block_dec_reference(x, params, num_heads)

    assert out.shape == (B, N, C)
    err = float(jnp.max(jnp.abs(out - ref)))
    assert jnp.allclose(out, ref, atol=2e-4, rtol=2e-4), err
    print("KERNEL_OK")
</pallas_src>

<mosaic_0001>
module attributes {stable_mosaic.version = 11 : i64} {
  func.func @_block_dec_kernel(%arg0: i32, %arg1: memref<128x32xf32, #tpu.memory_space<vmem>>, %arg2: memref<512x32xf32, #tpu.memory_space<vmem>>, %arg3: memref<8x1x32xf32, #tpu.memory_space<vmem>>, %arg4: memref<3x32x32xf32, #tpu.memory_space<vmem>>, %arg5: memref<6x32xf32, #tpu.memory_space<vmem>>, %arg6: memref<32x128xf32, #tpu.memory_space<vmem>>, %arg7: memref<1x128xf32, #tpu.memory_space<vmem>>, %arg8: memref<128x32xf32, #tpu.memory_space<vmem>>, %arg9: memref<128x32xf32, #tpu.memory_space<vmem>>) attributes {dimension_semantics = [#tpu.dimension_semantics<parallel>], iteration_bounds = array<i64: 1>, scalar_prefetch = 0 : i64, scratch_operands = 0 : i64, tpu.core_type = #tpu.core_type<tc>, window_params = [{transform_indices = @transform_0, window_bounds = array<i64: 128, 32>}, {pipeline_mode = #tpu.pipeline_mode<synchronous>, transform_indices = @transform_1, window_bounds = array<i64: 512, 32>}, {pipeline_mode = #tpu.pipeline_mode<synchronous>, transform_indices = @transform_2, window_bounds = array<i64: 8, 1, 32>}, {pipeline_mode = #tpu.pipeline_mode<synchronous>, transform_indices = @transform_3, window_bounds = array<i64: 3, 32, 32>}, {pipeline_mode = #tpu.pipeline_mode<synchronous>, transform_indices = @transform_4, window_bounds = array<i64: 6, 32>}, {pipeline_mode = #tpu.pipeline_mode<synchronous>, transform_indices = @transform_5, window_bounds = array<i64: 32, 128>}, {pipeline_mode = #tpu.pipeline_mode<synchronous>, transform_indices = @transform_6, window_bounds = array<i64: 1, 128>}, {pipeline_mode = #tpu.pipeline_mode<synchronous>, transform_indices = @transform_7, window_bounds = array<i64: 128, 32>}, {transform_indices = @transform_8, window_bounds = array<i64: 128, 32>}]} {
    %c0 = arith.constant 0 : index
    %c0_0 = arith.constant 0 : index
    %0 = vector.load %arg1[%c0, %c0_0] : memref<128x32xf32, #tpu.memory_space<vmem>>, vector<128x32xf32>
    %c0_1 = arith.constant 0 : index
    %c0_2 = arith.constant 0 : index
    %1 = vector.load %arg5[%c0_1, %c0_2] : memref<6x32xf32, #tpu.memory_space<vmem>>, vector<1x32xf32>
    %2 = vector.shape_cast %1 : vector<1x32xf32> to vector<32xf32>
    %c1 = arith.constant 1 : index
    %c0_3 = arith.constant 0 : index
    %3 = vector.load %arg5[%c1, %c0_3] : memref<6x32xf32, #tpu.memory_space<vmem>>, vector<1x32xf32>
    %4 = vector.shape_cast %3 : vector<1x32xf32> to vector<32xf32>
    %c2 = arith.constant 2 : index
    %c0_4 = arith.constant 0 : index
    %5 = vector.load %arg5[%c2, %c0_4] : memref<6x32xf32, #tpu.memory_space<vmem>>, vector<1x32xf32>
    %6 = vector.shape_cast %5 : vector<1x32xf32> to vector<32xf32>
    %c3 = arith.constant 3 : index
    %c0_5 = arith.constant 0 : index
    %7 = vector.load %arg5[%c3, %c0_5] : memref<6x32xf32, #tpu.memory_space<vmem>>, vector<1x32xf32>
    %8 = vector.shape_cast %7 : vector<1x32xf32> to vector<32xf32>
    %c4 = arith.constant 4 : index
    %c0_6 = arith.constant 0 : index
    %9 = vector.load %arg5[%c4, %c0_6] : memref<6x32xf32, #tpu.memory_space<vmem>>, vector<1x32xf32>
    %10 = vector.shape_cast %9 : vector<1x32xf32> to vector<32xf32>
    %c5 = arith.constant 5 : index
    %c0_7 = arith.constant 0 : index
    %11 = vector.load %arg5[%c5, %c0_7] : memref<6x32xf32, #tpu.memory_space<vmem>>, vector<1x32xf32>
    %12 = vector.shape_cast %11 : vector<1x32xf32> to vector<32xf32>
    %cst = arith.constant dense<0.000000e+00> : vector<128xf32>
    %13 = vector.multi_reduction <add>, %0, %cst [1] : vector<128x32xf32> to vector<128xf32>
    %14 = vector.shape_cast %13 : vector<128xf32> to vector<128x1xf32>
    %cst_8 = arith.constant 3.200000e+01 : f32
    %15 = vector.broadcast %cst_8 : f32 to vector<128x1xf32>
    %16 = arith.divf %14, %15 : vector<128x1xf32>
    %17 = vector.broadcast %16 : vector<128x1xf32> to vector<128x32xf32>
    %18 = arith.subf %0, %17 : vector<128x32xf32>
    %19 = arith.mulf %18, %18 : vector<128x32xf32>
    %cst_9 = arith.constant dense<0.000000e+00> : vector<128xf32>
    %20 = vector.multi_reduction <add>, %19, %cst_9 [1] : vector<128x32xf32> to vector<128xf32>
    %21 = vector.shape_cast %20 : vector<128xf32> to vector<128x1xf32>
    %cst_10 = arith.constant 3.200000e+01 : f32
    %22 = vector.broadcast %cst_10 : f32 to vector<128x1xf32>
    %23 = arith.divf %21, %22 : vector<128x1xf32>
    %24 = vector.broadcast %16 : vector<128x1xf32> to vector<128x32xf32>
    %25 = arith.subf %0, %24 : vector<128x32xf32>
    %cst_11 = arith.constant 9.99999974E-6 : f32
    %26 = vector.broadcast %cst_11 : f32 to vector<128x1xf32>
    %27 = arith.addf %23, %26 : vector<128x1xf32>
    %28 = math.rsqrt %27 : vector<128x1xf32>
    %29 = vector.broadcast %28 : vector<128x1xf32> to vector<128x32xf32>
    %30 = arith.mulf %25, %29 : vector<128x32xf32>
    %31 = vector.shape_cast %2 : vector<32xf32> to vector<1x32xf32>
    %32 = vector.broadcast %31 : vector<1x32xf32> to vector<128x32xf32>
    %33 = arith.mulf %30, %32 : vector<128x32xf32>
    %34 = vector.shape_cast %4 : vector<32xf32> to vector<1x32xf32>
    %35 = vector.broadcast %34 : vector<1x32xf32> to vector<128x32xf32>
    %36 = arith.addf %33, %35 : vector<128x32xf32>
    %c0_12 = arith.constant 0 : index
    %c0_13 = arith.constant 0 : index
    %c0_14 = arith.constant 0 : index
    %37 = vector.load %arg4[%c0_12, %c0_13, %c0_14] : memref<3x32x32xf32, #tpu.memory_space<vmem>>, vector<1x32x32xf32>
    %38 = vector.shape_cast %37 : vector<1x32x32xf32> to vector<32x32xf32>
    %cst_15 = arith.constant dense<0.000000e+00> : vector<128x32xf32>
    %39 = tpu.matmul %36, %38, %cst_15 {dimension_numbers = #tpu.dot_dimension_numbers<[1], [0], [0], [1], [0, 0, 1, 1], [], []>} : vector<128x32xf32>, vector<32x32xf32>, vector<128x32xf32> -> vector<128x32xf32>
    %c1_16 = arith.constant 1 : index
    %c0_17 = arith.constant 0 : index
    %c0_18 = arith.constant 0 : index
    %40 = vector.load %arg4[%c1_16, %c0_17, %c0_18] : memref<3x32x32xf32, #tpu.memory_space<vmem>>, vector<1x32x32xf32>
    %41 = vector.shape_cast %40 : vector<1x32x32xf32> to vector<32x32xf32>
    %cst_19 = arith.constant dense<0.000000e+00> : vector<128x32xf32>
    %42 = tpu.matmul %36, %41, %cst_19 {dimension_numbers = #tpu.dot_dimension_numbers<[1], [0], [0], [1], [0, 0, 1, 1], [], []>} : vector<128x32xf32>, vector<32x32xf32>, vector<128x32xf32> -> vector<128x32xf32>
    %c0_20 = arith.constant 0 : index
    %c0_21 = arith.constant 0 : index
    %43 = vector.load %arg2[%c0_20, %c0_21] : memref<512x32xf32, #tpu.memory_space<vmem>>, vector<512x32xf32>
    %c0_22 = arith.constant 0 : index
    %c0_23 = arith.constant 0 : index
    %c0_24 = arith.constant 0 : index
    %44 = vector.load %arg3[%c0_22, %c0_23, %c0_24] : memref<8x1x32xf32, #tpu.memory_space<vmem>>, vector<8x1x32xf32>
    %45 = vector.extract_strided_slice %39 {offsets = [0, 0], sizes = [64, 32], strides = [1, 1]} : vector<128x32xf32> to vector<64x32xf32>
    %46 = vector.extract_strided_slice %42 {offsets = [0, 0], sizes = [64, 32], strides = [1, 1]} : vector<128x32xf32> to vector<64x32xf32>
    %cst_25 = arith.constant dense<0.000000e+00> : vector<512x64xf32>
    %47 = tpu.matmul %43, %45, %cst_25 {dimension_numbers = #tpu.dot_dimension_numbers<[1], [1], [0], [0], [0, 0, 1, 0], [], []>} : vector<512x32xf32>, vector<64x32xf32>, vector<512x64xf32> -> vector<512x64xf32>
    %cst_26 = arith.constant dense<0xFF800000> : vector<512xf32>
    %48 = vector.multi_reduction <maximumf>, %47, %cst_26 [1] : vector<512x64xf32> to vector<512xf32>
    %49 = vector.shape_cast %48 : vector<512xf32> to vector<512x1xf32>
    %50 = vector.broadcast %49 : vector<512x1xf32> to vector<512x64xf32>
    %51 = arith.subf %47, %50 : vector<512x64xf32>
    %52 = math.exp %51 : vector<512x64xf32>
    %cst_27 = arith.constant dense<0.000000e+00> : vector<512xf32>
    %53 = vector.multi_reduction <add>, %52, %cst_27 [1] : vector<512x64xf32> to vector<512xf32>
    %54 = vector.shape_cast %53 : vector<512xf32> to vector<512x1xf32>
    %55 = tpu.reciprocal %54 {approx = true} : vector<512x1xf32> -> vector<512x1xf32>
    %cst_28 = arith.constant dense<0.000000e+00> : vector<512x32xf32>
    %56 = tpu.matmul %52, %46, %cst_28 {dimension_numbers = #tpu.dot_dimension_numbers<[1], [0], [0], [1], [0, 0, 1, 1], [], []>} : vector<512x64xf32>, vector<64x32xf32>, vector<512x32xf32> -> vector<512x32xf32>
    %57 = vector.shape_cast %56 : vector<512x32xf32> to vector<8x64x32xf32>
    %58 = vector.shape_cast %55 : vector<512x1xf32> to vector<8x64x1xf32>
    %59 = vector.broadcast %58 : vector<8x64x1xf32> to vector<8x64x32xf32>
    %60 = arith.mulf %57, %59 : vector<8x64x32xf32>
    %61 = vector.broadcast %44 : vector<8x1x32xf32> to vector<8x64x32xf32>
    %62 = arith.mulf %60, %61 : vector<8x64x32xf32>
    %cst_29 = arith.constant dense<0.000000e+00> : vector<64x32xf32>
    %63 = vector.multi_reduction <add>, %62, %cst_29 [0] : vector<8x64x32xf32> to vector<64x32xf32>
    %64 = vector.extract_strided_slice %39 {offsets = [64, 0], sizes = [64, 32], strides = [1, 1]} : vector<128x32xf32> to vector<64x32xf32>
    %65 = vector.extract_strided_slice %42 {offsets = [64, 0], sizes = [64, 32], strides = [1, 1]} : vector<128x32xf32> to vector<64x32xf32>
    %cst_30 = arith.constant dense<0.000000e+00> : vector<512x64xf32>
    %66 = tpu.matmul %43, %64, %cst_30 {dimension_numbers = #tpu.dot_dimension_numbers<[1], [1], [0], [0], [0, 0, 1, 0], [], []>} : vector<512x32xf32>, vector<64x32xf32>, vector<512x64xf32> -> vector<512x64xf32>
    %cst_31 = arith.constant dense<0xFF800000> : vector<512xf32>
    %67 = vector.multi_reduction <maximumf>, %66, %cst_31 [1] : vector<512x64xf32> to vector<512xf32>
    %68 = vector.shape_cast %67 : vector<512xf32> to vector<512x1xf32>
    %69 = vector.broadcast %68 : vector<512x1xf32> to vector<512x64xf32>
    %70 = arith.subf %66, %69 : vector<512x64xf32>
    %71 = math.exp %70 : vector<512x64xf32>
    %cst_32 = arith.constant dense<0.000000e+00> : vector<512xf32>
    %72 = vector.multi_reduction <add>, %71, %cst_32 [1] : vector<512x64xf32> to vector<512xf32>
    %73 = vector.shape_cast %72 : vector<512xf32> to vector<512x1xf32>
    %74 = tpu.reciprocal %73 {approx = true} : vector<512x1xf32> -> vector<512x1xf32>
    %cst_33 = arith.constant dense<0.000000e+00> : vector<512x32xf32>
    %75 = tpu.matmul %71, %65, %cst_33 {dimension_numbers = #tpu.dot_dimension_numbers<[1], [0], [0], [1], [0, 0, 1, 1], [], []>} : vector<512x64xf32>, vector<64x32xf32>, vector<512x32xf32> -> vector<512x32xf32>
    %76 = vector.shape_cast %75 : vector<512x32xf32> to vector<8x64x32xf32>
    %77 = vector.shape_cast %74 : vector<512x1xf32> to vector<8x64x1xf32>
    %78 = vector.broadcast %77 : vector<8x64x1xf32> to vector<8x64x32xf32>
    %79 = arith.mulf %76, %78 : vector<8x64x32xf32>
    %80 = vector.broadcast %44 : vector<8x1x32xf32> to vector<8x64x32xf32>
    %81 = arith.mulf %79, %80 : vector<8x64x32xf32>
    %cst_34 = arith.constant dense<0.000000e+00> : vector<64x32xf32>
    %82 = vector.multi_reduction <add>, %81, %cst_34 [0] : vector<8x64x32xf32> to vector<64x32xf32>
    %83 = tpu.concatenate %63, %82 in 0 : vector<64x32xf32>, vector<64x32xf32> -> vector<128x32xf32>
    %c2_35 = arith.constant 2 : index
    %c0_36 = arith.constant 0 : index
    %c0_37 = arith.constant 0 : index
    %84 = vector.load %arg4[%c2_35, %c0_36, %c0_37] : memref<3x32x32xf32, #tpu.memory_space<vmem>>, vector<1x32x32xf32>
    %85 = vector.shape_cast %84 : vector<1x32x32xf32> to vector<32x32xf32>
    %cst_38 = arith.constant dense<0.000000e+00> : vector<128x32xf32>
    %86 = tpu.matmul %83, %85, %cst_38 {dimension_numbers = #tpu.dot_dimension_numbers<[1], [0], [0], [1], [0, 0, 1, 1], [], []>} : vector<128x32xf32>, vector<32x32xf32>, vector<128x32xf32> -> vector<128x32xf32>
    %87 = vector.shape_cast %10 : vector<32xf32> to vector<1x32xf32>
    %88 = vector.broadcast %87 : vector<1x32xf32> to vector<128x32xf32>
    %89 = arith.addf %86, %88 : vector<128x32xf32>
    %90 = arith.addf %0, %89 : vector<128x32xf32>
    %cst_39 = arith.constant dense<0.000000e+00> : vector<128xf32>
    %91 = vector.multi_reduction <add>, %90, %cst_39 [1] : vector<128x32xf32> to vector<128xf32>
    %92 = vector.shape_cast %91 : vector<128xf32> to vector<128x1xf32>
    %cst_40 = arith.constant 3.200000e+01 : f32
    %93 = vector.broadcast %cst_40 : f32 to vector<128x1xf32>
    %94 = arith.divf %92, %93 : vector<128x1xf32>
    %95 = vector.broadcast %94 : vector<128x1xf32> to vector<128x32xf32>
    %96 = arith.subf %90, %95 : vector<128x32xf32>
    %97 = arith.mulf %96, %96 : vector<128x32xf32>
    %cst_41 = arith.constant dense<0.000000e+00> : vector<128xf32>
    %98 = vector.multi_reduction <add>, %97, %cst_41 [1] : vector<128x32xf32> to vector<128xf32>
    %99 = vector.shape_cast %98 : vector<128xf32> to vector<128x1xf32>
    %cst_42 = arith.constant 3.200000e+01 : f32
    %100 = vector.broadcast %cst_42 : f32 to vector<128x1xf32>
    %101 = arith.divf %99, %100 : vector<128x1xf32>
    %102 = vector.broadcast %94 : vector<128x1xf32> to vector<128x32xf32>
    %103 = arith.subf %90, %102 : vector<128x32xf32>
    %cst_43 = arith.constant 9.99999974E-6 : f32
    %104 = vector.broadcast %cst_43 : f32 to vector<128x1xf32>
    %105 = arith.addf %101, %104 : vector<128x1xf32>
    %106 = math.rsqrt %105 : vector<128x1xf32>
    %107 = vector.broadcast %106 : vector<128x1xf32> to vector<128x32xf32>
    %108 = arith.mulf %103, %107 : vector<128x32xf32>
    %109 = vector.shape_cast %6 : vector<32xf32> to vector<1x32xf32>
    %110 = vector.broadcast %109 : vector<1x32xf32> to vector<128x32xf32>
    %111 = arith.mulf %108, %110 : vector<128x32xf32>
    %112 = vector.shape_cast %8 : vector<32xf32> to vector<1x32xf32>
    %113 = vector.broadcast %112 : vector<1x32xf32> to vector<128x32xf32>
    %114 = arith.addf %111, %113 : vector<128x32xf32>
    %c0_44 = arith.constant 0 : index
    %c0_45 = arith.constant 0 : index
    %115 = vector.load %arg6[%c0_44, %c0_45] : memref<32x128xf32, #tpu.memory_space<vmem>>, vector<32x128xf32>
    %cst_46 = arith.constant dense<0.000000e+00> : vector<128x128xf32>
    %116 = tpu.matmul %114, %115, %cst_46 {dimension_numbers = #tpu.dot_dimension_numbers<[1], [0], [0], [1], [0, 0, 1, 1], [], []>} : vector<128x32xf32>, vector<32x128xf32>, vector<128x128xf32> -> vector<128x128xf32>
    %c0_47 = arith.constant 0 : index
    %c0_48 = arith.constant 0 : index
    %117 = vector.load %arg7[%c0_47, %c0_48] : memref<1x128xf32, #tpu.memory_space<vmem>>, vector<1x128xf32>
    %118 = vector.shape_cast %117 : vector<1x128xf32> to vector<128xf32>
    %119 = vector.shape_cast %118 : vector<128xf32> to vector<1x128xf32>
    %120 = vector.broadcast %119 : vector<1x128xf32> to vector<128x128xf32>
    %121 = arith.addf %116, %120 : vector<128x128xf32>
    %cst_49 = arith.constant 5.000000e-01 : f32
    %122 = vector.broadcast %cst_49 : f32 to vector<128x128xf32>
    %123 = arith.mulf %122, %121 : vector<128x128xf32>
    %cst_50 = arith.constant 0.707106769 : f32
    %124 = vector.broadcast %cst_50 : f32 to vector<128x128xf32>
    %125 = arith.mulf %121, %124 : vector<128x128xf32>
    %126 = math.erf %125 : vector<128x128xf32>
    %cst_51 = arith.constant 1.000000e+00 : f32
    %127 = vector.broadcast %cst_51 : f32 to vector<128x128xf32>
    %128 = arith.addf %127, %126 : vector<128x128xf32>
    %129 = arith.mulf %123, %128 : vector<128x128xf32>
    %c0_52 = arith.constant 0 : index
    %c0_53 = arith.constant 0 : index
    %130 = vector.load %arg8[%c0_52, %c0_53] : memref<128x32xf32, #tpu.memory_space<vmem>>, vector<128x32xf32>
    %cst_54 = arith.constant dense<0.000000e+00> : vector<128x32xf32>
    %131 = tpu.matmul %129, %130, %cst_54 {dimension_numbers = #tpu.dot_dimension_numbers<[1], [0], [0], [1], [0, 0, 1, 1], [], []>} : vector<128x128xf32>, vector<128x32xf32>, vector<128x32xf32> -> vector<128x32xf32>
    %132 = vector.shape_cast %12 : vector<32xf32> to vector<1x32xf32>
    %133 = vector.broadcast %132 : vector<1x32xf32> to vector<128x32xf32>
    %134 = arith.addf %131, %133 : vector<128x32xf32>
    %135 = arith.addf %90, %134 : vector<128x32xf32>
    %c0_55 = arith.constant 0 : index
    %c0_56 = arith.constant 0 : index
    %136 = vector.load %arg9[%c0_55, %c0_56] : memref<128x32xf32, #tpu.memory_space<vmem>>, vector<128x32xf32>
    tpu.vector_store %arg9[%c0_55, %c0_56], %135 {strides = array<i32>} : memref<128x32xf32, #tpu.memory_space<vmem>>, vector<128x32xf32>,
    return
  }
  func.func @transform_0(%arg0: i32) -> (i32, i32) {
    %c0_i32 = arith.constant 0 : i32
    %c0_i32_0 = arith.constant 0 : i32
    return %arg0, %c0_i32 : i32, i32
  }
  func.func @transform_1(%arg0: i32) -> (i32, i32) {
    %c0_i32 = arith.constant 0 : i32
    %c0_i32_0 = arith.constant 0 : i32
    %c0_i32_1 = arith.constant 0 : i32
    return %c0_i32, %c0_i32_0 : i32, i32
  }
  func.func @transform_2(%arg0: i32) -> (i32, i32, i32) {
    %c0_i32 = arith.constant 0 : i32
    %c0_i32_0 = arith.constant 0 : i32
    %c0_i32_1 = arith.constant 0 : i32
    %c0_i32_2 = arith.constant 0 : i32
    return %c0_i32, %c0_i32_0, %c0_i32_1 : i32, i32, i32
  }
  func.func @transform_3(%arg0: i32) -> (i32, i32, i32) {
    %c0_i32 = arith.constant 0 : i32
    %c0_i32_0 = arith.constant 0 : i32
    %c0_i32_1 = arith.constant 0 : i32
    %c0_i32_2 = arith.constant 0 : i32
    return %c0_i32, %c0_i32_0, %c0_i32_1 : i32, i32, i32
  }
  func.func @transform_4(%arg0: i32) -> (i32, i32) {
    %c0_i32 = arith.constant 0 : i32
    %c0_i32_0 = arith.constant 0 : i32
    %c0_i32_1 = arith.constant 0 : i32
    return %c0_i32, %c0_i32_0 : i32, i32
  }
  func.func @transform_5(%arg0: i32) -> (i32, i32) {
    %c0_i32 = arith.constant 0 : i32
    %c0_i32_0 = arith.constant 0 : i32
    %c0_i32_1 = arith.constant 0 : i32
    return %c0_i32, %c0_i32_0 : i32, i32
  }
  func.func @transform_6(%arg0: i32) -> (i32, i32) {
    %c0_i32 = arith.constant 0 : i32
    %c0_i32_0 = arith.constant 0 : i32
    %c0_i32_1 = arith.constant 0 : i32
    return %c0_i32, %c0_i32_0 : i32, i32
  }
  func.func @transform_7(%arg0: i32) -> (i32, i32) {
    %c0_i32 = arith.constant 0 : i32
    %c0_i32_0 = arith.constant 0 : i32
    %c0_i32_1 = arith.constant 0 : i32
    return %c0_i32, %c0_i32_0 : i32, i32
  }
  func.func @transform_8(%arg0: i32) -> (i32, i32) {
    %c0_i32 = arith.constant 0 : i32
    %c0_i32_0 = arith.constant 0 : i32
    return %arg0, %c0_i32 : i32, i32
  }
}

</mosaic_0001>

<bundles_post_ra>
// kernel: tpu_custom_call.1
= control target key start
LH: loop header
LB: loop body
LE: loop exit
PB: predicated region body
PF: predicated region fallthrough
CT: control target
= control target key end

     0   :  { %vm51_vm0 = vcmask 261120   ;;  %vm1321_vm1 = vcmask 523264   ;;  %s11545_s0 = inlined_call_operand.vmem [shape: f32[128,32], index: 0, kind: input, shape index: {}]   ;;  %s11546_s3 = inlined_call_operand.vmem [shape: f32[3,32,32], index: 3, kind: input, shape index: {}]   ;;  %s11547_s4 = inlined_call_operand.vmem [shape: f32[6,32], index: 4, kind: input, shape index: {}]   ;;  %s11548_s1 = inlined_call_operand.vmem [shape: f32[512,32], index: 1, kind: input, shape index: {}]   ;;  %s11549_s2 = inlined_call_operand.vmem [shape: f32[8,1,32], index: 2, kind: input, shape index: {}]   ;;  %s11550_s5 = inlined_call_operand.vmem [shape: f32[32,128], index: 5, kind: input, shape index: {}]   ;;  %s11551_s7 = inlined_call_operand.vmem [shape: f32[128,32], index: 7, kind: input, shape index: {}]   ;;  %s11552_s6 = inlined_call_operand.vmem [shape: f32[1,128], index: 6, kind: input, shape index: {}]   ;;  %s11553_s8 = inlined_call_operand.vmem [shape: f32[128,32], index: 8, kind: output, shape index: {}]  }
   0x1   :  { %v29_v0 = vld [vmem:[%s11545_s0] sm:$0xff]  ;;  %v31_v1 = vld [vmem:[%s11545_s0 + $0x10] sm:$0xff]  ;;  %v30_v2 = vld [vmem:[%s11545_s0 + $0x8] sm:$0xff] }
   0x2   :  { %v52_v3 = vsel %vm51_vm0, %v29_v0, 0.0  ;;  %v58_v4 = vsel %vm51_vm0, %v31_v1, 0.0  ;;  %v32_v5 = vld [vmem:[%s11545_s0 + $0x18] sm:$0xff]  ;;  %v55_v6 = vsel %vm51_vm0, %v30_v2, 0.0  ;;  %v33_v8 = vld [vmem:[%s11545_s0 + $0x20] sm:$0xff]  ;;  %v34_v9 = vld [vmem:[%s11545_s0 + $0x28] sm:$0xff] }
   0x3   :  { %53 = vadd.xlane.f32.xlu0 %v52_v3  ;;  %59 = vadd.xlane.f32.xlu1 %v58_v4  ;;  %v61_v7 = vsel %vm51_vm0, %v32_v5, 0.0  ;;  %v64_v10 = vsel %vm51_vm0, %v33_v8, 0.0  ;;  %v67_v11 = vsel %vm51_vm0, %v34_v9, 0.0  ;;  %v35_v12 = vld [vmem:[%s11545_s0 + $0x30] sm:$0xff]  ;;  %v36_v13 = vld [vmem:[%s11545_s0 + $0x38] sm:$0xff]  ;;  %v7817_v54 = vld [vmem:[%s11545_s0 + $0x40] sm:$0xff] }
   0x4   :  { %v70_v14 = vsel %vm51_vm0, %v35_v12, 0.0  ;;  %v73_v15 = vsel %vm51_vm0, %v36_v13, 0.0  ;;  %v76_v57 = vsel %vm51_vm0, %v7817_v54, 0.0  ;;  %v7826_v58 = vld [vmem:[%s11545_s0 + $0x48] sm:$0xff]  ;;  %v7831_v59 = vld [vmem:[%s11545_s0 + $0x50] sm:$0xff]  ;;  %v7840_v62 = vld [vmem:[%s11545_s0 + $0x58] sm:$0xff] }
   0x5   :  { %v79_v60 = vsel %vm51_vm0, %v7826_v58, 0.0  ;;  %v82_v61 = vsel %vm51_vm0, %v7831_v59, 0.0  ;;  %v7845_v63 = vld [vmem:[%s11545_s0 + $0x60] sm:$0xff]  ;;  %v7859_v3 = vld [vmem:[%s11545_s0 + $0x70] sm:$0xff] }
   0x7   :  { %56 = vadd.xlane.f32.xlu0 %v55_v6  ;;  %62 = vadd.xlane.f32.xlu1 %v61_v7  ;;  %v7868_v6 = vld [vmem:[%s11545_s0 + $0x78] sm:$0xff] }
   0x8   :  { %v97_v7 = vsel %vm51_vm0, %v7868_v6, 0.0 }
   0xb   :  { %65 = vadd.xlane.f32.xlu0 %v64_v10  ;;  %68 = vadd.xlane.f32.xlu1 %v67_v11  ;;  %v303_v10 = vld [vmem:[%s11546_s3 + $0x10] sm:$0xff] }
   0xc   :  { %v5680_v11 = vld [vmem:[%s11546_s3 + $0x30] sm:$0xff] }
   0xf   :  { %71 = vadd.xlane.f32.xlu0 %v70_v14  ;;  %74 = vadd.xlane.f32.xlu1 %v73_v15  ;;  %v301_v14 = vld [vmem:[%s11546_s3] sm:$0xff] }
  0x10   :  { %v5678_v15 = vld [vmem:[%s11546_s3 + $0x20] sm:$0xff] }
  0x8c   :  { %v54_v16 = vpop.xlane.xlu0 %53  ;;  %v60_v17 = vpop.xlane.xlu1 %59 }
  0x8d   :  { %v101_v18 = vmul.f32 0.03125, %v54_v16  ;;  %v103_v19 = vmul.f32 0.03125, %v60_v17 }
  0x8f   :  { %v7776_v20 = vsub.f32 %v29_v0, %v101_v18  ;;  %v7778_v21 = vsub.f32 %v31_v1, %v103_v19  ;;  %v85_v0 = vsel %vm51_vm0, %v7840_v62, 0.0  ;;  %v88_v1 = vsel %vm51_vm0, %v7845_v63, 0.0 }
  0x90   :  { %v57_v22 = vpop.xlane.xlu0 %56  ;;  %v63_v23 = vpop.xlane.xlu1 %62 }
  0x91   :  { %v102_v24 = vmul.f32 0.03125, %v57_v22  ;;  %v104_v25 = vmul.f32 0.03125, %v63_v23  ;;  %v133_v26 = vmul.f32 %v7776_v20, %v7776_v20  ;;  %v135_v27 = vmul.f32 %v7778_v21, %v7778_v21 }
  0x93   :  { %v7784_v28 = vsub.f32 %v30_v2, %v102_v24  ;;  %v7786_v29 = vsub.f32 %v32_v5, %v104_v25  ;;  %v149_v30 = vsel %vm51_vm0, %v133_v26, 0.0  ;;  %v155_v33 = vsel %vm51_vm0, %v135_v27, 0.0  ;;  %v7854_v2 = vld [vmem:[%s11545_s0 + $0x68] sm:$0xff] }
  0x94   :  { %150 = vadd.xlane.f32.xlu0 %v149_v30  ;;  %v66_v31 = vpop.xlane.xlu0 %65  ;;  %v69_v32 = vpop.xlane.xlu1 %68  ;;  %v91_v4 = vsel %vm51_vm0, %v7854_v2, 0.0  ;;  %v94_v5 = vsel %vm51_vm0, %v7859_v3, 0.0 }
  0x95   :  { %v105_v34 = vmul.f32 0.03125, %v66_v31  ;;  %v106_v35 = vmul.f32 0.03125, %v69_v32  ;;  %v134_v36 = vmul.f32 %v7784_v28, %v7784_v28  ;;  %v136_v37 = vmul.f32 %v7786_v29, %v7786_v29 }
  0x97   :  { %v7794_v38 = vsub.f32 %v33_v8, %v105_v34  ;;  %v7796_v39 = vsub.f32 %v34_v9, %v106_v35  ;;  %v152_v40 = vsel %vm51_vm0, %v134_v36, 0.0  ;;  %v158_v43 = vsel %vm51_vm0, %v136_v37, 0.0  ;;  %v304_v8 = vld [vmem:[%s11546_s3 + $0x18] sm:$0xff] }
  0x98   :  { %156 = vadd.xlane.f32.xlu0 %v155_v33  ;;  %153 = vadd.xlane.f32.xlu1 %v152_v40  ;;  %v72_v41 = vpop.xlane.xlu0 %71  ;;  %v75_v42 = vpop.xlane.xlu1 %74  ;;  %v5681_v9 = vld [vmem:[%s11546_s3 + $0x38] sm:$0xff] }
  0x99   :  { %v107_v44 = vmul.f32 0.03125, %v72_v41  ;;  %v108_v45 = vmul.f32 0.03125, %v75_v42  ;;  %v137_v46 = vmul.f32 %v7794_v38, %v7794_v38  ;;  %v138_v47 = vmul.f32 %v7796_v39, %v7796_v39  ;;  %6419 = vmatprep.subr.mxu0 %v304_v8  ;;  %6451 = vmatprep.subr.mxu1 %v5681_v9 }
  0x9a   :  { %6420 = vmatpush3.msra.mxu0 %v304_v8  ;;  %6452 = vmatpush3.msra.mxu1 %v5681_v9 }
  0x9b   :  { %v7804_v48 = vsub.f32 %v35_v12, %v107_v44  ;;  %v7806_v49 = vsub.f32 %v36_v13, %v108_v45  ;;  %v161_v50 = vsel %vm51_vm0, %v137_v46, 0.0  ;;  %v164_v51 = vsel %vm51_vm0, %v138_v47, 0.0  ;;  %6421 = vmatprep.subr.mxu0 %v303_v10  ;;  %6453 = vmatprep.subr.mxu1 %v5680_v11  ;;  %v302_v12 = vld [vmem:[%s11546_s3 + $0x8] sm:$0xff] }
  0x9c   :  { %159 = vadd.xlane.f32.xlu1 %v158_v43  ;;  %162 = vadd.xlane.f32.xlu0 %v161_v50  ;;  %v5679_v13 = vld [vmem:[%s11546_s3 + $0x28] sm:$0xff] }
  0x9d   :  { %v139_v52 = vmul.f32 %v7804_v48, %v7804_v48  ;;  %v140_v53 = vmul.f32 %v7806_v49, %v7806_v49  ;;  %6422 = vmatpush3.msra.mxu0 %v303_v10  ;;  %6454 = vmatpush3.msra.mxu1 %v5680_v11 }
  0x9e   :  { %6423 = vmatprep.subr.mxu0 %v302_v12  ;;  %6455 = vmatprep.subr.mxu1 %v5679_v13 }
  0x9f   :  { %v167_v55 = vsel %vm51_vm0, %v139_v52, 0.0  ;;  %v170_v56 = vsel %vm51_vm0, %v140_v53, 0.0  ;;  %6424 = vmatpush3.msra.mxu0 %v302_v12  ;;  %6456 = vmatpush3.msra.mxu1 %v5679_v13  ;;  %v7902_v52 = vld [vmem:[%s11547_s4] ss:$0 sm:$0xff] }
  0xa0   :  { %165 = vadd.xlane.f32.xlu1 %v164_v51  ;;  %168 = vadd.xlane.f32.xlu0 %v167_v55 }
  0xa1   :  { %6425 = vmatprep.subr.mxu0 %v301_v14  ;;  %6457 = vmatprep.subr.mxu1 %v5678_v15 }
  0xa2   :  { %6426 = vmatpush3.msra.mxu0 %v301_v14  ;;  %6458 = vmatpush3.msra.mxu1 %v5678_v15 }
  0xa4   :  { %171 = vadd.xlane.f32.xlu1 %v170_v56  ;;  %77 = vadd.xlane.f32.xlu0 %v76_v57 }
  0xa8   :  { %80 = vadd.xlane.f32.xlu1 %v79_v60  ;;  %83 = vadd.xlane.f32.xlu0 %v82_v61 }
  0xac   :  { %86 = vadd.xlane.f32.xlu1 %v85_v0  ;;  %89 = vadd.xlane.f32.xlu0 %v88_v1 }
  0xb0   :  { %92 = vadd.xlane.f32.xlu1 %v91_v4  ;;  %95 = vadd.xlane.f32.xlu0 %v94_v5 }
  0xb4   :  { %98 = vadd.xlane.f32.xlu1 %v97_v7 }
 0x11d   :  { %v151_v16 = vpop.xlane.xlu0 %150 }
 0x11e   :  { %v197_v17 = vmul.f32 0.03125, %v151_v16 }
 0x120   :  { %v213_v18 = vadd.f32 1e-05, %v197_v17 }
 0x121   :  { %v154_v19 = vpop.xlane.xlu1 %153  ;;  %v157_v22 = vpop.xlane.xlu0 %156 }
 0x122   :  { %7067 = vrsqrt.f32 %v213_v18  ;;  %v198_v23 = vmul.f32 0.03125, %v154_v19  ;;  %v199_v24 = vmul.f32 0.03125, %v157_v22 }
 0x124   :  { %v214_v25 = vadd.f32 1e-05, %v198_v23  ;;  %v215_v26 = vadd.f32 1e-05, %v199_v24 }
 0x125   :  { %v160_v27 = vpop.xlane.xlu1 %159  ;;  %v163_v30 = vpop.xlane.xlu0 %162 }
 0x126   :  { %7069 = vrsqrt.f32 %v214_v25  ;;  %v200_v31 = vmul.f32 0.03125, %v160_v27  ;;  %v201_v32 = vmul.f32 0.03125, %v163_v30 }
 0x127   :  { %7071 = vrsqrt.f32 %v215_v26 }
 0x128   :  { %v216_v33 = vadd.f32 1e-05, %v200_v31  ;;  %v217_v34 = vadd.f32 1e-05, %v201_v32 }
 0x129   :  { %v166_v35 = vpop.xlane.xlu1 %165  ;;  %v169_v36 = vpop.xlane.xlu0 %168 }
 0x12a   :  { %7073 = vrsqrt.f32 %v216_v33  ;;  %v202_v37 = vmul.f32 0.03125, %v166_v35  ;;  %v203_v40 = vmul.f32 0.03125, %v169_v36 }
 0x12b   :  { %7075 = vrsqrt.f32 %v217_v34 }
 0x12c   :  { %v218_v41 = vadd.f32 1e-05, %v202_v37  ;;  %v219_v42 = vadd.f32 1e-05, %v203_v40 }
 0x12d   :  { %v172_v43 = vpop.xlane.xlu1 %171  ;;  %v78_v44 = vpop.xlane.xlu0 %77 }
 0x12e   :  { %7077 = vrsqrt.f32 %v218_v41  ;;  %v204_v45 = vmul.f32 0.03125, %v172_v43  ;;  %v109_v46 = vmul.f32 0.03125, %v78_v44 }
 0x12f   :  { %v7068_v47 = vpop.eup %7067  ;;  %7079 = vrsqrt.f32 %v219_v42 }
 0x130   :  { %v220_v50 = vadd.f32 1e-05, %v204_v45  ;;  %v7897_v51 = vsub.f32 %v7817_v54, %v109_v46  ;;  %v245_v53 = vmul.f32 %v7068_v47, %v7776_v20  ;;  %v7910_v54 = vld [vmem:[%s11547_s4 + $0x1] ss:$0 sm:$0xff] }
 0x131   :  { %v81_v55 = vpop.xlane.xlu1 %80  ;;  %v84_v56 = vpop.xlane.xlu0 %83 }
 0x132   :  { %7081 = vrsqrt.f32 %v220_v50  ;;  %v110_v57 = vmul.f32 0.03125, %v81_v55  ;;  %v111_v60 = vmul.f32 0.03125, %v84_v56  ;;  %v141_v61 = vmul.f32 %v7897_v51, %v7897_v51 }
 0x133   :  { %v7070_v0 = vpop.eup %7069  ;;  %v265_v1 = vmul.f32 %v7902_v52, %v245_v53 }
 0x134   :  { %v7072_v4 = vpop.eup %7071  ;;  %v7914_v5 = vsub.f32 %v7826_v58, %v110_v57  ;;  %v7917_v20 = vsub.f32 %v7831_v59, %v111_v60  ;;  %v173_v7 = vsel %vm51_vm0, %v141_v61, 0.0  ;;  %v246_v8 = vmul.f32 %v7070_v0, %v7784_v28 }
 0x135   :  { %v87_v9 = vpop.xlane.xlu1 %86  ;;  %174 = vadd.xlane.f32.xlu0 %v173_v7  ;;  %v90_v10 = vpop.xlane.xlu0 %89  ;;  %v285_v11 = vadd.f32 %v7910_v54, %v265_v1  ;;  %v247_v12 = vmul.f32 %v7072_v4, %v7778_v21 }
 0x136   :  { %v112_v13 = vmul.f32 0.03125, %v87_v9  ;;  %v113_v14 = vmul.f32 0.03125, %v90_v10  ;;  %v142_v58 = vmul.f32 %v7914_v5, %v7914_v5  ;;  %v143_v59 = vmul.f32 %v7917_v20, %v7917_v20 }
 0x137   :  { %v7074_v15 = vpop.eup %7073  ;;  %6427 = vmatprep.mubr.msk.f32.mxu0 %vm51_vm0, %v285_v11  ;;  %6459 = vmatprep.mubr.msk.f32.mxu1 %vm51_vm0, %v285_v11  ;;  %v266_v28 = vmul.f32 %v7902_v52, %v246_v8  ;;  %v267_v16 = vmul.f32 %v7902_v52, %v247_v12 }
 0x138   :  { %v7076_v17 = vpop.eup %7075  ;;  %v7932_v21 = vsub.f32 %v7840_v62, %v112_v13  ;;  %v7935_v18 = vsub.f32 %v7845_v63, %v113_v14  ;;  %v176_v19 = vsel %vm51_vm0, %v142_v58, 0.0  ;;  %v179_v22 = vsel %vm51_vm0, %v143_v59, 0.0 }
 0x139   :  { %177 = vadd.xlane.f32.xlu1 %v176_v19  ;;  %v93_v23 = vpop.xlane.xlu1 %92  ;;  %180 = vadd.xlane.f32.xlu0 %v179_v22  ;;  %v96_v24 = vpop.xlane.xlu0 %95  ;;  %v286_v25 = vadd.f32 %v7910_v54, %v266_v28  ;;  %v287_v26 = vadd.f32 %v7910_v54, %v267_v16  ;;  %v248_v27 = vmul.f32 %v7074_v15, %v7786_v29 }
 0x13a   :  { %v114_v30 = vmul.f32 0.03125, %v93_v23  ;;  %v115_v62 = vmul.f32 0.03125, %v96_v24  ;;  %v144_v63 = vmul.f32 %v7932_v21, %v7932_v21  ;;  %v145_v31 = vmul.f32 %v7935_v18, %v7935_v18 }
 0x13b   :  { %v7078_v32 = vpop.eup %7077  ;;  %6428 = vmatmul.mubr.msk.f32.vlgmr.msra.gmra.mxu0 %vm51_vm0, %v286_v25  ;;  %6460 = vmatmul.mubr.msk.f32.vlgmr.msra.gmra.mxu1 %vm51_vm0, %v286_v25  ;;  %v268_v33 = vmul.f32 %v7902_v52, %v248_v27  ;;  %v249_v34 = vmul.f32 %v7076_v17, %v7794_v38 }
 0x13c   :  { %v7080_v35 = vpop.eup %7079  ;;  %v7951_v29 = vsub.f32 %v7854_v2, %v114_v30  ;;  %v7954_v36 = vsub.f32 %v7859_v3, %v115_v62  ;;  %6430 = vmatprep.mubr.msk.f32.mxu0 %vm51_vm0, %v287_v26  ;;  %6462 = vmatprep.mubr.msk.f32.mxu1 %vm51_vm0, %v287_v26  ;;  %v182_v37 = vsel %vm51_vm0, %v144_v63, 0.0  ;;  %v185_v40 = vsel %vm51_vm0, %v145_v31, 0.0 }
 0x13d   :  { %183 = vadd.xlane.f32.xlu1 %v182_v37  ;;  %v99_v41 = vpop.xlane.xlu1 %98  ;;  %186 = vadd.xlane.f32.xlu0 %v185_v40  ;;  %v288_v38 = vadd.f32 %v7910_v54, %v268_v33  ;;  %v269_v42 = vmul.f32 %v7902_v52, %v249_v34  ;;  %v250_v2 = vmul.f32 %v7078_v32, %v7796_v39 }
 0x13e   :  { %v116_v43 = vmul.f32 0.03125, %v99_v41  ;;  %v146_v3 = vmul.f32 %v7951_v29, %v7951_v29  ;;  %v147_v44 = vmul.f32 %v7954_v36, %v7954_v36  ;;  %v251_v45 = vmul.f32 %v7080_v35, %v7804_v48 }
 0x13f   :  { %v7082_v46 = vpop.eup %7081  ;;  %6431 = vmatmul.mubr.msk.f32.gmra.mxu0 %vm51_vm0, %v288_v38  ;;  %6463 = vmatmul.mubr.msk.f32.gmra.mxu1 %vm51_vm0, %v288_v38  ;;  %v289_v47 = vadd.f32 %v7910_v54, %v269_v42  ;;  %v270_v50 = vmul.f32 %v7902_v52, %v250_v2 }
 0x140   :  { %v7973_v39 = vsub.f32 %v7868_v6, %v116_v43  ;;  %v188_v53 = vsel %vm51_vm0, %v146_v3, 0.0  ;;  %v191_v55 = vsel %vm51_vm0, %v147_v44, 0.0  ;;  %v271_v56 = vmul.f32 %v7902_v52, %v251_v45 }
 0x141   :  { %6433 = vmatprep.mubr.msk.f32.mxu0 %vm51_vm0, %v289_v47  ;;  %6465 = vmatprep.mubr.msk.f32.mxu1 %vm51_vm0, %v289_v47  ;;  %v290_v48 = vadd.f32 %v7910_v54, %v270_v50  ;;  %v252_v57 = vmul.f32 %v7082_v46, %v7806_v49 }
 0x142   :  { %189 = vadd.xlane.f32.xlu1 %v188_v53  ;;  %192 = vadd.xlane.f32.xlu0 %v191_v55  ;;  %v291_v60 = vadd.f32 %v7910_v54, %v271_v56  ;;  %v148_v6 = vmul.f32 %v7973_v39, %v7973_v39 }
 0x143   :  { %6434 = vmatmul.mubr.msk.f32.gmra.mxu0 %vm51_vm0, %v290_v48  ;;  %6466 = vmatmul.mubr.msk.f32.gmra.mxu1 %vm51_vm0, %v290_v48  ;;  %v272_v61 = vmul.f32 %v7902_v52, %v252_v57 }
 0x144   :  { %6436 = vmatprep.mubr.msk.f32.mxu0 %vm51_vm0, %v291_v60  ;;  %6468 = vmatprep.mubr.msk.f32.mxu1 %vm51_vm0, %v291_v60  ;;  %v194_v0 = vsel %vm51_vm0, %v148_v6, 0.0  ;;  %v8035_v60 = vld [vmem:[%s11548_s1] sm:$0xff] }
 0x145   :  { %v292_v49 = vadd.f32 %v7910_v54, %v272_v61 }
 0x146   :  { %195 = vadd.xlane.f32.xlu1 %v194_v0 }
 0x147   :  { %6437 = vmatmul.mubr.msk.f32.gmra.mxu0 %vm51_vm0, %v292_v49  ;;  %6469 = vmatmul.mubr.msk.f32.gmra.mxu1 %vm51_vm0, %v292_v49 }
 0x1be   :  { %v175_v1 = vpop.xlane.xlu0 %174 }
 0x1bf   :  { %v205_v4 = vmul.f32 0.03125, %v175_v1 }
 0x1c1   :  { %v221_v7 = vadd.f32 1e-05, %v205_v4 }
 0x1c2   :  { %v178_v8 = vpop.xlane.xlu1 %177  ;;  %v181_v9 = vpop.xlane.xlu0 %180 }
 0x1c3   :  { %7083 = vrsqrt.f32 %v221_v7  ;;  %v206_v10 = vmul.f32 0.03125, %v178_v8  ;;  %v207_v11 = vmul.f32 0.03125, %v181_v9 }
 0x1c5   :  { %v222_v12 = vadd.f32 1e-05, %v206_v10  ;;  %v223_v13 = vadd.f32 1e-05, %v207_v11 }
 0x1c6   :  { %v184_v14 = vpop.xlane.xlu1 %183  ;;  %v187_v58 = vpop.xlane.xlu0 %186 }
 0x1c7   :  { %7085 = vrsqrt.f32 %v222_v12  ;;  %v208_v59 = vmul.f32 0.03125, %v184_v14  ;;  %v209_v15 = vmul.f32 0.03125, %v187_v58  ;;  %v8087_v14 = vld [vmem:[%s11548_s1 + $0x8] sm:$0xff] }
 0x1c8   :  { %7087 = vrsqrt.f32 %v223_v13  ;;  %v8092_v58 = vld [vmem:[%s11548_s1 + $0x1c8] sm:$0xff] }
 0x1c9   :  { %v224_v28 = vadd.f32 1e-05, %v208_v59  ;;  %v225_v16 = vadd.f32 1e-05, %v209_v15  ;;  %11658 = vst [vmem:[#allocation3_spill] sm:$0xff] %v8092_v58  ;;  %v8097_v59 = vld [vmem:[%s11548_s1 + $0x10] sm:$0xff] }
 0x1ca   :  { %v8102_v15 = vld [vmem:[%s11548_s1 + $0x1d0] sm:$0xff] }
 0x1cb   :  { %7089 = vrsqrt.f32 %v224_v28  ;;  %v190_v17 = vpop.xlane.xlu1 %189  ;;  %v193_v19 = vpop.xlane.xlu0 %192  ;;  %11659 = vst [vmem:[#allocation4_spill] sm:$0xff] %v8102_v15 }
 0x1cc   :  { %7091 = vrsqrt.f32 %v225_v16  ;;  %v210_v22 = vmul.f32 0.03125, %v190_v17  ;;  %v211_v23 = vmul.f32 0.03125, %v193_v19  ;;  %v8113_v16 = vld [vmem:[%s11548_s1 + $0x18] sm:$0xff]  ;;  %v8120_v17 = vld [vmem:[%s11548_s1 + $0x20] sm:$0xff] }
 0x1cd   :  { %v8125_v19 = vld [vmem:[%s11548_s1 + $0x1d8] sm:$0xff] }
 0x1ce   :  { %v226_v24 = vadd.f32 1e-05, %v210_v22  ;;  %v227_v25 = vadd.f32 1e-05, %v211_v23  ;;  %11660 = vst [vmem:[#allocation5_spill] sm:$0xff] %v8125_v19  ;;  %v8132_v22 = vld [vmem:[%s11548_s1 + $0x1e0] sm:$0xff] }
 0x1cf   :  { %v196_v26 = vpop.xlane.xlu1 %195  ;;  %11661 = vst [vmem:[#allocation6_spill] sm:$0xff] %v8132_v22  ;;  %v8139_v23 = vld [vmem:[%s11548_s1 + $0x28] sm:$0xff] }
 0x1d0   :  { %v7084_v27 = vpop.eup %7083  ;;  %7093 = vrsqrt.f32 %v226_v24  ;;  %v212_v30 = vmul.f32 0.03125, %v196_v26  ;;  %v8146_v24 = vld [vmem:[%s11548_s1 + $0x30] sm:$0xff] }
 0x1d1   :  { %7095 = vrsqrt.f32 %v227_v25  ;;  %v253_v62 = vmul.f32 %v7084_v27, %v7897_v51  ;;  %v8153_v25 = vld [vmem:[%s11548_s1 + $0x1e8] sm:$0xff]  ;;  %v8160_v26 = vld [vmem:[%s11548_s1 + $0x1f0] sm:$0xff]  ;;  %v8167_v27 = vld [vmem:[%s11548_s1 + $0x38] sm:$0xff] }
 0x1d2   :  { %v228_v63 = vadd.f32 1e-05, %v212_v30  ;;  %11662 = vst [vmem:[#allocation7_spill] sm:$0xff] %v8153_v25  ;;  %11663 = vst [vmem:[#allocation8_spill] sm:$0xff] %v8160_v26  ;;  %v8174_v30 = vld [vmem:[%s11548_s1 + $0x40] sm:$0xff] }
 0x1d3   :  { %v273_v31 = vmul.f32 %v7902_v52, %v253_v62  ;;  %v8181_v62 = vld [vmem:[%s11548_s1 + $0x1f8] sm:$0xff] }
 0x1d4   :  { %v7086_v32 = vpop.eup %7085  ;;  %7097 = vrsqrt.f32 %v228_v63  ;;  %11664 = vst [vmem:[#allocation9_spill] sm:$0xff] %v8181_v62  ;;  %v8192_v63 = vld [vmem:[%s11548_s1 + $0x48] sm:$0xff] }
 0x1d5   :  { %v7088_v33 = vpop.eup %7087  ;;  %v293_v34 = vadd.f32 %v7910_v54, %v273_v31  ;;  %v254_v35 = vmul.f32 %v7086_v32, %v7914_v5  ;;  %v8200_v31 = vld [vmem:[%s11548_s1 + $0x50] sm:$0xff]  ;;  %v8210_v32 = vld [vmem:[%s11548_s1 + $0x58] sm:$0xff] }
 0x1d6   :  { %v255_v37 = vmul.f32 %v7088_v33, %v7917_v20  ;;  %v8215_v33 = vld [vmem:[%s11548_s1 + $0x60] sm:$0xff] }
 0x1d7   :  { %6439 = vmatprep.mubr.msk.f32.mxu0 %vm51_vm0, %v293_v34  ;;  %6471 = vmatprep.mubr.msk.f32.mxu1 %vm51_vm0, %v293_v34  ;;  %v274_v40 = vmul.f32 %v7902_v52, %v254_v35  ;;  %v8224_v34 = vld [vmem:[%s11548_s1 + $0x68] sm:$0xff]  ;;  %v8229_v35 = vld [vmem:[%s11548_s1 + $0x70] sm:$0xff] }
 0x1d8   :  { %v7090_v41 = vpop.eup %7089  ;;  %v275_v51 = vmul.f32 %v7902_v52, %v255_v37  ;;  %v8238_v37 = vld [vmem:[%s11548_s1 + $0x78] sm:$0xff] }
 0x1d9   :  { %v7092_v38 = vpop.eup %7091  ;;  %v294_v42 = vadd.f32 %v7910_v54, %v274_v40  ;;  %v256_v2 = vmul.f32 %v7090_v41, %v7932_v21  ;;  %v8243_v40 = vld [vmem:[%s11548_s1 + $0x80] sm:$0xff]  ;;  %v8252_v41 = vld [vmem:[%s11548_s1 + $0x88] sm:$0xff] }
 0x1da   :  { %v295_v43 = vadd.f32 %v7910_v54, %v275_v51  ;;  %v257_v5 = vmul.f32 %v7092_v38, %v7935_v18  ;;  %v8257_v51 = vld [vmem:[%s11548_s1 + $0x90] sm:$0xff]  ;;  %v8266_v38 = vld [vmem:[%s11548_s1 + $0x98] sm:$0xff] }
 0x1db   :  { %6440 = vmatmul.mubr.msk.f32.gmra.mxu0 %vm51_vm0, %v294_v42  ;;  %6472 = vmatmul.mubr.msk.f32.gmra.mxu1 %vm51_vm0, %v294_v42  ;;  %v276_v20 = vmul.f32 %v7902_v52, %v256_v2  ;;  %v8271_v42 = vld [vmem:[%s11548_s1 + $0xa0] sm:$0xff]  ;;  %v8280_v2 = vld [vmem:[%s11548_s1 + $0xa8] sm:$0xff] }
 0x1dc   :  { %6442 = vmatprep.mubr.msk.f32.mxu0 %vm51_vm0, %v295_v43  ;;  %6474 = vmatprep.mubr.msk.f32.mxu1 %vm51_vm0, %v295_v43  ;;  %v277_v3 = vmul.f32 %v7902_v52, %v257_v5  ;;  %v8285_v43 = vld [vmem:[%s11548_s1 + $0xb0] sm:$0xff]  ;;  %v8294_v5 = vld [vmem:[%s11548_s1 + $0xb8] sm:$0xff] }
 0x1dd   :  { %v7094_v44 = vpop.eup %7093  ;;  %v296_v45 = vadd.f32 %v7910_v54, %v276_v20  ;;  %v8299_v20 = vld [vmem:[%s11548_s1 + $0xc0] sm:$0xff] }
 0x1de   :  { %v7096_v21 = vpop.eup %7095  ;;  %v297_v46 = vadd.f32 %v7910_v54, %v277_v3  ;;  %v258_v18 = vmul.f32 %v7094_v44, %v7951_v29  ;;  %v8308_v3 = vld [vmem:[%s11548_s1 + $0xc8] sm:$0xff]  ;;  %v8313_v44 = vld [vmem:[%s11548_s1 + $0xd0] sm:$0xff] }
 0x1df   :  { %6443 = vmatmul.mubr.msk.f32.gmra.mxu0 %vm51_vm0, %v296_v45  ;;  %6475 = vmatmul.mubr.msk.f32.gmra.mxu1 %vm51_vm0, %v296_v45  ;;  %v259_v47 = vmul.f32 %v7096_v21, %v7954_v36  ;;  %v8322_v45 = vld [vmem:[%s11548_s1 + $0xd8] sm:$0xff]  ;;  %v8327_v21 = vld [vmem:[%s11548_s1 + $0xe0] sm:$0xff] }
 0x1e0   :  { %6445 = vmatprep.mubr.msk.f32.mxu0 %vm51_vm0, %v297_v46  ;;  %6477 = vmatprep.mubr.msk.f32.mxu1 %vm51_vm0, %v297_v46  ;;  %v278_v50 = vmul.f32 %v7902_v52, %v258_v18  ;;  %v8336_v46 = vld [vmem:[%s11548_s1 + $0xe8] sm:$0xff]  ;;  %v8341_v18 = vld [vmem:[%s11548_s1 + $0xf0] sm:$0xff] }
 0x1e1   :  { %v7098_v53 = vpop.eup %7097  ;;  %v279_v55 = vmul.f32 %v7902_v52, %v259_v47  ;;  %v8350_v47 = vld [vmem:[%s11548_s1 + $0xf8] sm:$0xff] }
 0x1e2   :  { %v298_v56 = vadd.f32 %v7910_v54, %v278_v50  ;;  %v260_v48 = vmul.f32 %v7098_v53, %v7973_v39  ;;  %v8040_v39 = vld [vmem:[%s11548_s1 + $0x1c0] sm:$0xff]  ;;  %v8364_v53 = vld [vmem:[%s11548_s1 + $0x108] sm:$0xff] }
 0x1e3   :  { %v299_v29 = vadd.f32 %v7910_v54, %v279_v55  ;;  %11657 = vst [vmem:[#allocation2_spill] sm:$0xff] %v8040_v39  ;;  %v8355_v50 = vld [vmem:[%s11548_s1 + $0x100] sm:$0xff]  ;;  %v8369_v55 = vld [vmem:[%s11548_s1 + $0x110] sm:$0xff] }
 0x1e4   :  { %6446 = vmatmul.mubr.msk.f32.gmra.mxu0 %vm51_vm0, %v298_v56  ;;  %6478 = vmatmul.mubr.msk.f32.gmra.mxu1 %vm51_vm0, %v298_v56  ;;  %v280_v36 = vmul.f32 %v7902_v52, %v260_v48  ;;  %v8378_v56 = vld [vmem:[%s11548_s1 + $0x118] sm:$0xff]  ;;  %v8383_v48 = vld [vmem:[%s11548_s1 + $0x120] sm:$0xff] }
 0x1e5   :  { %6448 = vmatprep.mubr.msk.f32.mxu0 %vm51_vm0, %v299_v29  ;;  %6480 = vmatprep.mubr.msk.f32.mxu1 %vm51_vm0, %v299_v29  ;;  %v8392_v29 = vld [vmem:[%s11548_s1 + $0x128] sm:$0xff] }
 0x1e6   :  { %v300_v57 = vadd.f32 %v7910_v54, %v280_v36  ;;  %v8397_v36 = vld [vmem:[%s11548_s1 + $0x130] sm:$0xff] }
 0x1e8   :  { %6449 = vmatmul.mubr.msk.f32.gmra.mxu0 %vm51_vm0, %v300_v57  ;;  %6481 = vmatmul.mubr.msk.f32.gmra.mxu1 %vm51_vm0, %v300_v57  ;;  %v8406_v57 = vld [vmem:[%s11548_s1 + $0x138] sm:$0xff] }
 0x1e9   :  { %6499 = vmatprep.mubr.msk.f32.mxu0 %vm51_vm0, %v8035_v60  ;;  %6583 = vmatprep.mubr.msk.f32.mxu1 %vm51_vm0, %v8040_v39 }
 0x1fb   :  { %v6429_v52 = vpop.f32.mrf.mxu0  ;;  %v8054_v7 = vpop.f32.mrf.mxu1 }
 0x1fd   :  { %v419_v54 = vpop.f32.mrf.mxu0  ;;  %v8060_v8 = vpop.f32.mrf.mxu1 }
 0x1ff   :  { %v6432_v6 = vpop.f32.mrf.mxu0  ;;  %v6464_v9 = vpop.f32.mrf.mxu1 }
 0x201   :  { %v429_v61 = vpop.f32.mrf.mxu0  ;;  %v579_v10 = vpop.f32.mrf.mxu1 }
 0x203   :  { %v6435_v0 = vpop.f32.mrf.mxu0  ;;  %v6467_v11 = vpop.f32.mrf.mxu1 }
 0x205   :  { %v439_v49 = vpop.f32.mrf.mxu0  ;;  %v589_v12 = vpop.f32.mrf.mxu1 }
 0x207   :  { %v6438_v1 = vpop.f32.mrf.mxu0  ;;  %v6470_v13 = vpop.f32.mrf.mxu1 }
 0x208   :  { %6483 = vmatprep.subr.msk.mxu0 %vm51_vm0, %v6438_v1  ;;  %7051 = vmatprep.subr.msk.mxu1 %vm51_vm0, %v6438_v1 }
 0x209   :  { %v449_v4 = vpop.f32.mrf.mxu0  ;;  %6484 = vmatpush3.xpose.msk.msra.mxu0 %vm51_vm0, %v6438_v1  ;;  %7059 = vmatpush3.xpose.msk.msra.mxu1 %vm51_vm0, %v6438_v1  ;;  %v599_v28 = vpop.f32.mrf.mxu1  ;;  %v8453_v1 = vld [vmem:[%s11548_s1 + $0x170] sm:$0xff] }
 0x20a   :  { %6485 = vmatprep.subr.msk.mxu0 %vm51_vm0, %v449_v4  ;;  %7052 = vmatprep.subr.msk.mxu1 %vm51_vm0, %v449_v4 }
 0x20d   :  { %6486 = vmatpush3.xpose.msk.msra.mxu0 %vm51_vm0, %v449_v4  ;;  %7060 = vmatpush3.xpose.msk.msra.mxu1 %vm51_vm0, %v449_v4  ;;  %v8462_v4 = vld [vmem:[%s11548_s1 + $0x178] sm:$0xff] }
 0x20e   :  { %6487 = vmatprep.subr.msk.mxu0 %vm51_vm0, %v6435_v0  ;;  %7053 = vmatprep.subr.msk.mxu1 %vm51_vm0, %v6435_v0 }
 0x211   :  { %6488 = vmatpush3.xpose.msk.msra.mxu0 %vm51_vm0, %v6435_v0  ;;  %7061 = vmatpush3.xpose.msk.msra.mxu1 %vm51_vm0, %v6435_v0  ;;  %v8439_v0 = vld [vmem:[%s11548_s1 + $0x160] sm:$0xff] }
 0x212   :  { %6489 = vmatprep.subr.msk.mxu0 %vm51_vm0, %v439_v49  ;;  %7054 = vmatprep.subr.msk.mxu1 %vm51_vm0, %v439_v49 }
 0x215   :  { %6490 = vmatpush3.xpose.msk.msra.mxu0 %vm51_vm0, %v439_v49  ;;  %7062 = vmatpush3.xpose.msk.msra.mxu1 %vm51_vm0, %v439_v49  ;;  %v8448_v49 = vld [vmem:[%s11548_s1 + $0x168] sm:$0xff] }
 0x216   :  { %6491 = vmatprep.subr.msk.mxu0 %vm51_vm0, %v6432_v6  ;;  %7055 = vmatprep.subr.msk.mxu1 %vm51_vm0, %v6432_v6 }
 0x219   :  { %6492 = vmatpush3.xpose.msk.msra.mxu0 %vm51_vm0, %v6432_v6  ;;  %7063 = vmatpush3.xpose.msk.msra.mxu1 %vm51_vm0, %v6432_v6  ;;  %v8425_v6 = vld [vmem:[%s11548_s1 + $0x150] sm:$0xff] }
 0x21a   :  { %6493 = vmatprep.subr.msk.mxu0 %vm51_vm0, %v429_v61  ;;  %7056 = vmatprep.subr.msk.mxu1 %vm51_vm0, %v429_v61 }
 0x21d   :  { %6494 = vmatpush3.xpose.msk.msra.mxu0 %vm51_vm0, %v429_v61  ;;  %7064 = vmatpush3.xpose.msk.msra.mxu1 %vm51_vm0, %v429_v61  ;;  %v8434_v61 = vld [vmem:[%s11548_s1 + $0x158] sm:$0xff] }
 0x21e   :  { %6495 = vmatprep.subr.msk.mxu0 %vm51_vm0, %v6429_v52  ;;  %7057 = vmatprep.subr.msk.mxu1 %vm51_vm0, %v6429_v52 }
 0x221   :  { %6496 = vmatpush3.xpose.msk.msra.mxu0 %vm51_vm0, %v6429_v52  ;;  %7065 = vmatpush3.xpose.msk.msra.mxu1 %vm51_vm0, %v6429_v52  ;;  %v8411_v52 = vld [vmem:[%s11548_s1 + $0x140] sm:$0xff] }
 0x222   :  { %6497 = vmatprep.subr.msk.mxu0 %vm51_vm0, %v419_v54  ;;  %7058 = vmatprep.subr.msk.mxu1 %vm51_vm0, %v419_v54 }
 0x225   :  { %6498 = vmatpush3.xpose.msk.msra.mxu0 %vm51_vm0, %v419_v54  ;;  %7066 = vmatpush3.xpose.msk.msra.mxu1 %vm51_vm0, %v419_v54  ;;  %v8420_v54 = vld [vmem:[%s11548_s1 + $0x148] sm:$0xff] }
 0x226   :  { %6595 = vmatprep.subr.mxu1 %v6470_v13 }
 0x228   :  { %6500 = vmatmul.mubr.msk.f32.vlgmr.msra.gmra.mxu0 %vm51_vm0, %v8087_v14  ;;  %6584 = vmatmul.mubr.msk.f32.vlgmr.msra.gmra.mxu1 %vm51_vm0, %v8092_v58 }
 0x229   :  { %6596 = vmatpush3.msra.mxu1 %v6470_v13  ;;  %6502 = vmatprep.mubr.msk.f32.mxu0 %vm51_vm0, %v8097_v59  ;;  %v8509_v13 = vld [vmem:[%s11548_s1 + $0x1b0] sm:$0xff] }
 0x22a   :  { %6597 = vmatprep.subr.mxu1 %v599_v28  ;;  %6586 = vmatprep.mubr.msk.f32.mxu1 %vm51_vm0, %v8102_v15  ;;  %11668 = vst [vmem:[#allocation13_spill] sm:$0xff] %v8509_v13 }
 0x22b   :  { %6598 = vmatpush3.msra.mxu1 %v599_v28  ;;  %v8518_v28 = vld [vmem:[%s11548_s1 + $0x1b8] sm:$0xff] }
 0x22c   :  { %6599 = vmatprep.subr.mxu1 %v6467_v11  ;;  %6503 = vmatmul.mubr.msk.f32.gmra.mxu0 %vm51_vm0, %v8113_v16  ;;  %11669 = vst [vmem:[#allocation14_spill] sm:$0xff] %v8518_v28 }
 0x22d   :  { %6600 = vmatpush3.msra.mxu1 %v6467_v11  ;;  %6505 = vmatprep.mubr.msk.f32.mxu0 %vm51_vm0, %v8120_v17  ;;  %v8495_v11 = vld [vmem:[%s11548_s1 + $0x1a0] sm:$0xff] }
 0x22e   :  { %6601 = vmatprep.subr.mxu1 %v589_v12  ;;  %6587 = vmatmul.mubr.msk.f32.gmra.mxu1 %vm51_vm0, %v8125_v19  ;;  %11666 = vst [vmem:[#allocation11_spill] sm:$0xff] %v8495_v11 }
 0x22f   :  { %6602 = vmatpush3.msra.mxu1 %v589_v12  ;;  %6589 = vmatprep.mubr.msk.f32.mxu1 %vm51_vm0, %v8132_v22  ;;  %v8504_v12 = vld [vmem:[%s11548_s1 + $0x1a8] sm:$0xff] }
 0x230   :  { %6603 = vmatprep.subr.mxu1 %v6464_v9  ;;  %6506 = vmatmul.mubr.msk.f32.gmra.mxu0 %vm51_vm0, %v8139_v23  ;;  %11667 = vst [vmem:[#allocation12_spill] sm:$0xff] %v8504_v12 }
 0x231   :  { %6604 = vmatpush3.msra.mxu1 %v6464_v9  ;;  %6508 = vmatprep.mubr.msk.f32.mxu0 %vm51_vm0, %v8146_v24  ;;  %v8481_v9 = vld [vmem:[%s11548_s1 + $0x190] sm:$0xff] }
 0x232   :  { %6605 = vmatprep.subr.mxu1 %v579_v10  ;;  %6590 = vmatmul.mubr.msk.f32.gmra.mxu1 %vm51_vm0, %v8153_v25 }
 0x233   :  { %6606 = vmatpush3.msra.mxu1 %v579_v10  ;;  %6592 = vmatprep.mubr.msk.f32.mxu1 %vm51_vm0, %v8160_v26  ;;  %v8490_v10 = vld [vmem:[%s11548_s1 + $0x198] sm:$0xff] }
 0x234   :  { %6607 = vmatprep.subr.mxu1 %v8054_v7  ;;  %6509 = vmatmul.mubr.msk.f32.gmra.mxu0 %vm51_vm0, %v8167_v27  ;;  %11665 = vst [vmem:[#allocation10_spill] sm:$0xff] %v8490_v10 }
 0x235   :  { %6608 = vmatpush3.msra.mxu1 %v8054_v7  ;;  %6511 = vmatprep.mubr.msk.f32.mxu0 %vm51_vm0, %v8174_v30  ;;  %v8467_v7 = vld [vmem:[%s11548_s1 + $0x180] sm:$0xff] }
 0x236   :  { %6609 = vmatprep.subr.mxu1 %v8060_v8  ;;  %6593 = vmatmul.mubr.msk.f32.gmra.mxu1 %vm51_vm0, %v8181_v62 }
 0x237   :  { %6610 = vmatpush3.msra.mxu1 %v8060_v8  ;;  %v8476_v8 = vld [vmem:[%s11548_s1 + $0x188] sm:$0xff] }
 0x238   :  { %6512 = vmatmul.mubr.msk.f32.gmra.mxu0 %vm51_vm0, %v8192_v63 }
 0x239   :  { %6514 = vmatprep.mubr.msk.f32.mxu0 %vm51_vm0, %v8200_v31 }
 0x23c   :  { %6515 = vmatmul.mubr.msk.f32.gmra.mxu0 %vm51_vm0, %v8210_v32 }
 0x23d   :  { %6517 = vmatprep.mubr.msk.f32.mxu0 %vm51_vm0, %v8215_v33 }
 0x240   :  { %6518 = vmatmul.mubr.msk.f32.gmra.mxu0 %vm51_vm0, %v8224_v34 }
 0x241   :  { %6520 = vmatprep.mubr.msk.f32.mxu0 %vm51_vm0, %v8229_v35 }
 0x244   :  { %6521 = vmatmul.mubr.msk.f32.gmra.mxu0 %vm51_vm0, %v8238_v37 }
 0x245   :  { %6523 = vmatprep.mubr.msk.f32.mxu0 %vm51_vm0, %v8243_v40 }
 0x248   :  { %6524 = vmatmul.mubr.msk.f32.gmra.mxu0 %vm51_vm0, %v8252_v41 }
 0x249   :  { %6526 = vmatprep.mubr.msk.f32.mxu0 %vm51_vm0, %v8257_v51 }
 0x24c   :  { %6527 = vmatmul.mubr.msk.f32.gmra.mxu0 %vm51_vm0, %v8266_v38 }
 0x24d   :  { %6529 = vmatprep.mubr.msk.f32.mxu0 %vm51_vm0, %v8271_v42 }
 0x250   :  { %6530 = vmatmul.mubr.msk.f32.gmra.mxu0 %vm51_vm0, %v8280_v2 }
 0x251   :  { %6532 = vmatprep.mubr.msk.f32.mxu0 %vm51_vm0, %v8285_v43 }
 0x254   :  { %6533 = vmatmul.mubr.msk.f32.gmra.mxu0 %vm51_vm0, %v8294_v5 }
 0x255   :  { %6535 = vmatprep.mubr.msk.f32.mxu0 %vm51_vm0, %v8299_v20 }
 0x258   :  { %6536 = vmatmul.mubr.msk.f32.gmra.mxu0 %vm51_vm0, %v8308_v3 }
 0x259   :  { %6538 = vmatprep.mubr.msk.f32.mxu0 %vm51_vm0, %v8313_v44 }
 0x25c   :  { %6539 = vmatmul.mubr.msk.f32.gmra.mxu0 %vm51_vm0, %v8322_v45 }
 0x25d   :  { %6541 = vmatprep.mubr.msk.f32.mxu0 %vm51_vm0, %v8327_v21 }
 0x260   :  { %6542 = vmatmul.mubr.msk.f32.gmra.mxu0 %vm51_vm0, %v8336_v46 }
 0x261   :  { %6544 = vmatprep.mubr.msk.f32.mxu0 %vm51_vm0, %v8341_v18 }
 0x264   :  { %6545 = vmatmul.mubr.msk.f32.gmra.mxu0 %vm51_vm0, %v8350_v47 }
 0x265   :  { %6547 = vmatprep.mubr.msk.f32.mxu0 %vm51_vm0, %v8355_v50 }
 0x268   :  { %6548 = vmatmul.mubr.msk.f32.gmra.mxu0 %vm51_vm0, %v8364_v53 }
 0x269   :  { %6550 = vmatprep.mubr.msk.f32.mxu0 %vm51_vm0, %v8369_v55 }
 0x26c   :  { %6551 = vmatmul.mubr.msk.f32.gmra.mxu0 %vm51_vm0, %v8378_v56 }
 0x26d   :  { %6553 = vmatprep.mubr.msk.f32.mxu0 %vm51_vm0, %v8383_v48 }
 0x270   :  { %6554 = vmatmul.mubr.msk.f32.gmra.mxu0 %vm51_vm0, %v8392_v29 }
 0x271   :  { %6556 = vmatprep.mubr.msk.f32.mxu0 %vm51_vm0, %v8397_v36 }
 0x274   :  { %6557 = vmatmul.mubr.msk.f32.gmra.mxu0 %vm51_vm0, %v8406_v57 }
 0x275   :  { %6559 = vmatprep.mubr.msk.f32.mxu0 %vm51_vm0, %v8411_v52 }
 0x278   :  { %6560 = vmatmul.mubr.msk.f32.gmra.mxu0 %vm51_vm0, %v8420_v54 }
 0x279   :  { %6562 = vmatprep.mubr.msk.f32.mxu0 %vm51_vm0, %v8425_v6 }
 0x27c   :  { %6563 = vmatmul.mubr.msk.f32.gmra.mxu0 %vm51_vm0, %v8434_v61 }
 0x27d   :  { %6565 = vmatprep.mubr.msk.f32.mxu0 %vm51_vm0, %v8439_v0 }
 0x280   :  { %6566 = vmatmul.mubr.msk.f32.gmra.mxu0 %vm51_vm0, %v8448_v49 }
 0x281   :  { %6568 = vmatprep.mubr.msk.f32.mxu0 %vm51_vm0, %v8453_v1 }
 0x284   :  { %6569 = vmatmul.mubr.msk.f32.gmra.mxu0 %vm51_vm0, %v8462_v4 }
 0x285   :  { %6571 = vmatprep.mubr.msk.f32.mxu0 %vm51_vm0, %v8467_v7 }
 0x288   :  { %6572 = vmatmul.mubr.msk.f32.gmra.mxu0 %vm51_vm0, %v8476_v8 }
 0x289   :  { %6574 = vmatprep.mubr.msk.f32.mxu0 %vm51_vm0, %v8481_v9 }
 0x28c   :  { %6575 = vmatmul.mubr.msk.f32.gmra.mxu0 %vm51_vm0, %v8490_v10 }
 0x28d   :  { %6577 = vmatprep.mubr.msk.f32.mxu0 %vm51_vm0, %v8495_v11 }
 0x290   :  { %6578 = vmatmul.mubr.msk.f32.gmra.mxu0 %vm51_vm0, %v8504_v12 }
 0x291   :  { %6580 = vmatprep.mubr.msk.f32.mxu0 %vm51_vm0, %v8509_v13 }
 0x294   :  { %6581 = vmatmul.mubr.msk.f32.gmra.mxu0 %vm51_vm0, %v8518_v28 }
 0x295   :  { %6723 = vmatprep.mubr.msk.f32.mxu0 %vm51_vm0, %v8035_v60 }
 0x29b   :  { %v6441_v62 = vpop.f32.mrf.mxu0  ;;  %v8524_v26 = vpop.f32.mrf.mxu1 }
 0x29d   :  { %v459_v25 = vpop.f32.mrf.mxu0  ;;  %v8526_v22 = vpop.f32.mrf.mxu1 }
 0x29e   :  { %11670 = vst [vmem:[#allocation15_spill] sm:$0xff] %v8526_v22 }
 0x29f   :  { %v6444_v19 = vpop.f32.mrf.mxu0  ;;  %v8528_v15 = vpop.f32.mrf.mxu1 }
 0x2a1   :  { %v469_v58 = vpop.f32.mrf.mxu0  ;;  %v8530_v39 = vpop.f32.mrf.mxu1 }
 0x2a4   :  { %v6447_v13 = vpop.f32.mrf.mxu0  ;;  %v8532_v12 = vpop.f32.mrf.mxu1 }
 0x2a6   :  { %v479_v11 = vpop.f32.mrf.mxu0  ;;  %v8534_v28 = vpop.f32.mrf.mxu1 }
 0x2a8   :  { %v6450_v10 = vpop.f32.mrf.mxu0  ;;  %v8536_v60 = vpop.f32.mrf.mxu1 }
 0x2a9   :  { %6707 = vmatprep.subr.msk.mxu0 %vm51_vm0, %v6450_v10  ;;  %6819 = vmatprep.subr.mxu1 %v8536_v60 }
 0x2aa   :  { %v489_v22 = vpop.f32.mrf.mxu0  ;;  %6708 = vmatpush3.xpose.msk.msra.mxu0 %vm51_vm0, %v6450_v10 }
 0x2ab   :  { %6709 = vmatprep.subr.msk.mxu0 %vm51_vm0, %v489_v22 }
 0x2ae   :  { %6710 = vmatpush3.xpose.msk.msra.mxu0 %vm51_vm0, %v489_v22 }
 0x2af   :  { %6711 = vmatprep.subr.msk.mxu0 %vm51_vm0, %v6447_v13 }
 0x2b2   :  { %6712 = vmatpush3.xpose.msk.msra.mxu0 %vm51_vm0, %v6447_v13 }
 0x2b3   :  { %6713 = vmatprep.subr.msk.mxu0 %vm51_vm0, %v479_v11 }
 0x2b6   :  { %6714 = vmatpush3.xpose.msk.msra.mxu0 %vm51_vm0, %v479_v11 }
 0x2b7   :  { %6715 = vmatprep.subr.msk.mxu0 %vm51_vm0, %v6444_v19 }
 0x2ba   :  { %6716 = vmatpush3.xpose.msk.msra.mxu0 %vm51_vm0, %v6444_v19 }
 0x2bb   :  { %6717 = vmatprep.subr.msk.mxu0 %vm51_vm0, %v469_v58 }
 0x2be   :  { %6718 = vmatpush3.xpose.msk.msra.mxu0 %vm51_vm0, %v469_v58 }
 0x2bf   :  { %6719 = vmatprep.subr.msk.mxu0 %vm51_vm0, %v6441_v62 }
 0x2c2   :  { %6720 = vmatpush3.xpose.msk.msra.mxu0 %vm51_vm0, %v6441_v62 }
 0x2c3   :  { %6721 = vmatprep.subr.msk.mxu0 %vm51_vm0, %v459_v25 }
 0x2c6   :  { %6722 = vmatpush3.xpose.msk.msra.mxu0 %vm51_vm0, %v459_v25 }
 0x2c9   :  { %6724 = vmatmul.mubr.msk.f32.vlgmr.msra.gmra.mxu0 %vm51_vm0, %v8087_v14  ;;  %v8585_v14 = vpop.f32.mrf.mxu1 }
 0x2ca   :  { %6726 = vmatprep.mubr.msk.f32.mxu0 %vm51_vm0, %v8097_v59 }
 0x2cd   :  { %6727 = vmatmul.mubr.msk.f32.gmra.mxu0 %vm51_vm0, %v8113_v16 }
 0x2ce   :  { %6729 = vmatprep.mubr.msk.f32.mxu0 %vm51_vm0, %v8120_v17 }
 0x2d1   :  { %6730 = vmatmul.mubr.msk.f32.gmra.mxu0 %vm51_vm0, %v8139_v23 }
 0x2d2   :  { %6732 = vmatprep.mubr.msk.f32.mxu0 %vm51_vm0, %v8146_v24 }
 0x2d5   :  { %6733 = vmatmul.mubr.msk.f32.gmra.mxu0 %vm51_vm0, %v8167_v27 }
 0x2d6   :  { %6735 = vmatprep.mubr.msk.f32.mxu0 %vm51_vm0, %v8174_v30 }
 0x2d9   :  { %6736 = vmatmul.mubr.msk.f32.gmra.mxu0 %vm51_vm0, %v8192_v63 }
 0x2da   :  { %6738 = vmatprep.mubr.msk.f32.mxu0 %vm51_vm0, %v8200_v31 }
 0x2dd   :  { %6739 = vmatmul.mubr.msk.f32.gmra.mxu0 %vm51_vm0, %v8210_v32 }
 0x2de   :  { %6741 = vmatprep.mubr.msk.f32.mxu0 %vm51_vm0, %v8215_v33 }
 0x2e1   :  { %6742 = vmatmul.mubr.msk.f32.gmra.mxu0 %vm51_vm0, %v8224_v34 }
 0x2e2   :  { %6744 = vmatprep.mubr.msk.f32.mxu0 %vm51_vm0, %v8229_v35 }
 0x2e5   :  { %6745 = vmatmul.mubr.msk.f32.gmra.mxu0 %vm51_vm0, %v8238_v37 }
 0x2e6   :  { %6747 = vmatprep.mubr.msk.f32.mxu0 %vm51_vm0, %v8243_v40 }
 0x2e8   :  { %v8589_v58 = vpop.f32.mrf.mxu0  ;;  %v8591_v59 = vpop.f32.mrf.mxu1 }
 0x2e9   :  { %11671 = vst [vmem:[#allocation16_spill] sm:$0xff] %v8591_v59  ;;  %6748 = vmatmul.mubr.msk.f32.gmra.mxu0 %vm51_vm0, %v8252_v41  ;;  %v1325_v16 = vsel %vm1321_vm1, %v8589_v58, -inf  ;;  %v1493_v23 = vsel %vm1321_vm1, %v8591_v59, -inf }
 0x2ea   :  { %1326 = vmax.xlane.f32.xlu1 %v1325_v16  ;;  %v8597_v17 = vpop.f32.mrf.mxu0  ;;  %6750 = vmatprep.mubr.msk.f32.mxu0 %vm51_vm0, %v8257_v51  ;;  %v8601_v19 = vpop.f32.mrf.mxu1 }
 0x2eb   :  { %11672 = vst [vmem:[#allocation17_spill] sm:$0xff] %v8601_v19  ;;  %v1322_v22 = vsel %vm1321_vm1, %v8597_v17, -inf  ;;  %v1490_v25 = vsel %vm1321_vm1, %v8601_v19, -inf }
 0x2ec   :  { %1323 = vmax.xlane.f32.xlu0 %v1322_v22  ;;  %v8607_v24 = vpop.f32.mrf.mxu0 }
 0x2ed   :  { %6751 = vmatmul.mubr.msk.f32.gmra.mxu0 %vm51_vm0, %v8266_v38  ;;  %v1331_v62 = vsel %vm1321_vm1, %v8607_v24, -inf }
 0x2ee   :  { %1494 = vmax.xlane.f32.xlu1 %v1493_v23  ;;  %6753 = vmatprep.mubr.msk.f32.mxu0 %vm51_vm0, %v8271_v42  ;;  %v8615_v27 = vpop.f32.mrf.mxu0  ;;  %v8617_v30 = vpop.f32.mrf.mxu1 }
 0x2ef   :  { %11673 = vst [vmem:[#allocation18_spill] sm:$0xff] %v8617_v30  ;;  %v1328_v31 = vsel %vm1321_vm1, %v8615_v27, -inf  ;;  %v1499_v34 = vsel %vm1321_vm1, %v8617_v30, -inf  ;;  %v11695_v30 = vld [vmem:[#allocation9_spill] sm:$0xff] }
 0x2f0   :  { %1491 = vmax.xlane.f32.xlu0 %v1490_v25  ;;  %v8621_v63 = vpop.f32.mrf.mxu0  ;;  %v8629_v32 = vpop.f32.mrf.mxu1 }
 0x2f1   :  { %6754 = vmatmul.mubr.msk.f32.gmra.mxu0 %vm51_vm0, %v8280_v2  ;;  %11674 = vst [vmem:[#allocation19_spill] sm:$0xff] %v8629_v32  ;;  %v1496_v37 = vsel %vm1321_vm1, %v8629_v32, -inf  ;;  %v1337_v51 = vsel %vm1321_vm1, %v8621_v63, -inf }
 0x2f2   :  { %1332 = vmax.xlane.f32.xlu1 %v1331_v62  ;;  %6756 = vmatprep.mubr.msk.f32.mxu0 %vm51_vm0, %v8285_v43  ;;  %v8631_v33 = vpop.f32.mrf.mxu0  ;;  %v8643_v40 = vpop.f32.mrf.mxu1 }
 0x2f3   :  { %11675 = vst [vmem:[#allocation20_spill] sm:$0xff] %v8643_v40  ;;  %v1334_v42 = vsel %vm1321_vm1, %v8631_v33, -inf }
 0x2f4   :  { %1329 = vmax.xlane.f32.xlu0 %v1328_v31  ;;  %v8635_v35 = vpop.f32.mrf.mxu0  ;;  %v8655_v2 = vpop.f32.mrf.mxu1 }
 0x2f5   :  { %6757 = vmatmul.mubr.msk.f32.gmra.mxu0 %vm51_vm0, %v8294_v5  ;;  %11676 = vst [vmem:[#allocation21_spill] sm:$0xff] %v8655_v2  ;;  %v1505_v5 = vsel %vm1321_vm1, %v8643_v40, -inf  ;;  %v1343_v11 = vsel %vm1321_vm1, %v8635_v35, -inf  ;;  %v11691_v40 = vld [vmem:[#allocation7_spill] sm:$0xff] }
 0x2f6   :  { %1500 = vmax.xlane.f32.xlu1 %v1499_v34  ;;  %6759 = vmatprep.mubr.msk.f32.mxu0 %vm51_vm0, %v8299_v20  ;;  %v8645_v41 = vpop.f32.mrf.mxu0  ;;  %v8669_v10 = vpop.f32.mrf.mxu1 }
 0x2f7   :  { %11677 = vst [vmem:[#allocation22_spill] sm:$0xff] %v8669_v10  ;;  %v1340_v16 = vsel %vm1321_vm1, %v8645_v41, -inf  ;;  %v1511_v22 = vsel %vm1321_vm1, %v8669_v10, -inf  ;;  %v11688_v10 = vld [vmem:[#allocation5_spill] sm:$0xff] }
 0x2f8   :  { %1497 = vmax.xlane.f32.xlu0 %v1496_v37  ;;  %v8649_v38 = vpop.f32.mrf.mxu0 }
 0x2f9   :  { %6760 = vmatmul.mubr.msk.f32.gmra.mxu0 %vm51_vm0, %v8308_v3  ;;  %v1502_v3 = vsel %vm1321_vm1, %v8655_v2, -inf }
 0x2fa   :  { %1338 = vmax.xlane.f32.xlu1 %v1337_v51  ;;  %6762 = vmatprep.mubr.msk.f32.mxu0 %vm51_vm0, %v8313_v44  ;;  %v8659_v43 = vpop.f32.mrf.mxu0 }
 0x2fb   :  { %v1346_v31 = vsel %vm1321_vm1, %v8659_v43, -inf }
 0x2fc   :  { %1335 = vmax.xlane.f32.xlu0 %v1334_v42  ;;  %v8663_v20 = vpop.f32.mrf.mxu0 }
 0x2fd   :  { %6763 = vmatmul.mubr.msk.f32.gmra.mxu0 %vm51_vm0, %v8322_v45  ;;  %v8683_v45 = vpop.f32.mrf.mxu1 }
 0x2fe   :  { %1506 = vmax.xlane.f32.xlu1 %v1505_v5  ;;  %6765 = vmatprep.mubr.msk.f32.mxu0 %vm51_vm0, %v8327_v21  ;;  %v8673_v44 = vpop.f32.mrf.mxu0  ;;  %11678 = vst [vmem:[#allocation23_spill] sm:$0xff] %v8683_v45  ;;  %v1508_v25 = vsel %vm1321_vm1, %v8683_v45, -inf }
 0x2ff   :  { %v1352_v37 = vsel %vm1321_vm1, %v8673_v44, -inf }
 0x300   :  { %1503 = vmax.xlane.f32.xlu0 %v1502_v3  ;;  %v8677_v13 = vpop.f32.mrf.mxu0 }
 0x301   :  { %6766 = vmatmul.mubr.msk.f32.gmra.mxu0 %vm51_vm0, %v8336_v46 }
 0x302   :  { %1344 = vmax.xlane.f32.xlu1 %v1343_v11  ;;  %6768 = vmatprep.mubr.msk.f32.mxu0 %vm51_vm0, %v8341_v18  ;;  %v8687_v21 = vpop.f32.mrf.mxu0  ;;  %v1349_v18 = vsel %vm1321_vm1, %v8649_v38, -inf }
 0x303   :  { %v1358_v42 = vsel %vm1321_vm1, %v8687_v21, -inf }
 0x304   :  { %1341 = vmax.xlane.f32.xlu0 %v1340_v16  ;;  %v8691_v23 = vpop.f32.mrf.mxu0 }
 0x305   :  { %6769 = vmatmul.mubr.msk.f32.gmra.mxu0 %vm51_vm0, %v8350_v47 }
 0x306   :  { %1512 = vmax.xlane.f32.xlu1 %v1511_v22  ;;  %6771 = vmatprep.mubr.msk.f32.mxu0 %vm51_vm0, %v8355_v50  ;;  %v8699_v46 = vpop.f32.mrf.mxu0  ;;  %v1355_v50 = vsel %vm1321_vm1, %v8663_v20, -inf }
 0x307   :  { %v1364_v3 = vsel %vm1321_vm1, %v8699_v46, -inf }
 0x308   :  { %1509 = vmax.xlane.f32.xlu0 %v1508_v25  ;;  %v8703_v62 = vpop.f32.mrf.mxu0 }
 0x309   :  { %6772 = vmatmul.mubr.msk.f32.gmra.mxu0 %vm51_vm0, %v8364_v53 }
 0x30a   :  { %1350 = vmax.xlane.f32.xlu1 %v1349_v18  ;;  %v8709_v47 = vpop.f32.mrf.mxu0  ;;  %6774 = vmatprep.mubr.msk.f32.mxu0 %vm51_vm0, %v8369_v55  ;;  %v1361_v55 = vsel %vm1321_vm1, %v8677_v13, -inf }
 0x30b   :  { %v1370_v16 = vsel %vm1321_vm1, %v8709_v47, -inf }
 0x30c   :  { %1347 = vmax.xlane.f32.xlu0 %v1346_v31  ;;  %v8715_v34 = vpop.f32.mrf.mxu0 }
 0x30d   :  { %6775 = vmatmul.mubr.msk.f32.gmra.mxu0 %vm51_vm0, %v8378_v56 }
 0x30e   :  { %1356 = vmax.xlane.f32.xlu1 %v1355_v50  ;;  %v8721_v53 = vpop.f32.mrf.mxu0  ;;  %6777 = vmatprep.mubr.msk.f32.mxu0 %vm51_vm0, %v8383_v48  ;;  %v1367_v48 = vsel %vm1321_vm1, %v8691_v23, -inf }
 0x30f   :  { %v1376_v25 = vsel %vm1321_vm1, %v8721_v53, -inf }
 0x310   :  { %1353 = vmax.xlane.f32.xlu0 %v1352_v37  ;;  %v8727_v51 = vpop.f32.mrf.mxu0 }
 0x311   :  { %6778 = vmatmul.mubr.msk.f32.gmra.mxu0 %vm51_vm0, %v8392_v29 }
 0x312   :  { %1362 = vmax.xlane.f32.xlu1 %v1361_v55  ;;  %v8733_v56 = vpop.f32.mrf.mxu0  ;;  %6780 = vmatprep.mubr.msk.f32.mxu0 %vm51_vm0, %v8397_v36  ;;  %v1373_v36 = vsel %vm1321_vm1, %v8703_v62, -inf }
 0x313   :  { %v1382_v31 = vsel %vm1321_vm1, %v8733_v56, -inf }
 0x314   :  { %1359 = vmax.xlane.f32.xlu0 %v1358_v42  ;;  %v8739_v5 = vpop.f32.mrf.mxu0 }
 0x315   :  { %6781 = vmatmul.mubr.msk.f32.gmra.mxu0 %vm51_vm0, %v8406_v57 }
 0x316   :  { %1368 = vmax.xlane.f32.xlu1 %v1367_v48  ;;  %v8745_v29 = vpop.f32.mrf.mxu0  ;;  %6783 = vmatprep.mubr.msk.f32.mxu0 %vm51_vm0, %v8411_v52  ;;  %v1379_v52 = vsel %vm1321_vm1, %v8715_v34, -inf }
 0x317   :  { %v1388_v37 = vsel %vm1321_vm1, %v8745_v29, -inf }
 0x318   :  { %1365 = vmax.xlane.f32.xlu0 %v1364_v3  ;;  %v8751_v11 = vpop.f32.mrf.mxu0 }
 0x319   :  { %6784 = vmatmul.mubr.msk.f32.gmra.mxu0 %vm51_vm0, %v8420_v54 }
 0x31a   :  { %1374 = vmax.xlane.f32.xlu1 %v1373_v36  ;;  %v8757_v57 = vpop.f32.mrf.mxu0  ;;  %6786 = vmatprep.mubr.msk.f32.mxu0 %vm51_vm0, %v8425_v6  ;;  %v1385_v6 = vsel %vm1321_vm1, %v8727_v51, -inf  ;;  %v11679_v36 = vld [vmem:[#allocation10_spill] sm:$0xff] }
 0x31b   :  { %v1394_v42 = vsel %vm1321_vm1, %v8757_v57, -inf }
 0x31c   :  { %1371 = vmax.xlane.f32.xlu0 %v1370_v16  ;;  %v8763_v22 = vpop.f32.mrf.mxu0  ;;  %v11680_v16 = vld [vmem:[#allocation11_spill] sm:$0xff] }
 0x31d   :  { %6787 = vmatmul.mubr.msk.f32.gmra.mxu0 %vm51_vm0, %v8434_v61 }
 0x31e   :  { %1380 = vmax.xlane.f32.xlu1 %v1379_v52  ;;  %v8769_v54 = vpop.f32.mrf.mxu0  ;;  %6789 = vmatprep.mubr.msk.f32.mxu0 %vm51_vm0, %v8439_v0  ;;  %v1391_v0 = vsel %vm1321_vm1, %v8739_v5, -inf }
 0x31f   :  { %v1400_v3 = vsel %vm1321_vm1, %v8769_v54, -inf }
 0x320   :  { %1377 = vmax.xlane.f32.xlu0 %v1376_v25  ;;  %v8775_v18 = vpop.f32.mrf.mxu0 }
 0x321   :  { %6790 = vmatmul.mubr.msk.f32.gmra.mxu0 %vm51_vm0, %v8448_v49 }
 0x322   :  { %1386 = vmax.xlane.f32.xlu1 %v1385_v6  ;;  %v8781_v61 = vpop.f32.mrf.mxu0  ;;  %6792 = vmatprep.mubr.msk.f32.mxu0 %vm51_vm0, %v8453_v1  ;;  %v1397_v1 = vsel %vm1321_vm1, %v8751_v11, -inf  ;;  %v11681_v6 = vld [vmem:[#allocation12_spill] sm:$0xff] }
 0x323   :  { %v1406_v25 = vsel %vm1321_vm1, %v8781_v61, -inf }
 0x324   :  { %1383 = vmax.xlane.f32.xlu0 %v1382_v31  ;;  %v8787_v50 = vpop.f32.mrf.mxu0 }
 0x325   :  { %6793 = vmatmul.mubr.msk.f32.gmra.mxu0 %vm51_vm0, %v8462_v4 }
 0x326   :  { %1392 = vmax.xlane.f32.xlu1 %v1391_v0  ;;  %v8793_v49 = vpop.f32.mrf.mxu0  ;;  %6795 = vmatprep.mubr.msk.f32.mxu0 %vm51_vm0, %v8467_v7  ;;  %v1403_v7 = vsel %vm1321_vm1, %v8763_v22, -inf  ;;  %v11682_v0 = vld [vmem:[#allocation13_spill] sm:$0xff] }
 0x328   :  { %1389 = vmax.xlane.f32.xlu0 %v1388_v37  ;;  %v8799_v55 = vpop.f32.mrf.mxu0  ;;  %v1415_v37 = vsel %vm1321_vm1, %v8787_v50, -inf }
 0x329   :  { %6796 = vmatmul.mubr.msk.f32.gmra.mxu0 %vm51_vm0, %v8476_v8 }
 0x32a   :  { %1398 = vmax.xlane.f32.xlu1 %v1397_v1  ;;  %v8805_v4 = vpop.f32.mrf.mxu0  ;;  %6798 = vmatprep.mubr.msk.f32.mxu0 %vm51_vm0, %v8481_v9  ;;  %v1409_v9 = vsel %vm1321_vm1, %v8775_v18, -inf }
 0x32c   :  { %1395 = vmax.xlane.f32.xlu0 %v1394_v42  ;;  %v8811_v48 = vpop.f32.mrf.mxu0  ;;  %v1412_v42 = vsel %vm1321_vm1, %v8793_v49, -inf }
 0x32d   :  { %6799 = vmatmul.mubr.msk.f32.gmra.mxu0 %vm51_vm0, %v11679_v36  ;;  %v11684_v36 = vld [vmem:[#allocation2_spill] sm:$0xff] }
 0x32e   :  { %1404 = vmax.xlane.f32.xlu1 %v1403_v7  ;;  %v8817_v8 = vpop.f32.mrf.mxu0  ;;  %6801 = vmatprep.mubr.msk.f32.mxu0 %vm51_vm0, %v11680_v16  ;;  %v11683_v7 = vld [vmem:[#allocation14_spill] sm:$0xff]  ;;  %v1421_v16 = vsel %vm1321_vm1, %v8799_v55, -inf }
 0x330   :  { %1401 = vmax.xlane.f32.xlu0 %v1400_v3  ;;  %v8823_v52 = vpop.f32.mrf.mxu0 }
 0x331   :  { %6802 = vmatmul.mubr.msk.f32.gmra.mxu0 %vm51_vm0, %v11681_v6  ;;  %v11685_v6 = vld [vmem:[#allocation3_spill] sm:$0xff] }
 0x332   :  { %1410 = vmax.xlane.f32.xlu1 %v1409_v9  ;;  %v8829_v31 = vpop.f32.mrf.mxu0  ;;  %6804 = vmatprep.mubr.msk.f32.mxu0 %vm51_vm0, %v11682_v0 }
 0x334   :  { %1407 = vmax.xlane.f32.xlu0 %v1406_v25  ;;  %v8835_v1 = vpop.f32.mrf.mxu0  ;;  %v1418_v25 = vsel %vm1321_vm1, %v8805_v4, -inf }
 0x335   :  { %6805 = vmatmul.mubr.msk.f32.gmra.mxu0 %vm51_vm0, %v11683_v7  ;;  %v1427_v7 = vsel %vm1321_vm1, %v8811_v48, -inf }
 0x336   :  { %1416 = vmax.xlane.f32.xlu1 %v1415_v37  ;;  %v8841_v3 = vpop.f32.mrf.mxu0  ;;  %6807 = vmatprep.mubr.msk.f32.mxu0 %vm51_vm0, %v11684_v36  ;;  %v11686_v37 = vld [vmem:[#allocation4_spill] sm:$0xff] }
 0x338   :  { %1413 = vmax.xlane.f32.xlu0 %v1412_v42  ;;  %v8847_v9 = vpop.f32.mrf.mxu0  ;;  %v1424_v42 = vsel %vm1321_vm1, %v8817_v8, -inf }
 0x339   :  { %6808 = vmatmul.mubr.msk.f32.gmra.mxu0 %vm51_vm0, %v11685_v6 }
 0x33a   :  { %1422 = vmax.xlane.f32.xlu1 %v1421_v16  ;;  %v8853_v0 = vpop.f32.mrf.mxu0  ;;  %6810 = vmatprep.mubr.msk.f32.mxu0 %vm51_vm0, %v11686_v37  ;;  %v11689_v16 = vld [vmem:[#allocation6_spill] sm:$0xff]  ;;  %v1433_v37 = vsel %vm1321_vm1, %v8823_v52, -inf }
 0x33c   :  { %1419 = vmax.xlane.f32.xlu0 %v1418_v25  ;;  %v8859_v36 = vpop.f32.mrf.mxu0  ;;  %v1430_v25 = vsel %vm1321_vm1, %v8829_v31, -inf }
 0x33d   :  { %11687 = vst [vmem:[#allocation10_spill] sm:$0xff] %v8859_v36  ;;  %6811 = vmatmul.mubr.msk.f32.gmra.mxu0 %vm51_vm0, %v11688_v10  ;;  %v1451_v59 = vsel %vm1321_vm1, %v8859_v36, -inf }
 0x33e   :  { %1428 = vmax.xlane.f32.xlu1 %v1427_v7  ;;  %v8865_v6 = vpop.f32.mrf.mxu0  ;;  %6813 = vmatprep.mubr.msk.f32.mxu0 %vm51_vm0, %v11689_v16  ;;  %v11693_v7 = vld [vmem:[#allocation8_spill] sm:$0xff]  ;;  %v1439_v16 = vsel %vm1321_vm1, %v8835_v1, -inf }
 0x340   :  { %1425 = vmax.xlane.f32.xlu0 %v1424_v42  ;;  %v8871_v45 = vpop.f32.mrf.mxu0  ;;  %v1436_v42 = vsel %vm1321_vm1, %v8841_v3, -inf }
 0x341   :  { %11690 = vst [vmem:[#allocation11_spill] sm:$0xff] %v8871_v45  ;;  %6814 = vmatmul.mubr.msk.f32.gmra.mxu0 %vm51_vm0, %v11691_v40 }
 0x342   :  { %1434 = vmax.xlane.f32.xlu1 %v1433_v37  ;;  %v8877_v10 = vpop.f32.mrf.mxu0  ;;  %6816 = vmatprep.mubr.msk.f32.mxu0 %vm51_vm0, %v11693_v7  ;;  %v1445_v37 = vsel %vm1321_vm1, %v8847_v9, -inf }
 0x343   :  { %11692 = vst [vmem:[#allocation12_spill] sm:$0xff] %v8877_v10  ;;  %v1454_v19 = vsel %vm1321_vm1, %v8877_v10, -inf }
 0x344   :  { %1431 = vmax.xlane.f32.xlu0 %v1430_v25  ;;  %v8883_v2 = vpop.f32.mrf.mxu0  ;;  %v1442_v25 = vsel %vm1321_vm1, %v8853_v0, -inf }
 0x345   :  { %11694 = vst [vmem:[#allocation13_spill] sm:$0xff] %v8883_v2  ;;  %6817 = vmatmul.mubr.msk.f32.gmra.mxu0 %vm51_vm0, %v11695_v30  ;;  %v1448_v30 = vsel %vm1321_vm1, %v8865_v6, -inf  ;;  %v1463_v36 = vsel %vm1321_vm1, %v8883_v2, -inf }
 0x346   :  { %1440 = vmax.xlane.f32.xlu1 %v1439_v16  ;;  %v8889_v40 = vpop.f32.mrf.mxu0 }
 0x347   :  { %11696 = vst [vmem:[#allocation14_spill] sm:$0xff] %v8889_v40 }
 0x348   :  { %1437 = vmax.xlane.f32.xlu0 %v1436_v42  ;;  %v8893_v7 = vpop.f32.mrf.mxu0  ;;  %v1457_v42 = vsel %vm1321_vm1, %v8871_v45, -inf }
 0x349   :  { %11697 = vst [vmem:[#allocation2_spill] sm:$0xff] %v8893_v7  ;;  %v1469_v45 = vsel %vm1321_vm1, %v8893_v7, -inf }
 0x34a   :  { %1446 = vmax.xlane.f32.xlu1 %v1445_v37  ;;  %v8897_v32 = vpop.f32.mrf.mxu0 }
 0x34b   :  { %11698 = vst [vmem:[#allocation3_spill] sm:$0xff] %v8897_v32 }
 0x34c   :  { %1443 = vmax.xlane.f32.xlu0 %v1442_v25  ;;  %v8903_v16 = vpop.f32.mrf.mxu0  ;;  %v1460_v25 = vsel %vm1321_vm1, %v8889_v40, -inf }
 0x34d   :  { %11699 = vst [vmem:[#allocation4_spill] sm:$0xff] %v8903_v16  ;;  %v1475_v2 = vsel %vm1321_vm1, %v8903_v16, -inf }
 0x34e   :  { %1452 = vmax.xlane.f32.xlu1 %v1451_v59  ;;  %v8909_v37 = vpop.f32.mrf.mxu0 }
 0x34f   :  { %11700 = vst [vmem:[#allocation5_spill] sm:$0xff] %v8909_v37 }
 0x350   :  { %1449 = vmax.xlane.f32.xlu0 %v1448_v30  ;;  %v8915_v59 = vpop.f32.mrf.mxu0  ;;  %v1466_v30 = vsel %vm1321_vm1, %v8897_v32, -inf }
 0x351   :  { %11701 = vst [vmem:[#allocation6_spill] sm:$0xff] %v8915_v59  ;;  %v1481_v7 = vsel %vm1321_vm1, %v8915_v59, -inf }
 0x352   :  { %1458 = vmax.xlane.f32.xlu1 %v1457_v42  ;;  %v8921_v42 = vpop.f32.mrf.mxu0 }
 0x353   :  { %11702 = vst [vmem:[#allocation7_spill] sm:$0xff] %v8921_v42 }
 0x354   :  { %1455 = vmax.xlane.f32.xlu0 %v1454_v19  ;;  %v1472_v19 = vsel %vm1321_vm1, %v8909_v37, -inf }
 0x356   :  { %1464 = vmax.xlane.f32.xlu1 %v1463_v36  ;;  %v8927_v36 = vpop.f32.mrf.mxu0 }
 0x357   :  { %11703 = vst [vmem:[#allocation8_spill] sm:$0xff] %v8927_v36  ;;  %v1487_v16 = vsel %vm1321_vm1, %v8927_v36, -inf }
 0x358   :  { %1461 = vmax.xlane.f32.xlu0 %v1460_v25  ;;  %v1478_v25 = vsel %vm1321_vm1, %v8921_v42, -inf }
 0x35a   :  { %1470 = vmax.xlane.f32.xlu1 %v1469_v45  ;;  %v8933_v45 = vpop.f32.mrf.mxu0 }
 0x35b   :  { %11704 = vst [vmem:[#allocation9_spill] sm:$0xff] %v8933_v45 }
 0x35c   :  { %1467 = vmax.xlane.f32.xlu0 %v1466_v30  ;;  %v1484_v30 = vsel %vm1321_vm1, %v8933_v45, -inf }
 0x35e   :  { %1476 = vmax.xlane.f32.xlu1 %v1475_v2 }
 0x360   :  { %1473 = vmax.xlane.f32.xlu0 %v1472_v19 }
 0x362   :  { %1482 = vmax.xlane.f32.xlu1 %v1481_v7 }
 0x364   :  { %1479 = vmax.xlane.f32.xlu0 %v1478_v25 }
 0x366   :  { %1488 = vmax.xlane.f32.xlu1 %v1487_v16 }
 0x368   :  { %1485 = vmax.xlane.f32.xlu0 %v1484_v30 }
 0x373   :  { %v1327_v2 = vpop.xlane.xlu1 %1326 }
 0x374   :  { %v1515_v37 = vsub.f32 %v8589_v58, %v1327_v2 }
 0x375   :  { %v1324_v59 = vpop.xlane.xlu0 %1323 }
 0x376   :  { %v1514_v19 = vsub.f32 %v8597_v17, %v1324_v59  ;;  %v1580_v32 = vmul.f32 1.442695, %v1515_v37 }
 0x377   :  { %v8941_v42 = vpop.xlane.xlu1 %1494 }
 0x378   :  { %v1578_v7 = vmul.f32 1.442695, %v1514_v19 }
 0x379   :  { %v8943_v40 = vpop.xlane.xlu0 %1491 }
 0x37a   :  { %7099 = vpow2.f32 %v1578_v7 }
 0x37b   :  { %7101 = vpow2.f32 %v1580_v32  ;;  %v1333_v25 = vpop.xlane.xlu1 %1332 }
 0x37c   :  { %v1517_v36 = vsub.f32 %v8607_v24, %v1333_v25 }
 0x37d   :  { %v1330_v45 = vpop.xlane.xlu0 %1329 }
 0x37e   :  { %v1516_v16 = vsub.f32 %v8615_v27, %v1330_v45  ;;  %v1584_v30 = vmul.f32 1.442695, %v1517_v36 }
 0x37f   :  { %v8947_v10 = vpop.xlane.xlu1 %1500 }
 0x380   :  { %v1582_v58 = vmul.f32 1.442695, %v1516_v16 }
 0x381   :  { %v8949_v2 = vpop.xlane.xlu0 %1497 }
 0x382   :  { %7103 = vpow2.f32 %v1582_v58 }
 0x383   :  { %7105 = vpow2.f32 %v1584_v30  ;;  %v1339_v17 = vpop.xlane.xlu1 %1338 }
 0x384   :  { %v1519_v37 = vsub.f32 %v8621_v63, %v1339_v17 }
 0x385   :  { %v1336_v59 = vpop.xlane.xlu0 %1335 }
 0x386   :  { %v1518_v32 = vsub.f32 %v8631_v33, %v1336_v59  ;;  %v1588_v24 = vmul.f32 1.442695, %v1519_v37 }
 0x387   :  { %v8953_v19 = vpop.eup %7099  ;;  %v8955_v7 = vpop.xlane.xlu1 %1506 }
 0x388   :  { %v8957_v27 = vpop.eup %7101  ;;  %v1586_v36 = vmul.f32 1.442695, %v1518_v32  ;;  %6611 = vmatprep.mubr.msk.f32.mxu1 %vm1321_vm1, %v8953_v19 }
 0x389   :  { %6612 = vmatmul.mubr.msk.f32.vlgmr.msra.gmra.mxu1 %vm1321_vm1, %v8957_v27  ;;  %v8963_v45 = vpop.xlane.xlu0 %1503  ;;  %v8965_v63 = vpop.f32.mrf.mxu0 }
 0x38a   :  { %7107 = vpow2.f32 %v1586_v36  ;;  %6820 = vmatpush3.msra.mxu1 %v8536_v60  ;;  %v3247_v33 = vsel %vm1321_vm1, %v8965_v63, -inf }
 0x38b   :  { %7109 = vpow2.f32 %v1588_v24  ;;  %6821 = vmatprep.subr.mxu1 %v8585_v14  ;;  %v1345_v25 = vpop.xlane.xlu1 %1344  ;;  %3248 = vmax.xlane.f32.xlu1 %v3247_v33  ;;  %v8971_v16 = vpop.f32.mrf.mxu0 }
 0x38c   :  { %6822 = vmatpush3.msra.mxu1 %v8585_v14  ;;  %v1521_v30 = vsub.f32 %v8635_v35, %v1345_v25  ;;  %v3244_v58 = vsel %vm1321_vm1, %v8971_v16, -inf }
 0x38d   :  { %6823 = vmatprep.subr.mxu1 %v8532_v12  ;;  %v1342_v60 = vpop.xlane.xlu0 %1341  ;;  %v8978_v17 = vpop.f32.mrf.mxu0  ;;  %3245 = vmax.xlane.f32.xlu0 %v3244_v58 }
 0x38e   :  { %6824 = vmatpush3.msra.mxu1 %v8532_v12  ;;  %v1520_v37 = vsub.f32 %v8645_v41, %v1342_v60  ;;  %v3253_v59 = vsel %vm1321_vm1, %v8978_v17, -inf  ;;  %v1592_v14 = vmul.f32 1.442695, %v1521_v30 }
 0x38f   :  { %v8984_v32 = vpop.eup %7103  ;;  %6825 = vmatprep.subr.mxu1 %v8534_v28  ;;  %v8987_v35 = vpop.xlane.xlu1 %1512  ;;  %3254 = vmax.xlane.f32.xlu1 %v3253_v59 }
 0x390   :  { %v8989_v24 = vpop.f32.mrf.mxu0  ;;  %v8991_v36 = vpop.eup %7105  ;;  %v1590_v33 = vmul.f32 1.442695, %v1520_v37  ;;  %6826 = vmatpush3.msra.mxu1 %v8534_v28  ;;  %6614 = vmatprep.mubr.msk.f32.mxu1 %vm1321_vm1, %v8984_v32 }
 0x391   :  { %11705 = vst [vmem:[#allocation24_spill] sm:$0xff] %v8989_v24  ;;  %v3250_v12 = vsel %vm1321_vm1, %v8989_v24, -inf  ;;  %6827 = vmatprep.subr.mxu1 %v8528_v15  ;;  %6615 = vmatmul.mubr.msk.f32.gmra.mxu1 %vm1321_vm1, %v8991_v36  ;;  %v9001_v41 = vpop.xlane.xlu0 %1509 }
 0x392   :  { %v9003_v25 = vpop.f32.mrf.mxu0  ;;  %7111 = vpow2.f32 %v1590_v33  ;;  %6828 = vmatpush3.msra.mxu1 %v8528_v15  ;;  %3251 = vmax.xlane.f32.xlu0 %v3250_v12 }
 0x393   :  { %11706 = vst [vmem:[#allocation25_spill] sm:$0xff] %v9003_v25  ;;  %v3259_v28 = vsel %vm1321_vm1, %v9003_v25, -inf  ;;  %7113 = vpow2.f32 %v1592_v14  ;;  %6829 = vmatprep.subr.mxu1 %v8530_v39  ;;  %v1351_v30 = vpop.xlane.xlu1 %1350 }
 0x394   :  { %3260 = vmax.xlane.f32.xlu1 %v3259_v28  ;;  %v9009_v58 = vpop.f32.mrf.mxu0  ;;  %6830 = vmatpush3.msra.mxu1 %v8530_v39  ;;  %v1523_v60 = vsub.f32 %v8649_v38, %v1351_v30  ;;  %v11709_v38 = vld [vmem:[#allocation15_spill] sm:$0xff] }
 0x395   :  { %11707 = vst [vmem:[#allocation26_spill] sm:$0xff] %v9009_v58  ;;  %v3256_v37 = vsel %vm1321_vm1, %v9009_v58, -inf  ;;  %6831 = vmatprep.subr.mxu1 %v8524_v26  ;;  %v1348_v15 = vpop.xlane.xlu0 %1347 }
 0x396   :  { %v9016_v59 = vpop.f32.mrf.mxu0  ;;  %6832 = vmatpush3.msra.mxu1 %v8524_v26  ;;  %v1522_v14 = vsub.f32 %v8659_v43, %v1348_v15  ;;  %3257 = vmax.xlane.f32.xlu0 %v3256_v37  ;;  %v1596_v39 = vmul.f32 1.442695, %v1523_v60 }
 0x397   :  { %11708 = vst [vmem:[#allocation27_spill] sm:$0xff] %v9016_v59  ;;  %v3265_v33 = vsel %vm1321_vm1, %v9016_v59, -inf  ;;  %v9022_v12 = vpop.eup %7107  ;;  %6833 = vmatprep.subr.mxu1 %v11709_v38  ;;  %v1357_v28 = vpop.xlane.xlu1 %1356 }
 0x398   :  { %3266 = vmax.xlane.f32.xlu1 %v3265_v33  ;;  %v9025_v30 = vpop.f32.mrf.mxu0  ;;  %v9027_v58 = vpop.eup %7109  ;;  %v1594_v25 = vmul.f32 1.442695, %v1522_v14  ;;  %6834 = vmatpush3.msra.mxu1 %v11709_v38  ;;  %v1525_v26 = vsub.f32 %v8663_v20, %v1357_v28 }
 0x399   :  { %11710 = vst [vmem:[#allocation15_spill] sm:$0xff] %v9025_v30  ;;  %6617 = vmatprep.mubr.msk.f32.mxu1 %vm1321_vm1, %v9022_v12  ;;  %v3262_v43 = vsel %vm1321_vm1, %v9025_v30, -inf  ;;  %v1354_v60 = vpop.xlane.xlu0 %1353 }
 0x39a   :  { %6618 = vmatmul.mubr.msk.f32.gmra.mxu1 %vm1321_vm1, %v9027_v58  ;;  %v9037_v37 = vpop.f32.mrf.mxu0  ;;  %7115 = vpow2.f32 %v1594_v25  ;;  %v1524_v15 = vsub.f32 %v8673_v44, %v1354_v60  ;;  %3263 = vmax.xlane.f32.xlu0 %v3262_v43  ;;  %v1600_v20 = vmul.f32 1.442695, %v1525_v26 }
 0x39b   :  { %v3271_v14 = vsel %vm1321_vm1, %v9037_v37, -inf  ;;  %7117 = vpow2.f32 %v1596_v39  ;;  %v1363_v33 = vpop.xlane.xlu1 %1362 }
 0x39c   :  { %3272 = vmax.xlane.f32.xlu1 %v3271_v14  ;;  %v9042_v38 = vpop.f32.mrf.mxu0  ;;  %v1598_v28 = vmul.f32 1.442695, %v1524_v15  ;;  %v1527_v30 = vsub.f32 %v8677_v13, %v1363_v33 }
 0x39d   :  { %v3268_v59 = vsel %vm1321_vm1, %v9042_v38, -inf  ;;  %v1360_v24 = vpop.xlane.xlu0 %1359 }
 0x39e   :  { %v9047_v25 = vpop.f32.mrf.mxu0  ;;  %7119 = vpow2.f32 %v1598_v28  ;;  %v1526_v44 = vsub.f32 %v8687_v21, %v1360_v24  ;;  %3269 = vmax.xlane.f32.xlu0 %v3268_v59  ;;  %v1604_v43 = vmul.f32 1.442695, %v1527_v30 }
 0x39f   :  { %v3277_v39 = vsel %vm1321_vm1, %v9047_v25, -inf  ;;  %v9052_v26 = vpop.eup %7111  ;;  %7121 = vpow2.f32 %v1600_v20  ;;  %v1369_v60 = vpop.xlane.xlu1 %1368 }
 0x3a0   :  { %11711 = vst [vmem:[#allocation28_spill] sm:$0xff] %v9052_v26  ;;  %3278 = vmax.xlane.f32.xlu1 %v3277_v39  ;;  %v9054_v13 = vpop.f32.mrf.mxu0  ;;  %v9056_v15 = vpop.eup %7113  ;;  %v1602_v14 = vmul.f32 1.442695, %v1526_v44  ;;  %v1529_v33 = vsub.f32 %v8691_v23, %v1369_v60  ;;  %6620 = vmatprep.mubr.msk.f32.mxu1 %vm1321_vm1, %v9052_v26 }
 0x3a1   :  { %11712 = vst [vmem:[#allocation29_spill] sm:$0xff] %v9056_v15  ;;  %v3274_v21 = vsel %vm1321_vm1, %v9054_v13, -inf  ;;  %6621 = vmatmul.mubr.msk.f32.gmra.mxu1 %vm1321_vm1, %v9056_v15  ;;  %v1366_v24 = vpop.xlane.xlu0 %1365 }
 0x3a2   :  { %v9065_v59 = vpop.f32.mrf.mxu0  ;;  %7123 = vpow2.f32 %v1602_v14  ;;  %v1528_v30 = vsub.f32 %v8699_v46, %v1366_v24  ;;  %3275 = vmax.xlane.f32.xlu0 %v3274_v21  ;;  %v1608_v23 = vmul.f32 1.442695, %v1529_v33 }
 0x3a3   :  { %v3283_v20 = vsel %vm1321_vm1, %v9065_v59, -inf  ;;  %7125 = vpow2.f32 %v1604_v43  ;;  %v1375_v28 = vpop.xlane.xlu1 %1374 }
 0x3a4   :  { %3284 = vmax.xlane.f32.xlu1 %v3283_v20  ;;  %v9070_v44 = vpop.f32.mrf.mxu0  ;;  %v1606_v39 = vmul.f32 1.442695, %v1528_v30  ;;  %v1531_v60 = vsub.f32 %v8703_v62, %v1375_v28 }
 0x3a5   :  { %v3280_v26 = vsel %vm1321_vm1, %v9070_v44, -inf  ;;  %v1372_v15 = vpop.xlane.xlu0 %1371 }
 0x3a6   :  { %v9075_v14 = vpop.f32.mrf.mxu0  ;;  %7127 = vpow2.f32 %v1606_v39  ;;  %v1530_v46 = vsub.f32 %v8709_v47, %v1372_v15  ;;  %3281 = vmax.xlane.f32.xlu0 %v3280_v26  ;;  %v1612_v21 = vmul.f32 1.442695, %v1531_v60 }
 0x3a7   :  { %11713 = vst [vmem:[#allocation30_spill] sm:$0xff] %v9075_v14  ;;  %v3289_v43 = vsel %vm1321_vm1, %v9075_v14, -inf  ;;  %v9080_v33 = vpop.eup %7115  ;;  %7129 = vpow2.f32 %v1608_v23  ;;  %v1381_v24 = vpop.xlane.xlu1 %1380 }
 0x3a8   :  { %3290 = vmax.xlane.f32.xlu1 %v3289_v43  ;;  %v9082_v62 = vpop.f32.mrf.mxu0  ;;  %v9084_v30 = vpop.eup %7117  ;;  %v1610_v20 = vmul.f32 1.442695, %v1530_v46  ;;  %v1533_v28 = vsub.f32 %v8715_v34, %v1381_v24  ;;  %6623 = vmatprep.mubr.msk.f32.mxu1 %vm1321_vm1, %v9080_v33 }
 0x3a9   :  { %11714 = vst [vmem:[#allocation31_spill] sm:$0xff] %v9082_v62  ;;  %v3286_v47 = vsel %vm1321_vm1, %v9082_v62, -inf  ;;  %6624 = vmatmul.mubr.msk.f32.gmra.mxu1 %vm1321_vm1, %v9084_v30  ;;  %v1378_v26 = vpop.xlane.xlu0 %1377 }
 0x3aa   :  { %v9093_v15 = vpop.f32.mrf.mxu0  ;;  %7131 = vpow2.f32 %v1610_v20  ;;  %v1532_v23 = vsub.f32 %v8721_v53, %v1378_v26  ;;  %3287 = vmax.xlane.f32.xlu0 %v3286_v47  ;;  %v1616_v60 = vmul.f32 1.442695, %v1533_v28 }
 0x3ab   :  { %11715 = vst [vmem:[#allocation32_spill] sm:$0xff] %v9093_v15  ;;  %v3295_v39 = vsel %vm1321_vm1, %v9093_v15, -inf  ;;  %v9098_v34 = vpop.eup %7119  ;;  %7133 = vpow2.f32 %v1612_v21  ;;  %v1387_v46 = vpop.xlane.xlu1 %1386 }
 0x3ac   :  { %3296 = vmax.xlane.f32.xlu1 %v3295_v39  ;;  %v9100_v43 = vpop.f32.mrf.mxu0  ;;  %v9102_v24 = vpop.eup %7121  ;;  %v1614_v62 = vmul.f32 1.442695, %v1532_v23  ;;  %v1535_v14 = vsub.f32 %v8727_v51, %v1387_v46  ;;  %6626 = vmatprep.mubr.msk.f32.mxu1 %vm1321_vm1, %v9098_v34 }
 0x3ad   :  { %11716 = vst [vmem:[#allocation33_spill] sm:$0xff] %v9100_v43  ;;  %v3292_v53 = vsel %vm1321_vm1, %v9100_v43, -inf  ;;  %6627 = vmatmul.mubr.msk.f32.gmra.mxu1 %vm1321_vm1, %v9102_v24  ;;  %v1384_v21 = vpop.xlane.xlu0 %1383 }
 0x3ae   :  { %v9111_v20 = vpop.f32.mrf.mxu0  ;;  %7135 = vpow2.f32 %v1614_v62  ;;  %v1534_v28 = vsub.f32 %v8733_v56, %v1384_v21  ;;  %3293 = vmax.xlane.f32.xlu0 %v3292_v53  ;;  %v1620_v26 = vmul.f32 1.442695, %v1535_v14 }
 0x3af   :  { %11717 = vst [vmem:[#allocation34_spill] sm:$0xff] %v9111_v20  ;;  %v3301_v47 = vsel %vm1321_vm1, %v9111_v20, -inf  ;;  %v9116_v51 = vpop.eup %7123  ;;  %7137 = vpow2.f32 %v1616_v60  ;;  %v1393_v23 = vpop.xlane.xlu1 %1392 }
 0x3b0   :  { %3302 = vmax.xlane.f32.xlu1 %v3301_v47  ;;  %v9118_v39 = vpop.f32.mrf.mxu0  ;;  %v9120_v46 = vpop.eup %7125  ;;  %v1618_v43 = vmul.f32 1.442695, %v1534_v28  ;;  %v1537_v15 = vsub.f32 %v8739_v5, %v1393_v23  ;;  %6629 = vmatprep.mubr.msk.f32.mxu1 %vm1321_vm1, %v9116_v51 }
 0x3b1   :  { %11718 = vst [vmem:[#allocation35_spill] sm:$0xff] %v9118_v39  ;;  %v3298_v56 = vsel %vm1321_vm1, %v9118_v39, -inf  ;;  %6630 = vmatmul.mubr.msk.f32.gmra.mxu1 %vm1321_vm1, %v9120_v46  ;;  %v1390_v62 = vpop.xlane.xlu0 %1389 }
 0x3b2   :  { %v9129_v14 = vpop.f32.mrf.mxu0  ;;  %7139 = vpow2.f32 %v1618_v43  ;;  %v1536_v60 = vsub.f32 %v8745_v29, %v1390_v62  ;;  %3299 = vmax.xlane.f32.xlu0 %v3298_v56  ;;  %v1624_v21 = vmul.f32 1.442695, %v1537_v15 }
 0x3b3   :  { %v3307_v53 = vsel %vm1321_vm1, %v9129_v14, -inf  ;;  %v9134_v5 = vpop.eup %7127  ;;  %7141 = vpow2.f32 %v1620_v26  ;;  %v1399_v28 = vpop.xlane.xlu1 %1398 }
 0x3b4   :  { %3308 = vmax.xlane.f32.xlu1 %v3307_v53  ;;  %v9136_v47 = vpop.f32.mrf.mxu0  ;;  %v9138_v23 = vpop.eup %7129  ;;  %v1622_v39 = vmul.f32 1.442695, %v1536_v60  ;;  %v1539_v20 = vsub.f32 %v8751_v11, %v1399_v28  ;;  %6632 = vmatprep.mubr.msk.f32.mxu1 %vm1321_vm1, %v9134_v5 }
 0x3b5   :  { %11719 = vst [vmem:[#allocation36_spill] sm:$0xff] %v9136_v47  ;;  %11720 = vst [vmem:[#allocation37_spill] sm:$0xff] %v9138_v23  ;;  %v3304_v29 = vsel %vm1321_vm1, %v9136_v47, -inf  ;;  %6633 = vmatmul.mubr.msk.f32.gmra.mxu1 %vm1321_vm1, %v9138_v23  ;;  %v1396_v43 = vpop.xlane.xlu0 %1395 }
 0x3b6   :  { %v9147_v15 = vpop.f32.mrf.mxu0  ;;  %7143 = vpow2.f32 %v1622_v39  ;;  %v1538_v26 = vsub.f32 %v8757_v57, %v1396_v43  ;;  %3305 = vmax.xlane.f32.xlu0 %v3304_v29  ;;  %v1628_v62 = vmul.f32 1.442695, %v1539_v20  ;;  %v1709_v20 = vsel %vm1321_vm1, %v8957_v27, 0.0 }
 0x3b7   :  { %11721 = vst [vmem:[#allocation38_spill] sm:$0xff] %v9147_v15  ;;  %v3313_v56 = vsel %vm1321_vm1, %v9147_v15, -inf  ;;  %v9152_v11 = vpop.eup %7131  ;;  %7145 = vpow2.f32 %v1624_v21  ;;  %v1405_v60 = vpop.xlane.xlu1 %1404 }
 0x3b8   :  { %3314 = vmax.xlane.f32.xlu1 %v3313_v56  ;;  %v9154_v53 = vpop.f32.mrf.mxu0  ;;  %v9156_v28 = vpop.eup %7133  ;;  %v1626_v23 = vmul.f32 1.442695, %v1538_v26  ;;  %v1541_v47 = vsub.f32 %v8763_v22, %v1405_v60  ;;  %6635 = vmatprep.mubr.msk.f32.mxu1 %vm1321_vm1, %v9152_v11 }
 0x3b9   :  { %11722 = vst [vmem:[#allocation39_spill] sm:$0xff] %v9154_v53  ;;  %6636 = vmatmul.mubr.msk.f32.gmra.mxu1 %vm1321_vm1, %v9156_v28  ;;  %v1402_v57 = vpop.xlane.xlu0 %1401 }
 0x3ba   :  { %v9163_v39 = vpop.f32.mrf.mxu0  ;;  %7147 = vpow2.f32 %v1626_v23  ;;  %v1540_v21 = vsub.f32 %v8769_v54, %v1402_v57  ;;  %1710 = vadd.xlane.f32.xlu0 %v1709_v20  ;;  %v1632_v43 = vmul.f32 1.442695, %v1541_v47  ;;  %v3310_v23 = vsel %vm1321_vm1, %v9154_v53, -inf }
 0x3bb   :  { %11723 = vst [vmem:[#allocation40_spill] sm:$0xff] %v9163_v39  ;;  %v3319_v29 = vsel %vm1321_vm1, %v9163_v39, -inf  ;;  %v9170_v22 = vpop.eup %7135  ;;  %7149 = vpow2.f32 %v1628_v62  ;;  %v1411_v26 = vpop.xlane.xlu1 %1410  ;;  %v1715_v57 = vsel %vm1321_vm1, %v8991_v36, 0.0 }
 0x3bc   :  { %3320 = vmax.xlane.f32.xlu1 %v3319_v29  ;;  %v9172_v56 = vpop.f32.mrf.mxu0  ;;  %v9174_v60 = vpop.eup %7137  ;;  %v1630_v15 = vmul.f32 1.442695, %v1540_v21  ;;  %v1543_v27 = vsub.f32 %v8775_v18, %v1411_v26  ;;  %6638 = vmatprep.mubr.msk.f32.mxu1 %vm1321_vm1, %v9170_v22 }
 0x3bd   :  { %6639 = vmatmul.mubr.msk.f32.gmra.mxu1 %vm1321_vm1, %v9174_v60  ;;  %v1408_v54 = vpop.xlane.xlu0 %1407 }
 0x3be   :  { %v9183_v47 = vpop.f32.mrf.mxu0  ;;  %7151 = vpow2.f32 %v1630_v15  ;;  %v1542_v62 = vsub.f32 %v8781_v61, %v1408_v54  ;;  %3311 = vmax.xlane.f32.xlu0 %v3310_v23  ;;  %v1636_v20 = vmul.f32 1.442695, %v1543_v27  ;;  %v1706_v15 = vsel %vm1321_vm1, %v8953_v19, 0.0 }
 0x3bf   :  { %11724 = vst [vmem:[#allocation41_spill] sm:$0xff] %v9183_v47  ;;  %v9188_v18 = vpop.eup %7139  ;;  %7153 = vpow2.f32 %v1632_v43  ;;  %v1417_v21 = vpop.xlane.xlu1 %1416  ;;  %v3325_v61 = vsel %vm1321_vm1, %v9183_v47, -inf }
 0x3c0   :  { %1716 = vadd.xlane.f32.xlu1 %v1715_v57  ;;  %v9190_v29 = vpop.f32.mrf.mxu0  ;;  %v9192_v26 = vpop.eup %7141  ;;  %v1634_v39 = vmul.f32 1.442695, %v1542_v62  ;;  %v1545_v53 = vsub.f32 %v8787_v50, %v1417_v21  ;;  %6641 = vmatprep.mubr.msk.f32.mxu1 %vm1321_vm1, %v9188_v18 }
 0x3c1   :  { %11725 = vst [vmem:[#allocation42_spill] sm:$0xff] %v9190_v29  ;;  %6642 = vmatmul.mubr.msk.f32.gmra.mxu1 %vm1321_vm1, %v9192_v26  ;;  %v1414_v36 = vpop.xlane.xlu0 %1413 }
 0x3c2   :  { %v9203_v43 = vpop.f32.mrf.mxu0  ;;  %7155 = vpow2.f32 %v1634_v39  ;;  %v1544_v27 = vsub.f32 %v8793_v49, %v1414_v36  ;;  %1707 = vadd.xlane.f32.xlu0 %v1706_v15  ;;  %v1640_v54 = vmul.f32 1.442695, %v1545_v53  ;;  %v3316_v53 = vsel %vm1321_vm1, %v9172_v56, -inf }
 0x3c3   :  { %11726 = vst [vmem:[#allocation43_spill] sm:$0xff] %v9203_v43  ;;  %v9206_v50 = vpop.eup %7143  ;;  %7157 = vpow2.f32 %v1636_v20  ;;  %v1423_v23 = vpop.xlane.xlu1 %1422  ;;  %v3331_v49 = vsel %vm1321_vm1, %v9203_v43, -inf }
 0x3c4   :  { %11727 = vst [vmem:[#allocation44_spill] sm:$0xff] %v9206_v50  ;;  %3326 = vmax.xlane.f32.xlu1 %v3325_v61  ;;  %v9208_v62 = vpop.f32.mrf.mxu0  ;;  %v9210_v57 = vpop.eup %7145  ;;  %v1638_v21 = vmul.f32 1.442695, %v1544_v27  ;;  %v1547_v47 = vsub.f32 %v8799_v55, %v1423_v23  ;;  %6644 = vmatprep.mubr.msk.f32.mxu1 %vm1321_vm1, %v9206_v50 }
 0x3c5   :  { %11728 = vst [vmem:[#allocation45_spill] sm:$0xff] %v9208_v62  ;;  %6645 = vmatmul.mubr.msk.f32.gmra.mxu1 %vm1321_vm1, %v9210_v57  ;;  %v1420_v19 = vpop.xlane.xlu0 %1419 }
 0x3c6   :  { %v9221_v39 = vpop.f32.mrf.mxu0  ;;  %7159 = vpow2.f32 %v1638_v21  ;;  %v1546_v20 = vsub.f32 %v8805_v4, %v1420_v19  ;;  %3317 = vmax.xlane.f32.xlu0 %v3316_v53  ;;  %v1644_v61 = vmul.f32 1.442695, %v1547_v47  ;;  %v1712_v47 = vsel %vm1321_vm1, %v8984_v32, 0.0 }
 0x3c7   :  { %11729 = vst [vmem:[#allocation46_spill] sm:$0xff] %v9221_v39  ;;  %v9224_v55 = vpop.eup %7147  ;;  %7161 = vpow2.f32 %v1640_v54  ;;  %v1429_v36 = vpop.xlane.xlu1 %1428  ;;  %v3337_v4 = vsel %vm1321_vm1, %v9221_v39, -inf  ;;  %v1721_v32 = vsel %vm1321_vm1, %v9027_v58, 0.0 }
 0x3c8   :  { %3332 = vmax.xlane.f32.xlu1 %v3331_v49  ;;  %v9226_v15 = vpop.f32.mrf.mxu0  ;;  %v9228_v27 = vpop.eup %7149  ;;  %v1642_v23 = vmul.f32 1.442695, %v1546_v20  ;;  %v1549_v43 = vsub.f32 %v8811_v48, %v1429_v36  ;;  %6647 = vmatprep.mubr.msk.f32.mxu1 %vm1321_vm1, %v9224_v55 }
 0x3c9   :  { %11730 = vst [vmem:[#allocation47_spill] sm:$0xff] %v9226_v15  ;;  %6648 = vmatmul.mubr.msk.f32.gmra.mxu1 %vm1321_vm1, %v9228_v27  ;;  %v1426_v54 = vpop.xlane.xlu0 %1425 }
 0x3ca   :  { %v9239_v21 = vpop.f32.mrf.mxu0  ;;  %7163 = vpow2.f32 %v1642_v23  ;;  %v1548_v49 = vsub.f32 %v8817_v8, %v1426_v54  ;;  %1713 = vadd.xlane.f32.xlu0 %v1712_v47  ;;  %v1648_v19 = vmul.f32 1.442695, %v1549_v43  ;;  %v1733_v23 = vsel %vm1321_vm1, %v9084_v30, 0.0 }
 0x3cb   :  { %11731 = vst [vmem:[#allocation48_spill] sm:$0xff] %v9239_v21  ;;  %v9242_v48 = vpop.eup %7151  ;;  %7165 = vpow2.f32 %v1644_v61  ;;  %v1435_v53 = vpop.xlane.xlu1 %1434  ;;  %v3322_v30 = vsel %vm1321_vm1, %v9190_v29, -inf  ;;  %v11746_v29 = vld [vmem:[#allocation2_spill] sm:$0xff] }
 0x3cc   :  { %3338 = vmax.xlane.f32.xlu1 %v3337_v4  ;;  %v9244_v20 = vpop.f32.mrf.mxu0  ;;  %v9246_v36 = vpop.eup %7153  ;;  %v1646_v39 = vmul.f32 1.442695, %v1548_v49  ;;  %v1551_v50 = vsub.f32 %v8823_v52, %v1435_v53  ;;  %6650 = vmatprep.mubr.msk.f32.mxu1 %vm1321_vm1, %v9242_v48 }
 0x3cd   :  { %11732 = vst [vmem:[#allocation49_spill] sm:$0xff] %v9244_v20  ;;  %6651 = vmatmul.mubr.msk.f32.gmra.mxu1 %vm1321_vm1, %v9246_v36  ;;  %v1432_v8 = vpop.xlane.xlu0 %1431 }
 0x3ce   :  { %v9255_v43 = vpop.f32.mrf.mxu0  ;;  %7167 = vpow2.f32 %v1646_v39  ;;  %v1550_v61 = vsub.f32 %v8829_v31, %v1432_v8  ;;  %1722 = vadd.xlane.f32.xlu0 %v1721_v32  ;;  %v1652_v4 = vmul.f32 1.442695, %v1551_v50 }
 0x3cf   :  { %11733 = vst [vmem:[#allocation50_spill] sm:$0xff] %v9255_v43  ;;  %v9260_v52 = vpop.eup %7155  ;;  %7169 = vpow2.f32 %v1648_v19  ;;  %v1441_v54 = vpop.xlane.xlu1 %1440  ;;  %v1730_v19 = vsel %vm1321_vm1, %v9080_v33, 0.0 }
 0x3d0   :  { %1734 = vadd.xlane.f32.xlu1 %v1733_v23  ;;  %v9262_v47 = vpop.eup %7157  ;;  %v1650_v49 = vmul.f32 1.442695, %v1550_v61  ;;  %v1553_v58 = vsub.f32 %v8835_v1, %v1441_v54  ;;  %6653 = vmatprep.mubr.msk.f32.mxu1 %vm1321_vm1, %v9260_v52  ;;  %v9271_v39 = vpop.f32.mrf.mxu0 }
 0x3d1   :  { %6654 = vmatmul.mubr.msk.f32.gmra.mxu1 %vm1321_vm1, %v9262_v47  ;;  %v1438_v31 = vpop.xlane.xlu0 %1437  ;;  %11734 = vst [vmem:[#allocation51_spill] sm:$0xff] %v9271_v39 }
 0x3d2   :  { %7171 = vpow2.f32 %v1650_v49  ;;  %v1552_v50 = vsub.f32 %v8841_v3, %v1438_v31  ;;  %3323 = vmax.xlane.f32.xlu0 %v3322_v30  ;;  %v1656_v53 = vmul.f32 1.442695, %v1553_v58  ;;  %v9278_v32 = vpop.f32.mrf.mxu0  ;;  %v3343_v3 = vsel %vm1321_vm1, %v9239_v21, -inf }
 0x3d3   :  { %v9276_v1 = vpop.eup %7159  ;;  %7173 = vpow2.f32 %v1652_v4  ;;  %v1447_v8 = vpop.xlane.xlu1 %1446  ;;  %11736 = vst [vmem:[#allocation53_spill] sm:$0xff] %v9278_v32  ;;  %v1718_v4 = vsel %vm1321_vm1, %v9022_v12, 0.0  ;;  %v3328_v12 = vsel %vm1321_vm1, %v9208_v62, -inf }
 0x3d4   :  { %11735 = vst [vmem:[#allocation52_spill] sm:$0xff] %v9276_v1  ;;  %1731 = vadd.xlane.f32.xlu1 %v1730_v19  ;;  %v9280_v61 = vpop.eup %7161  ;;  %v1654_v23 = vmul.f32 1.442695, %v1552_v50  ;;  %v1555_v54 = vsub.f32 %v8847_v9, %v1447_v8  ;;  %6656 = vmatprep.mubr.msk.f32.mxu1 %vm1321_vm1, %v9276_v1  ;;  %v9294_v30 = vpop.f32.mrf.mxu0  ;;  %v11738_v8 = vld [vmem:[#allocation10_spill] sm:$0xff] }
 0x3d5   :  { %6657 = vmatmul.mubr.msk.f32.gmra.mxu1 %vm1321_vm1, %v9280_v61  ;;  %v1444_v33 = vpop.xlane.xlu0 %1443  ;;  %11737 = vst [vmem:[#allocation54_spill] sm:$0xff] %v9294_v30 }
 0x3d6   :  { %7175 = vpow2.f32 %v1654_v23  ;;  %v1554_v49 = vsub.f32 %v8853_v0, %v1444_v33  ;;  %1719 = vadd.xlane.f32.xlu0 %v1718_v4  ;;  %v1660_v9 = vmul.f32 1.442695, %v1555_v54  ;;  %v1736_v23 = vsel %vm1321_vm1, %v9098_v34, 0.0  ;;  %v9310_v4 = vpop.f32.mrf.mxu0 }
 0x3d7   :  { %v9292_v58 = vpop.eup %7163  ;;  %7177 = vpow2.f32 %v1656_v53  ;;  %v1453_v31 = vpop.xlane.xlu1 %1452  ;;  %11739 = vst [vmem:[#allocation10_spill] sm:$0xff] %v9310_v4 }
 0x3d8   :  { %3344 = vmax.xlane.f32.xlu1 %v3343_v3  ;;  %v9296_v50 = vpop.eup %7165  ;;  %v1658_v19 = vmul.f32 1.442695, %v1554_v49  ;;  %v1557_v21 = vsub.f32 %v11738_v8, %v1453_v31  ;;  %6659 = vmatprep.mubr.msk.f32.mxu1 %vm1321_vm1, %v9292_v58  ;;  %v11740_v8 = vld [vmem:[#allocation11_spill] sm:$0xff] }
 0x3d9   :  { %6660 = vmatmul.mubr.msk.f32.gmra.mxu1 %vm1321_vm1, %v9296_v50  ;;  %v1450_v0 = vpop.xlane.xlu0 %1449 }
 0x3da   :  { %7179 = vpow2.f32 %v1658_v19  ;;  %v1556_v53 = vsub.f32 %v8865_v6, %v1450_v0  ;;  %3329 = vmax.xlane.f32.xlu0 %v3328_v12  ;;  %v1664_v3 = vmul.f32 1.442695, %v1557_v21  ;;  %v3349_v6 = vsel %vm1321_vm1, %v9255_v43, -inf  ;;  %v11742_v43 = vld [vmem:[#allocation13_spill] sm:$0xff] }
 0x3db   :  { %v9308_v54 = vpop.eup %7167  ;;  %7181 = vpow2.f32 %v1660_v9  ;;  %v1459_v33 = vpop.xlane.xlu1 %1458  ;;  %v3334_v21 = vsel %vm1321_vm1, %v9226_v15, -inf  ;;  %v11741_v9 = vld [vmem:[#allocation12_spill] sm:$0xff] }
 0x3dc   :  { %1737 = vadd.xlane.f32.xlu1 %v1736_v23  ;;  %v9312_v49 = vpop.eup %7169  ;;  %v1662_v31 = vmul.f32 1.442695, %v1556_v53  ;;  %v1559_v62 = vsub.f32 %v11740_v8, %v1459_v33  ;;  %6662 = vmatprep.mubr.msk.f32.mxu1 %vm1321_vm1, %v9308_v54  ;;  %v9326_v23 = vpop.f32.mrf.mxu0 }
 0x3dd   :  { %6663 = vmatmul.mubr.msk.f32.gmra.mxu1 %vm1321_vm1, %v9312_v49  ;;  %v1456_v34 = vpop.xlane.xlu0 %1455 }
 0x3de   :  { %7183 = vpow2.f32 %v1662_v31  ;;  %v1558_v19 = vsub.f32 %v11741_v9, %v1456_v34  ;;  %3335 = vmax.xlane.f32.xlu0 %v3334_v21  ;;  %v1668_v12 = vmul.f32 1.442695, %v1559_v62  ;;  %v9337_v62 = vpop.f32.mrf.mxu0  ;;  %v1745_v21 = vsel %vm1321_vm1, %v9120_v46, 0.0 }
 0x3df   :  { %v9324_v0 = vpop.eup %7171  ;;  %7185 = vpow2.f32 %v1664_v3  ;;  %v1465_v53 = vpop.xlane.xlu1 %1464  ;;  %v1739_v3 = vsel %vm1321_vm1, %v9102_v24, 0.0  ;;  %v3340_v46 = vsel %vm1321_vm1, %v9244_v20, -inf }
 0x3e0   :  { %3350 = vmax.xlane.f32.xlu1 %v3349_v6  ;;  %v9328_v33 = vpop.eup %7173  ;;  %v1666_v8 = vmul.f32 1.442695, %v1558_v19  ;;  %v1561_v1 = vsub.f32 %v11742_v43, %v1465_v53  ;;  %6665 = vmatprep.mubr.msk.f32.mxu1 %vm1321_vm1, %v9324_v0  ;;  %v11743_v6 = vld [vmem:[#allocation14_spill] sm:$0xff] }
 0x3e1   :  { %6666 = vmatmul.mubr.msk.f32.gmra.mxu1 %vm1321_vm1, %v9328_v33  ;;  %v1462_v31 = vpop.xlane.xlu0 %1461 }
 0x3e2   :  { %7187 = vpow2.f32 %v1666_v8  ;;  %v1560_v34 = vsub.f32 %v11743_v6, %v1462_v31  ;;  %1740 = vadd.xlane.f32.xlu0 %v1739_v3  ;;  %v1672_v9 = vmul.f32 1.442695, %v1561_v1  ;;  %v9353_v31 = vpop.f32.mrf.mxu0  ;;  %v11747_v1 = vld [vmem:[#allocation3_spill] sm:$0xff]  ;;  %v1742_v3 = vsel %vm1321_vm1, %v9116_v51, 0.0 }
 0x3e3   :  { %v9342_v43 = vpop.eup %7175  ;;  %7189 = vpow2.f32 %v1668_v12  ;;  %v1471_v19 = vpop.xlane.xlu1 %1470 }
 0x3e4   :  { %11744 = vst [vmem:[#allocation11_spill] sm:$0xff] %v9342_v43  ;;  %1746 = vadd.xlane.f32.xlu1 %v1745_v21  ;;  %v9344_v53 = vpop.eup %7177  ;;  %v1670_v15 = vmul.f32 1.442695, %v1560_v34  ;;  %v1563_v24 = vsub.f32 %v11746_v29, %v1471_v19  ;;  %6668 = vmatprep.mubr.msk.f32.mxu1 %vm1321_vm1, %v9342_v43  ;;  %v11749_v43 = vld [vmem:[#allocation4_spill] sm:$0xff] }
 0x3e5   :  { %11745 = vst [vmem:[#allocation12_spill] sm:$0xff] %v9344_v53  ;;  %6669 = vmatmul.mubr.msk.f32.gmra.mxu1 %vm1321_vm1, %v9344_v53  ;;  %v1468_v8 = vpop.xlane.xlu0 %1467 }
 0x3e6   :  { %7191 = vpow2.f32 %v1670_v15  ;;  %v1562_v12 = vsub.f32 %v11747_v1, %v1468_v8  ;;  %3341 = vmax.xlane.f32.xlu0 %v3340_v46  ;;  %v1676_v6 = vmul.f32 1.442695, %v1563_v24  ;;  %v3355_v15 = vsel %vm1321_vm1, %v9278_v32, -inf  ;;  %v9371_v24 = vpop.f32.mrf.mxu0  ;;  %v11751_v8 = vld [vmem:[#allocation5_spill] sm:$0xff]  ;;  %v11754_v32 = vld [vmem:[#allocation6_spill] sm:$0xff] }
 0x3e7   :  { %v9358_v29 = vpop.eup %7179  ;;  %7193 = vpow2.f32 %v1672_v9  ;;  %v1477_v34 = vpop.xlane.xlu1 %1476  ;;  %v3346_v9 = vsel %vm1321_vm1, %v9271_v39, -inf  ;;  %11750 = vst [vmem:[#allocation14_spill] sm:$0xff] %v9371_v24  ;;  %v11758_v39 = vld [vmem:[#allocation17_spill] sm:$0xff] }
 0x3e8   :  { %11748 = vst [vmem:[#allocation13_spill] sm:$0xff] %v9358_v29  ;;  %1743 = vadd.xlane.f32.xlu1 %v1742_v3  ;;  %v9360_v21 = vpop.eup %7181  ;;  %v1674_v19 = vmul.f32 1.442695, %v1562_v12  ;;  %v1565_v20 = vsub.f32 %v11749_v43, %v1477_v34  ;;  %6671 = vmatprep.mubr.msk.f32.mxu1 %vm1321_vm1, %v9358_v29 }
 0x3e9   :  { %6672 = vmatmul.mubr.msk.f32.gmra.mxu1 %vm1321_vm1, %v9360_v21  ;;  %v1474_v51 = vpop.xlane.xlu0 %1473 }
 0x3ea   :  { %7195 = vpow2.f32 %v1674_v19  ;;  %v1564_v46 = vsub.f32 %v11751_v8, %v1474_v51  ;;  %3347 = vmax.xlane.f32.xlu0 %v3346_v9  ;;  %v1680_v1 = vmul.f32 1.442695, %v1565_v20  ;;  %v3361_v19 = vsel %vm1321_vm1, %v9310_v4, -inf }
 0x3eb   :  { %v9374_v43 = vpop.eup %7183  ;;  %7197 = vpow2.f32 %v1676_v6  ;;  %v1483_v12 = vpop.xlane.xlu1 %1482  ;;  %v3352_v20 = vsel %vm1321_vm1, %v9294_v30, -inf }
 0x3ec   :  { %11752 = vst [vmem:[#allocation2_spill] sm:$0xff] %v9374_v43  ;;  %3356 = vmax.xlane.f32.xlu1 %v3355_v15  ;;  %v9376_v3 = vpop.eup %7185  ;;  %v1678_v34 = vmul.f32 1.442695, %v1564_v46  ;;  %v1567_v29 = vsub.f32 %v11754_v32, %v1483_v12  ;;  %6674 = vmatprep.mubr.msk.f32.mxu1 %vm1321_vm1, %v9374_v43  ;;  %v9387_v6 = vpop.f32.mrf.mxu0  ;;  %v11756_v15 = vld [vmem:[#allocation7_spill] sm:$0xff]  ;;  %v11759_v43 = vld [vmem:[#allocation8_spill] sm:$0xff] }
 0x3ed   :  { %11753 = vst [vmem:[#allocation3_spill] sm:$0xff] %v9376_v3  ;;  %6675 = vmatmul.mubr.msk.f32.gmra.mxu1 %vm1321_vm1, %v9376_v3  ;;  %v1480_v51 = vpop.xlane.xlu0 %1479  ;;  %11755 = vst [vmem:[#allocation4_spill] sm:$0xff] %v9387_v6  ;;  %v1570_v3 = vsub.f32 %v11758_v39, %v8943_v40  ;;  %v1757_v40 = vsel %vm1321_vm1, %v9156_v28, 0.0  ;;  %v3367_v28 = vsel %vm1321_vm1, %v9337_v62, -inf }
 0x3ee   :  { %7199 = vpow2.f32 %v1678_v34  ;;  %v1566_v9 = vsub.f32 %v11756_v15, %v1480_v51  ;;  %3353 = vmax.xlane.f32.xlu0 %v3352_v20  ;;  %v1684_v8 = vmul.f32 1.442695, %v1567_v29  ;;  %v9392_v12 = vpop.f32.mrf.mxu0  ;;  %v3358_v29 = vsel %vm1321_vm1, %v9326_v23, -inf  ;;  %v11760_v34 = vld [vmem:[#allocation9_spill] sm:$0xff] }
 0x3ef   :  { %v9390_v32 = vpop.eup %7187  ;;  %7201 = vpow2.f32 %v1680_v1  ;;  %v1489_v46 = vpop.xlane.xlu1 %1488  ;;  %11757 = vst [vmem:[#allocation5_spill] sm:$0xff] %v9392_v12 }
 0x3f0   :  { %3362 = vmax.xlane.f32.xlu1 %v3361_v19  ;;  %v9394_v4 = vpop.eup %7189  ;;  %v1682_v30 = vmul.f32 1.442695, %v1566_v9  ;;  %v1569_v53 = vsub.f32 %v11759_v43, %v1489_v46  ;;  %6677 = vmatprep.mubr.msk.f32.mxu1 %vm1321_vm1, %v9390_v32  ;;  %v11761_v43 = vld [vmem:[#allocation16_spill] sm:$0xff]  ;;  %v9412_v15 = vpop.f32.mrf.mxu0  ;;  %v1690_v46 = vmul.f32 1.442695, %v1570_v3 }
 0x3f1   :  { %6678 = vmatmul.mubr.msk.f32.gmra.mxu1 %vm1321_vm1, %v9394_v4  ;;  %v1486_v1 = vpop.xlane.xlu0 %1485  ;;  %v1571_v51 = vsub.f32 %v11761_v43, %v8941_v42  ;;  %11762 = vst [vmem:[#allocation6_spill] sm:$0xff] %v9412_v15  ;;  %v1754_v42 = vsel %vm1321_vm1, %v9152_v11, 0.0  ;;  %v11766_v43 = vld [vmem:[#allocation21_spill] sm:$0xff]  ;;  %v3373_v11 = vsel %vm1321_vm1, %v9371_v24, -inf }
 0x3f2   :  { %7203 = vpow2.f32 %v1682_v30  ;;  %3359 = vmax.xlane.f32.xlu0 %v3358_v29  ;;  %v1568_v19 = vsub.f32 %v11760_v34, %v1486_v1  ;;  %v1688_v20 = vmul.f32 1.442695, %v1569_v53  ;;  %v11763_v30 = vld [vmem:[#allocation19_spill] sm:$0xff]  ;;  %v9430_v34 = vpop.f32.mrf.mxu0 }
 0x3f3   :  { %v9408_v39 = vpop.eup %7191  ;;  %7205 = vpow2.f32 %v1684_v8  ;;  %v1572_v29 = vsub.f32 %v11763_v30, %v8949_v2  ;;  %v1692_v3 = vmul.f32 1.442695, %v1571_v51  ;;  %v11764_v2 = vld [vmem:[#allocation18_spill] sm:$0xff]  ;;  %11765 = vst [vmem:[#allocation7_spill] sm:$0xff] %v9430_v34  ;;  %v1574_v30 = vsub.f32 %v11766_v43, %v8963_v45 }
 0x3f4   :  { %1758 = vadd.xlane.f32.xlu1 %v1757_v40  ;;  %v9414_v9 = vpop.eup %7193  ;;  %v1686_v1 = vmul.f32 1.442695, %v1568_v19  ;;  %6680 = vmatprep.mubr.msk.f32.mxu1 %vm1321_vm1, %v9408_v39  ;;  %v1573_v8 = vsub.f32 %v11764_v2, %v8947_v10  ;;  %v1763_v10 = vsel %vm1321_vm1, %v9174_v60, 0.0  ;;  %v3364_v60 = vsel %vm1321_vm1, %v9353_v31, -inf }
 0x3f5   :  { %6681 = vmatmul.mubr.msk.f32.gmra.mxu1 %vm1321_vm1, %v9414_v9  ;;  %v1694_v40 = vmul.f32 1.442695, %v1572_v29  ;;  %v9448_v29 = vpop.f32.mrf.mxu0 }
 0x3f6   :  { %7207 = vpow2.f32 %v1686_v1  ;;  %1755 = vadd.xlane.f32.xlu0 %v1754_v42  ;;  %11768 = vst [vmem:[#allocation17_spill] sm:$0xff] %v9448_v29  ;;  %v11769_v42 = vld [vmem:[#allocation23_spill] sm:$0xff] }
 0x3f7   :  { %v9426_v53 = vpop.eup %7195  ;;  %7209 = vpow2.f32 %v1688_v20  ;;  %v1696_v20 = vmul.f32 1.442695, %v1573_v8  ;;  %v1576_v2 = vsub.f32 %v11769_v42, %v9001_v41  ;;  %v11771_v41 = vld [vmem:[#allocation22_spill] sm:$0xff] }
 0x3f8   :  { %3368 = vmax.xlane.f32.xlu1 %v3367_v28  ;;  %v9432_v19 = vpop.eup %7197  ;;  %7211 = vpow2.f32 %v1690_v46  ;;  %6683 = vmatprep.mubr.msk.f32.mxu1 %vm1321_vm1, %v9426_v53  ;;  %v11767_v46 = vld [vmem:[#allocation20_spill] sm:$0xff]  ;;  %v1698_v28 = vmul.f32 1.442695, %v1574_v30  ;;  %v1577_v43 = vsub.f32 %v11771_v41, %v8987_v35 }
 0x3f9   :  { %6684 = vmatmul.mubr.msk.f32.gmra.mxu1 %vm1321_vm1, %v9432_v19  ;;  %7213 = vpow2.f32 %v1692_v3  ;;  %v1575_v45 = vsub.f32 %v11767_v46, %v8955_v7  ;;  %v9460_v7 = vpop.f32.mrf.mxu0  ;;  %v1769_v3 = vsel %vm1321_vm1, %v9192_v26, 0.0  ;;  %v1760_v26 = vsel %vm1321_vm1, %v9170_v22, 0.0 }
 0x3fa   :  { %1764 = vadd.xlane.f32.xlu0 %v1763_v10  ;;  %7215 = vpow2.f32 %v1694_v40  ;;  %11770 = vst [vmem:[#allocation8_spill] sm:$0xff] %v9460_v7  ;;  %v3379_v10 = vsel %vm1321_vm1, %v9392_v12, -inf  ;;  %v1704_v46 = vmul.f32 1.442695, %v1577_v43  ;;  %v3370_v22 = vsel %vm1321_vm1, %v9387_v6, -inf }
 0x3fb   :  { %v9444_v51 = vpop.eup %7199  ;;  %7217 = vpow2.f32 %v1696_v20  ;;  %v1700_v40 = vmul.f32 1.442695, %v1575_v45  ;;  %v9478_v20 = vpop.f32.mrf.mxu0  ;;  %v1781_v43 = vsel %vm1321_vm1, %v9228_v27, 0.0 }
 0x3fc   :  { %3374 = vmax.xlane.f32.xlu1 %v3373_v11  ;;  %v9450_v1 = vpop.eup %7201  ;;  %6686 = vmatprep.mubr.msk.f32.mxu1 %vm1321_vm1, %v9444_v51  ;;  %7219 = vpow2.f32 %v1698_v28  ;;  %v1702_v11 = vmul.f32 1.442695, %v1576_v2  ;;  %v3385_v28 = vsel %vm1321_vm1, %v9430_v34, -inf }
 0x3fd   :  { %6687 = vmatmul.mubr.msk.f32.gmra.mxu1 %vm1321_vm1, %v9450_v1  ;;  %7221 = vpow2.f32 %v1700_v40  ;;  %v9494_v2 = vpop.f32.mrf.mxu0  ;;  %v1766_v40 = vsel %vm1321_vm1, %v9188_v18, 0.0  ;;  %v3376_v18 = vsel %vm1321_vm1, %v9412_v15, -inf }
 0x3fe   :  { %3365 = vmax.xlane.f32.xlu0 %v3364_v60  ;;  %7223 = vpow2.f32 %v1702_v11  ;;  %11772 = vst [vmem:[#allocation9_spill] sm:$0xff] %v9494_v2 }
 0x3ff   :  { %v9464_v8 = vpop.eup %7203  ;;  %7225 = vpow2.f32 %v1704_v46  ;;  %v9506_v41 = vpop.f32.mrf.mxu0 }
 0x400   :  { %1770 = vadd.xlane.f32.xlu1 %v1769_v3  ;;  %v9468_v30 = vpop.eup %7205  ;;  %6689 = vmatprep.mubr.msk.f32.mxu1 %vm1321_vm1, %v9464_v8  ;;  %11773 = vst [vmem:[#allocation16_spill] sm:$0xff] %v9506_v41 }
 0x401   :  { %6690 = vmatmul.mubr.msk.f32.gmra.mxu1 %vm1321_vm1, %v9468_v30  ;;  %v9522_v46 = vpop.f32.mrf.mxu0 }
 0x402   :  { %1761 = vadd.xlane.f32.xlu0 %v1760_v26  ;;  %11774 = vst [vmem:[#allocation19_spill] sm:$0xff] %v9522_v46 }
 0x403   :  { %v9480_v35 = vpop.eup %7207 }
 0x404   :  { %3380 = vmax.xlane.f32.xlu1 %v3379_v10  ;;  %v9482_v45 = vpop.eup %7209  ;;  %6692 = vmatprep.mubr.msk.f32.mxu1 %vm1321_vm1, %v9480_v35  ;;  %v3391_v10 = vsel %vm1321_vm1, %v9460_v7, -inf }
 0x405   :  { %v9488_v42 = vpop.eup %7211  ;;  %6693 = vmatmul.mubr.msk.f32.gmra.mxu1 %vm1321_vm1, %v9482_v45 }
 0x406   :  { %3371 = vmax.xlane.f32.xlu0 %v3370_v22  ;;  %6695 = vmatprep.mubr.msk.f32.mxu1 %vm1321_vm1, %v9488_v42  ;;  %v9498_v60 = vpop.eup %7213 }
 0x407   :  { %v9500_v3 = vpop.eup %7215 }
 0x408   :  { %3386 = vmax.xlane.f32.xlu1 %v3385_v28  ;;  %v9512_v11 = vpop.eup %7217  ;;  %v3397_v28 = vsel %vm1321_vm1, %v9494_v2, -inf  ;;  %v3403_v2 = vsel %vm1321_vm1, %v9522_v46, -inf }
 0x409   :  { %6696 = vmatmul.mubr.msk.f32.gmra.mxu1 %vm1321_vm1, %v9498_v60  ;;  %v9516_v26 = vpop.eup %7219 }
 0x40a   :  { %1767 = vadd.xlane.f32.xlu0 %v1766_v40  ;;  %6698 = vmatprep.mubr.msk.f32.mxu1 %vm1321_vm1, %v9500_v3  ;;  %v9526_v27 = vpop.eup %7221  ;;  %v3382_v40 = vsel %vm1321_vm1, %v9448_v29, -inf  ;;  %v1778_v29 = vsel %vm1321_vm1, %v9224_v55, 0.0  ;;  %v1787_v55 = vsel %vm1321_vm1, %v9246_v36, 0.0  ;;  %v1805_v36 = vsel %vm1321_vm1, %v9296_v50, 0.0 }
 0x40b   :  { %v9530_v22 = vpop.eup %7223  ;;  %v1802_v50 = vsel %vm1321_vm1, %v9292_v58, 0.0 }
 0x40c   :  { %1782 = vadd.xlane.f32.xlu1 %v1781_v43  ;;  %v9536_v43 = vpop.f32.mrf.mxu0 }
 0x40d   :  { %6699 = vmatmul.mubr.msk.f32.gmra.mxu1 %vm1321_vm1, %v9512_v11  ;;  %11775 = vst [vmem:[#allocation18_spill] sm:$0xff] %v9536_v43 }
 0x40e   :  { %3377 = vmax.xlane.f32.xlu0 %v3376_v18  ;;  %6701 = vmatprep.mubr.msk.f32.mxu1 %vm1321_vm1, %v9516_v26  ;;  %v9549_v34 = vpop.f32.mrf.mxu0 }
 0x40f   :  { %11776 = vst [vmem:[#allocation21_spill] sm:$0xff] %v9549_v34  ;;  %v3409_v46 = vsel %vm1321_vm1, %v9549_v34, -inf  ;;  %v11780_v34 = vld [vmem:[#allocation25_spill] sm:$0xff] }
 0x410   :  { %3392 = vmax.xlane.f32.xlu1 %v3391_v10  ;;  %v9540_v10 = vpop.eup %7225 }
 0x411   :  { %6702 = vmatmul.mubr.msk.f32.gmra.mxu1 %vm1321_vm1, %v9526_v27 }
 0x412   :  { %3383 = vmax.xlane.f32.xlu0 %v3382_v40  ;;  %6704 = vmatprep.mubr.msk.f32.mxu1 %vm1321_vm1, %v9530_v22 }
 0x414   :  { %3398 = vmax.xlane.f32.xlu1 %v3397_v28  ;;  %v3249_v18 = vpop.xlane.xlu1 %3248 }
 0x415   :  { %v3437_v7 = vsub.f32 %v8965_v63, %v3249_v18  ;;  %6705 = vmatmul.mubr.msk.f32.gmra.mxu1 %vm1321_vm1, %v9540_v10  ;;  %v9557_v18 = vpop.f32.mrf.mxu0 }
 0x416   :  { %1779 = vadd.xlane.f32.xlu0 %v1778_v29  ;;  %v3246_v40 = vpop.xlane.xlu0 %3245  ;;  %11777 = vst [vmem:[#allocation20_spill] sm:$0xff] %v9557_v18 }
 0x417   :  { %v3436_v28 = vsub.f32 %v8971_v16, %v3246_v40  ;;  %v3502_v15 = vmul.f32 1.442695, %v3437_v7  ;;  %v9559_v24 = vpop.f32.mrf.mxu0  ;;  %v11779_v16 = vld [vmem:[#allocation24_spill] sm:$0xff] }
 0x418   :  { %3404 = vmax.xlane.f32.xlu1 %v3403_v2  ;;  %v3255_v12 = vpop.xlane.xlu1 %3254  ;;  %11778 = vst [vmem:[#allocation23_spill] sm:$0xff] %v9559_v24 }
 0x419   :  { %v3500_v6 = vmul.f32 1.442695, %v3436_v28  ;;  %v3439_v63 = vsub.f32 %v8978_v17, %v3255_v12  ;;  %v3388_v17 = vsel %vm1321_vm1, %v9478_v20, -inf }
 0x41a   :  { %1788 = vadd.xlane.f32.xlu0 %v1787_v55 }
 0x41b   :  { %7227 = vpow2.f32 %v3500_v6  ;;  %v3252_v29 = vpop.xlane.xlu0 %3251  ;;  %v3506_v40 = vmul.f32 1.442695, %v3439_v63 }
 0x41c   :  { %3410 = vmax.xlane.f32.xlu1 %v3409_v46  ;;  %7229 = vpow2.f32 %v3502_v15  ;;  %v3438_v7 = vsub.f32 %v11779_v16, %v3252_v29  ;;  %v9567_v46 = vpop.f32.mrf.mxu0  ;;  %v11782_v15 = vld [vmem:[#allocation26_spill] sm:$0xff]  ;;  %v11783_v16 = vld [vmem:[#allocation27_spill] sm:$0xff] }
 0x41d   :  { %v3261_v2 = vpop.xlane.xlu1 %3260  ;;  %11781 = vst [vmem:[#allocation22_spill] sm:$0xff] %v9567_v46 }
 0x41e   :  { %v3441_v28 = vsub.f32 %v11780_v34, %v3261_v2  ;;  %v3504_v12 = vmul.f32 1.442695, %v3438_v7  ;;  %3389 = vmax.xlane.f32.xlu0 %v3388_v17  ;;  %v1784_v2 = vsel %vm1321_vm1, %v9242_v48, 0.0  ;;  %v9573_v7 = vpop.f32.mrf.mxu0 }
 0x41f   :  { %v3258_v6 = vpop.xlane.xlu0 %3257  ;;  %11784 = vst [vmem:[#allocation24_spill] sm:$0xff] %v9573_v7 }
 0x420   :  { %1806 = vadd.xlane.f32.xlu1 %v1805_v36  ;;  %7231 = vpow2.f32 %v3504_v12  ;;  %v3440_v55 = vsub.f32 %v11782_v15, %v3258_v6  ;;  %v3510_v63 = vmul.f32 1.442695, %v3441_v28  ;;  %v11785_v12 = vld [vmem:[#allocation15_spill] sm:$0xff] }
 0x421   :  { %v3267_v29 = vpop.xlane.xlu1 %3266  ;;  %7233 = vpow2.f32 %v3506_v40  ;;  %v3415_v40 = vsel %vm1321_vm1, %v9559_v24, -inf }
 0x422   :  { %v3443_v34 = vsub.f32 %v11783_v16, %v3267_v29  ;;  %v3508_v17 = vmul.f32 1.442695, %v3440_v55  ;;  %1785 = vadd.xlane.f32.xlu0 %v1784_v2  ;;  %v3394_v55 = vsel %vm1321_vm1, %v9506_v41, -inf  ;;  %v9583_v29 = vpop.f32.mrf.mxu0 }
 0x423   :  { %v3264_v36 = vpop.xlane.xlu0 %3263  ;;  %11786 = vst [vmem:[#allocation25_spill] sm:$0xff] %v9583_v29 }
 0x424   :  { %1803 = vadd.xlane.f32.xlu1 %v1802_v50  ;;  %7235 = vpow2.f32 %v3508_v17  ;;  %v3442_v6 = vsub.f32 %v11785_v12, %v3264_v36  ;;  %v3514_v28 = vmul.f32 1.442695, %v3443_v34  ;;  %v3400_v34 = vsel %vm1321_vm1, %v9536_v43, -inf  ;;  %v9595_v12 = vpop.f32.mrf.mxu0 }
 0x425   :  { %v3273_v15 = vpop.xlane.xlu1 %3272  ;;  %7237 = vpow2.f32 %v3510_v63  ;;  %11787 = vst [vmem:[#allocation26_spill] sm:$0xff] %v9595_v12 }
 0x426   :  { %v3445_v48 = vsub.f32 %v9037_v37, %v3273_v15  ;;  %v3512_v16 = vmul.f32 1.442695, %v3442_v6  ;;  %3395 = vmax.xlane.f32.xlu0 %v3394_v55 }
 0x427   :  { %v3270_v58 = vpop.xlane.xlu0 %3269 }
 0x428   :  { %3416 = vmax.xlane.f32.xlu1 %v3415_v40  ;;  %v9585_v2 = vpop.eup %7227  ;;  %7239 = vpow2.f32 %v3512_v16  ;;  %v3444_v17 = vsub.f32 %v9042_v38, %v3270_v58  ;;  %v3518_v63 = vmul.f32 1.442695, %v3445_v48  ;;  %v1808_v38 = vsel %vm1321_vm1, %v9308_v54, 0.0 }
 0x429   :  { %v3279_v50 = vpop.xlane.xlu1 %3278  ;;  %v9588_v36 = vpop.eup %7229  ;;  %7241 = vpow2.f32 %v3514_v28  ;;  %6835 = vmatprep.mubr.msk.f32.mxu1 %vm1321_vm1, %v9585_v2  ;;  %v3421_v28 = vsel %vm1321_vm1, %v9573_v7, -inf  ;;  %v3406_v58 = vsel %vm1321_vm1, %v9557_v18, -inf }
 0x42a   :  { %v3447_v37 = vsub.f32 %v9047_v25, %v3279_v50  ;;  %v3516_v6 = vmul.f32 1.442695, %v3444_v17  ;;  %3401 = vmax.xlane.f32.xlu0 %v3400_v34  ;;  %6836 = vmatmul.mubr.msk.f32.vlgmr.msra.gmra.mxu1 %vm1321_vm1, %v9588_v36  ;;  %v9609_v17 = vpop.f32.mrf.mxu0 }
 0x42b   :  { %v3276_v15 = vpop.xlane.xlu0 %3275  ;;  %11788 = vst [vmem:[#allocation27_spill] sm:$0xff] %v9609_v17 }
 0x42c   :  { %1809 = vadd.xlane.f32.xlu1 %v1808_v38  ;;  %7243 = vpow2.f32 %v3516_v6  ;;  %v3446_v25 = vsub.f32 %v9054_v13, %v3276_v15  ;;  %v3522_v55 = vmul.f32 1.442695, %v3447_v37  ;;  %v3427_v37 = vsel %vm1321_vm1, %v9595_v12, -inf  ;;  %v11789_v38 = vld [vmem:[#allocation30_spill] sm:$0xff] }
 0x42d   :  { %v3285_v40 = vpop.xlane.xlu1 %3284  ;;  %v9604_v48 = vpop.eup %7231  ;;  %7245 = vpow2.f32 %v3518_v63 }
 0x42e   :  { %v3449_v16 = vsub.f32 %v9065_v59, %v3285_v40  ;;  %v9611_v54 = vpop.eup %7233  ;;  %v3520_v50 = vmul.f32 1.442695, %v3446_v25  ;;  %3407 = vmax.xlane.f32.xlu0 %v3406_v58  ;;  %6838 = vmatprep.mubr.msk.f32.mxu1 %vm1321_vm1, %v9604_v48  ;;  %v1811_v25 = vsel %vm1321_vm1, %v9312_v49, 0.0  ;;  %v9625_v40 = vpop.f32.mrf.mxu0 }
 0x42f   :  { %6839 = vmatmul.mubr.msk.f32.gmra.mxu1 %vm1321_vm1, %v9611_v54  ;;  %v3282_v13 = vpop.xlane.xlu0 %3281  ;;  %11790 = vst [vmem:[#allocation15_spill] sm:$0xff] %v9625_v40  ;;  %v3433_v49 = vsel %vm1321_vm1, %v9625_v40, -inf }
 0x430   :  { %3422 = vmax.xlane.f32.xlu1 %v3421_v28  ;;  %7247 = vpow2.f32 %v3520_v50  ;;  %v3448_v59 = vsub.f32 %v9070_v44, %v3282_v13  ;;  %v3526_v6 = vmul.f32 1.442695, %v3449_v16 }
 0x431   :  { %v3291_v63 = vpop.xlane.xlu1 %3290  ;;  %v9620_v34 = vpop.eup %7235  ;;  %7249 = vpow2.f32 %v3522_v55  ;;  %v11791_v55 = vld [vmem:[#allocation31_spill] sm:$0xff] }
 0x432   :  { %v3451_v15 = vsub.f32 %v11789_v38, %v3291_v63  ;;  %v9627_v58 = vpop.eup %7237  ;;  %v3524_v28 = vmul.f32 1.442695, %v3448_v59  ;;  %1812 = vadd.xlane.f32.xlu0 %v1811_v25  ;;  %6841 = vmatprep.mubr.msk.f32.mxu1 %vm1321_vm1, %v9620_v34  ;;  %v11792_v63 = vld [vmem:[#allocation32_spill] sm:$0xff]  ;;  %v3412_v25 = vsel %vm1321_vm1, %v9567_v46, -inf }
 0x433   :  { %6842 = vmatmul.mubr.msk.f32.gmra.mxu1 %vm1321_vm1, %v9627_v58  ;;  %v3288_v44 = vpop.xlane.xlu0 %3287 }
 0x434   :  { %3428 = vmax.xlane.f32.xlu1 %v3427_v37  ;;  %7251 = vpow2.f32 %v3524_v28  ;;  %v3450_v16 = vsub.f32 %v11791_v55, %v3288_v44  ;;  %v3530_v59 = vmul.f32 1.442695, %v3451_v15 }
 0x435   :  { %v3297_v50 = vpop.xlane.xlu1 %3296  ;;  %v9636_v13 = vpop.eup %7239  ;;  %7253 = vpow2.f32 %v3526_v6  ;;  %v11793_v6 = vld [vmem:[#allocation33_spill] sm:$0xff] }
 0x436   :  { %v3453_v38 = vsub.f32 %v11792_v63, %v3297_v50  ;;  %v9641_v12 = vpop.eup %7241  ;;  %v3528_v7 = vmul.f32 1.442695, %v3450_v16  ;;  %3413 = vmax.xlane.f32.xlu0 %v3412_v25  ;;  %6844 = vmatprep.mubr.msk.f32.mxu1 %vm1321_vm1, %v9636_v13  ;;  %v11794_v50 = vld [vmem:[#allocation34_spill] sm:$0xff]  ;;  %v3418_v16 = vsel %vm1321_vm1, %v9583_v29, -inf }
 0x437   :  { %6845 = vmatmul.mubr.msk.f32.gmra.mxu1 %vm1321_vm1, %v9641_v12  ;;  %v3294_v37 = vpop.xlane.xlu0 %3293 }
 0x438   :  { %3434 = vmax.xlane.f32.xlu1 %v3433_v49  ;;  %7255 = vpow2.f32 %v3528_v7  ;;  %v3452_v15 = vsub.f32 %v11793_v6, %v3294_v37  ;;  %v3534_v55 = vmul.f32 1.442695, %v3453_v38  ;;  %v1829_v7 = vsel %vm1321_vm1, %v9360_v21, 0.0 }
 0x439   :  { %v3303_v28 = vpop.xlane.xlu1 %3302  ;;  %v9648_v44 = vpop.eup %7243  ;;  %7257 = vpow2.f32 %v3530_v59  ;;  %v11795_v59 = vld [vmem:[#allocation35_spill] sm:$0xff] }
 0x43a   :  { %v3455_v63 = vsub.f32 %v11794_v50, %v3303_v28  ;;  %v9653_v25 = vpop.eup %7245  ;;  %v3532_v40 = vmul.f32 1.442695, %v3452_v15  ;;  %3419 = vmax.xlane.f32.xlu0 %v3418_v16  ;;  %6847 = vmatprep.mubr.msk.f32.mxu1 %vm1321_vm1, %v9648_v44  ;;  %v3424_v50 = vsel %vm1321_vm1, %v9609_v17, -inf  ;;  %v11798_v17 = vld [vmem:[#allocation29_spill] sm:$0xff] }
 0x43b   :  { %6848 = vmatmul.mubr.msk.f32.gmra.mxu1 %vm1321_vm1, %v9653_v25  ;;  %v3300_v49 = vpop.xlane.xlu0 %3299 }
 0x43c   :  { %1830 = vadd.xlane.f32.xlu1 %v1829_v7  ;;  %7259 = vpow2.f32 %v3532_v40  ;;  %v3454_v38 = vsub.f32 %v11795_v59, %v3300_v49  ;;  %v3538_v15 = vmul.f32 1.442695, %v3455_v63  ;;  %v1748_v40 = vsel %vm1321_vm1, %v9134_v5, 0.0  ;;  %v9673_v7 = vpop.f32.mrf.mxu0 }
 0x43d   :  { %v3309_v37 = vpop.xlane.xlu1 %3308  ;;  %v9662_v6 = vpop.eup %7247  ;;  %7261 = vpow2.f32 %v3534_v55  ;;  %11796 = vst [vmem:[#allocation30_spill] sm:$0xff] %v9673_v7 }
 0x43e   :  { %v3457_v28 = vsub.f32 %v9129_v14, %v3309_v37  ;;  %v9667_v16 = vpop.eup %7249  ;;  %v3536_v21 = vmul.f32 1.442695, %v3454_v38  ;;  %3425 = vmax.xlane.f32.xlu0 %v3424_v50  ;;  %6850 = vmatprep.mubr.msk.f32.mxu1 %vm1321_vm1, %v9662_v6  ;;  %v11797_v14 = vld [vmem:[#allocation36_spill] sm:$0xff]  ;;  %v3430_v37 = vsel %vm1321_vm1, %v9673_v7, -inf }
 0x43f   :  { %6851 = vmatmul.mubr.msk.f32.gmra.mxu1 %vm1321_vm1, %v9667_v16  ;;  %v3306_v55 = vpop.xlane.xlu0 %3305 }
 0x440   :  { %1749 = vadd.xlane.f32.xlu1 %v1748_v40  ;;  %7263 = vpow2.f32 %v3536_v21  ;;  %v3456_v63 = vsub.f32 %v11797_v14, %v3306_v55  ;;  %v3542_v38 = vmul.f32 1.442695, %v3457_v28  ;;  %v1727_v21 = vsel %vm1321_vm1, %v11798_v17, 0.0  ;;  %v11799_v55 = vld [vmem:[#allocation38_spill] sm:$0xff] }
 0x441   :  { %v3315_v49 = vpop.xlane.xlu1 %3314  ;;  %v9678_v59 = vpop.eup %7251  ;;  %7265 = vpow2.f32 %v3538_v15  ;;  %v1793_v17 = vsel %vm1321_vm1, %v9262_v47, 0.0  ;;  %v1877_v47 = vsel %vm1321_vm1, %v9498_v60, 0.0  ;;  %v1814_v60 = vsel %vm1321_vm1, %v9324_v0, 0.0 }
 0x442   :  { %v9682_v50 = vpop.eup %7253  ;;  %v3540_v5 = vmul.f32 1.442695, %v3456_v63  ;;  %3431 = vmax.xlane.f32.xlu0 %v3430_v37  ;;  %6853 = vmatprep.mubr.msk.f32.mxu1 %vm1321_vm1, %v9678_v59  ;;  %v3459_v14 = vsub.f32 %v11799_v55, %v3315_v49  ;;  %v11800_v63 = vld [vmem:[#allocation28_spill] sm:$0xff]  ;;  %v1775_v0 = vsel %vm1321_vm1, %v9210_v57, 0.0  ;;  %v1799_v57 = vsel %vm1321_vm1, %v9280_v61, 0.0 }
 0x443   :  { %6854 = vmatmul.mubr.msk.f32.gmra.mxu1 %vm1321_vm1, %v9682_v50  ;;  %v1711_v40 = vpop.xlane.xlu0 %1710  ;;  %v1724_v37 = vsel %vm1321_vm1, %v11800_v63, 0.0  ;;  %v1883_v61 = vsel %vm1321_vm1, %v9512_v11, 0.0  ;;  %v11815_v11 = vld [vmem:[#allocation12_spill] sm:$0xff] }
 0x444   :  { %1728 = vadd.xlane.f32.xlu1 %v1727_v21  ;;  %7267 = vpow2.f32 %v3540_v5  ;;  %v3546_v63 = vmul.f32 1.442695, %v3459_v14 }
 0x445   :  { %v3321_v15 = vpop.xlane.xlu1 %3320  ;;  %v9690_v28 = vpop.eup %7255  ;;  %7269 = vpow2.f32 %v3542_v38  ;;  %v11801_v38 = vld [vmem:[#allocation39_spill] sm:$0xff] }
 0x446   :  { %v9695_v7 = vpop.eup %7257  ;;  %7271 = vrcp.f32 %v1711_v40  ;;  %1725 = vadd.xlane.f32.xlu0 %v1724_v37  ;;  %6856 = vmatprep.mubr.msk.f32.mxu1 %vm1321_vm1, %v9690_v28  ;;  %v1790_v40 = vsel %vm1321_vm1, %v9260_v52, 0.0  ;;  %v11804_v52 = vld [vmem:[#allocation40_spill] sm:$0xff] }
 0x447   :  { %6857 = vmatmul.mubr.msk.f32.gmra.mxu1 %vm1321_vm1, %v9695_v7  ;;  %v3312_v5 = vpop.xlane.xlu0 %3311 }
 0x448   :  { %1794 = vadd.xlane.f32.xlu1 %v1793_v17  ;;  %v3458_v49 = vsub.f32 %v11801_v38, %v3312_v5  ;;  %v3461_v38 = vsub.f32 %v11804_v52, %v3321_v15  ;;  %v11807_v52 = vld [vmem:[#allocation37_spill] sm:$0xff] }
 0x449   :  { %v1717_v21 = vpop.xlane.xlu1 %1716  ;;  %v9704_v55 = vpop.eup %7259 }
 0x44a   :  { %11802 = vst [vmem:[#allocation31_spill] sm:$0xff] %v9704_v55  ;;  %v9708_v37 = vpop.eup %7261  ;;  %v3544_v29 = vmul.f32 1.442695, %v3458_v49  ;;  %7273 = vrcp.f32 %v1717_v21  ;;  %1791 = vadd.xlane.f32.xlu0 %v1790_v40  ;;  %6859 = vmatprep.mubr.msk.f32.mxu1 %vm1321_vm1, %v9704_v55  ;;  %v1874_v49 = vsel %vm1321_vm1, %v9488_v42, 0.0  ;;  %v3550_v42 = vmul.f32 1.442695, %v3461_v38 }
 0x44b   :  { %6860 = vmatmul.mubr.msk.f32.gmra.mxu1 %vm1321_vm1, %v9708_v37  ;;  %v1708_v17 = vpop.xlane.xlu0 %1707 }
 0x44c   :  { %1878 = vadd.xlane.f32.xlu1 %v1877_v47  ;;  %7275 = vpow2.f32 %v3544_v29  ;;  %v6613_v47 = vpop.f32.mrf.mxu1 }
 0x44d   :  { %v3327_v14 = vpop.xlane.xlu1 %3326  ;;  %v9716_v5 = vpop.eup %7263  ;;  %7277 = vpow2.f32 %v3546_v63 }
 0x44e   :  { %11803 = vst [vmem:[#allocation32_spill] sm:$0xff] %v9716_v5  ;;  %v9721_v21 = vpop.eup %7265  ;;  %1875 = vadd.xlane.f32.xlu0 %v1874_v49  ;;  %6862 = vmatprep.mubr.msk.f32.mxu1 %vm1321_vm1, %v9716_v5  ;;  %v1751_v49 = vsel %vm1321_vm1, %v11807_v52, 0.0  ;;  %v11809_v52 = vld [vmem:[#allocation44_spill] sm:$0xff] }
 0x44f   :  { %11805 = vst [vmem:[#allocation33_spill] sm:$0xff] %v9721_v21  ;;  %6863 = vmatmul.mubr.msk.f32.gmra.mxu1 %vm1321_vm1, %v9721_v21  ;;  %v3318_v29 = vpop.xlane.xlu0 %3317 }
 0x450   :  { %1815 = vadd.xlane.f32.xlu1 %v1814_v60  ;;  %v3460_v63 = vsub.f32 %v9172_v56, %v3318_v29 }
 0x451   :  { %v9730_v15 = vpop.xlane.xlu1 %3332  ;;  %v9732_v40 = vpop.eup %7267 }
 0x452   :  { %11806 = vst [vmem:[#allocation34_spill] sm:$0xff] %v9732_v40  ;;  %v9736_v46 = vpop.eup %7269  ;;  %v3548_v24 = vmul.f32 1.442695, %v3460_v63  ;;  %1752 = vadd.xlane.f32.xlu0 %v1751_v49  ;;  %6865 = vmatprep.mubr.msk.f32.mxu1 %vm1321_vm1, %v9732_v40  ;;  %v9748_v63 = vpop.f32.mrf.mxu1  ;;  %v1772_v49 = vsel %vm1321_vm1, %v11809_v52, 0.0  ;;  %v1817_v52 = vsel %vm1321_vm1, %v9328_v33, 0.0 }
 0x453   :  { %11808 = vst [vmem:[#allocation35_spill] sm:$0xff] %v9736_v46  ;;  %v7272_v56 = vpop.eup %7271  ;;  %6866 = vmatmul.mubr.msk.f32.gmra.mxu1 %vm1321_vm1, %v9736_v46  ;;  %v1714_v60 = vpop.xlane.xlu0 %1713  ;;  %v1823_v46 = vsel %vm1321_vm1, %v11815_v11, 0.0 }
 0x454   :  { %1776 = vadd.xlane.f32.xlu1 %v1775_v0  ;;  %v9744_v38 = vmul.f32 %v7272_v56, %v6613_v47  ;;  %7279 = vpow2.f32 %v3548_v24  ;;  %v6616_v43 = vpop.f32.mrf.mxu1 }
 0x455   :  { %v9746_v29 = vpop.xlane.xlu1 %3338  ;;  %7281 = vpow2.f32 %v3550_v42  ;;  %v11811_v42 = vld [vmem:[#allocation41_spill] sm:$0xff] }
 0x456   :  { %1773 = vadd.xlane.f32.xlu0 %v1772_v49  ;;  %7283 = vrcp.f32 %v1708_v17  ;;  %v3463_v56 = vsub.f32 %v11811_v42, %v3327_v14  ;;  %v11813_v17 = vld [vmem:[#allocation42_spill] sm:$0xff]  ;;  %v11814_v42 = vld [vmem:[#allocation52_spill] sm:$0xff] }
 0x457   :  { %v7274_v18 = vpop.eup %7273  ;;  %v1723_v40 = vpop.xlane.xlu0 %1722 }
 0x458   :  { %1800 = vadd.xlane.f32.xlu1 %v1799_v57  ;;  %v9754_v47 = vmul.f32 %v7274_v18, %v6616_v43  ;;  %7285 = vrcp.f32 %v1723_v40  ;;  %v9767_v43 = vpop.f32.mrf.mxu1  ;;  %v3554_v40 = vmul.f32 1.442695, %v3463_v56  ;;  %v11817_v56 = vld [vmem:[#allocation43_spill] sm:$0xff] }
 0x459   :  { %v1735_v24 = vpop.xlane.xlu1 %1734  ;;  %v9756_v0 = vpop.eup %7275 }
 0x45a   :  { %11810 = vst [vmem:[#allocation36_spill] sm:$0xff] %v9756_v0  ;;  %v9761_v49 = vpop.eup %7277  ;;  %1818 = vadd.xlane.f32.xlu0 %v1817_v52  ;;  %6868 = vmatprep.mubr.msk.f32.mxu1 %vm1321_vm1, %v9756_v0  ;;  %7287 = vrcp.f32 %v1735_v24  ;;  %v6619_v57 = vpop.f32.mrf.mxu1  ;;  %v1796_v52 = vsel %vm1321_vm1, %v11814_v42, 0.0 }
 0x45b   :  { %11812 = vst [vmem:[#allocation29_spill] sm:$0xff] %v9761_v49  ;;  %6869 = vmatmul.mubr.msk.f32.gmra.mxu1 %vm1321_vm1, %v9761_v49  ;;  %v3324_v18 = vpop.xlane.xlu0 %3323 }
 0x45c   :  { %1884 = vadd.xlane.f32.xlu1 %v1883_v61  ;;  %v3462_v14 = vsub.f32 %v11813_v17, %v3324_v18  ;;  %v3465_v18 = vsub.f32 %v11817_v56, %v9730_v15  ;;  %v9782_v17 = vpop.f32.mrf.mxu1  ;;  %v11821_v56 = vld [vmem:[#allocation46_spill] sm:$0xff] }
 0x45d   :  { %v1732_v33 = vpop.xlane.xlu1 %1731 }
 0x45e   :  { %7289 = vrcp.f32 %v1732_v33  ;;  %v3552_v0 = vmul.f32 1.442695, %v3462_v14  ;;  %1797 = vadd.xlane.f32.xlu0 %v1796_v52  ;;  %v1880_v14 = vsel %vm1321_vm1, %v9500_v3, 0.0  ;;  %v3558_v11 = vmul.f32 1.442695, %v3465_v18 }
 0x45f   :  { %7291 = vrcp.f32 %v1714_v60  ;;  %v1720_v21 = vpop.xlane.xlu0 %1719 }
 0x460   :  { %1824 = vadd.xlane.f32.xlu1 %v1823_v46  ;;  %7293 = vpow2.f32 %v3552_v0  ;;  %v1886_v46 = vsel %vm1321_vm1, %v9516_v26, 0.0 }
 0x461   :  { %v9776_v61 = vpop.xlane.xlu1 %3344  ;;  %v9778_v24 = vpop.eup %7279  ;;  %7295 = vpow2.f32 %v3554_v40  ;;  %v11820_v40 = vld [vmem:[#allocation45_spill] sm:$0xff] }
 0x462   :  { %11816 = vst [vmem:[#allocation38_spill] sm:$0xff] %v9778_v24  ;;  %v9786_v33 = vpop.eup %7281  ;;  %1881 = vadd.xlane.f32.xlu0 %v1880_v14  ;;  %6871 = vmatprep.mubr.msk.f32.mxu1 %vm1321_vm1, %v9778_v24  ;;  %v9792_v60 = vpop.f32.mrf.mxu1  ;;  %v3467_v14 = vsub.f32 %v11821_v56, %v9746_v29  ;;  %v11822_v24 = vld [vmem:[#allocation11_spill] sm:$0xff]  ;;  %v1889_v56 = vsel %vm1321_vm1, %v9526_v27, 0.0 }
 0x463   :  { %11818 = vst [vmem:[#allocation28_spill] sm:$0xff] %v9786_v33  ;;  %11819 = vst [vmem:[#allocation39_spill] sm:$0xff] %v9792_v60  ;;  %6872 = vmatmul.mubr.msk.f32.gmra.mxu1 %vm1321_vm1, %v9786_v33  ;;  %v3330_v15 = vpop.xlane.xlu0 %3329  ;;  %v7284_v0 = vpop.eup %7283  ;;  %v1820_v49 = vsel %vm1321_vm1, %v11822_v24, 0.0 }
 0x464   :  { %1887 = vadd.xlane.f32.xlu1 %v1886_v46  ;;  %v3464_v42 = vsub.f32 %v11820_v40, %v3330_v15  ;;  %v1895_v46 = vsel %vm1321_vm1, %v9540_v10, 0.0  ;;  %v9808_v15 = vld [vmem:[%s11549_s2] ss:$0 sm:$0xff]  ;;  %v9810_v18 = vpop.f32.mrf.mxu1  ;;  %v2539_v29 = vmul.f32 %v7284_v0, %v9748_v63  ;;  %v9819_v10 = vld [vmem:[%s11549_s2 + $0x1] ss:$0 sm:$0xff] }
 0x465   :  { %v1738_v3 = vpop.xlane.xlu1 %1737  ;;  %v7286_v52 = vpop.eup %7285  ;;  %11823 = vst [vmem:[#allocation40_spill] sm:$0xff] %v9810_v18  ;;  %v2652_v63 = vmul.f32 %v9808_v15, %v9744_v38  ;;  %v11826_v38 = vld [vmem:[#allocation48_spill] sm:$0xff] }
 0x466   :  { %v9801_v26 = vmul.f32 %v7286_v52, %v6619_v57  ;;  %v3556_v60 = vmul.f32 1.442695, %v3464_v42  ;;  %7297 = vrcp.f32 %v1738_v3  ;;  %1821 = vadd.xlane.f32.xlu0 %v1820_v49  ;;  %v11824_v57 = vld [vmem:[#allocation47_spill] sm:$0xff]  ;;  %v3562_v3 = vmul.f32 1.442695, %v3467_v14 }
 0x467   :  { %v3336_v40 = vpop.xlane.xlu0 %3335  ;;  %v7288_v49 = vpop.eup %7287  ;;  %v2651_v33 = vmul.f32 %v9808_v15, %v2539_v29 }
 0x468   :  { %1896 = vadd.xlane.f32.xlu1 %v1895_v46  ;;  %7299 = vpow2.f32 %v3556_v60  ;;  %v3466_v24 = vsub.f32 %v11824_v57, %v3336_v40  ;;  %v11825_v40 = vld [vmem:[#allocation13_spill] sm:$0xff] }
 0x469   :  { %v9814_v42 = vpop.xlane.xlu1 %3350  ;;  %7301 = vpow2.f32 %v3558_v11  ;;  %v6625_v52 = vpop.f32.mrf.mxu1  ;;  %v1826_v11 = vsel %vm1321_vm1, %v11825_v40, 0.0  ;;  %v11828_v40 = vld [vmem:[#allocation3_spill] sm:$0xff] }
 0x46a   :  { %v3560_v60 = vmul.f32 1.442695, %v3466_v24  ;;  %v2548_v0 = vmul.f32 %v7288_v49, %v6625_v52  ;;  %1890 = vadd.xlane.f32.xlu0 %v1889_v56  ;;  %7303 = vrcp.f32 %v1720_v21  ;;  %v3469_v24 = vsub.f32 %v11826_v38, %v9776_v61  ;;  %v11827_v52 = vld [vmem:[#allocation2_spill] sm:$0xff] }
 0x46b   :  { %v7290_v46 = vpop.eup %7289  ;;  %v1741_v14 = vpop.xlane.xlu0 %1740  ;;  %v1892_v21 = vsel %vm1321_vm1, %v9530_v22, 0.0  ;;  %v1832_v56 = vsel %vm1321_vm1, %v11827_v52, 0.0 }
 0x46c   :  { %v2260_v57 = vpop.f32.mrf.mxu1  ;;  %1827 = vadd.xlane.f32.xlu1 %v1826_v11  ;;  %v7292_v18 = vpop.eup %7291  ;;  %7305 = vpow2.f32 %v3560_v60  ;;  %v2660_v27 = vmul.f32 %v9819_v10, %v2548_v0  ;;  %v2730_v60 = vsel %vm51_vm0, %v2652_v63, 0.0  ;;  %v1835_v63 = vsel %vm1321_vm1, %v11828_v40, 0.0 }
 0x46d   :  { %v2547_v41 = vmul.f32 %v7290_v46, %v2260_v57  ;;  %v1747_v5 = vpop.xlane.xlu1 %1746  ;;  %v9829_v55 = vpop.eup %7293  ;;  %7307 = vpow2.f32 %v3562_v3  ;;  %v2715_v11 = vsel %vm51_vm0, %v2651_v33, 0.0  ;;  %v11829_v57 = vld [vmem:[#allocation49_spill] sm:$0xff]  ;;  %v1838_v33 = vsel %vm1321_vm1, %v9390_v32, 0.0 }
 0x46e   :  { %v9833_v49 = vpop.f32.mrf.mxu1  ;;  %v9839_v29 = vpop.eup %7295  ;;  %v2731_v46 = vsel %vm51_vm0, %v2660_v27, 0.0  ;;  %7309 = vrcp.f32 %v1741_v14  ;;  %1893 = vadd.xlane.f32.xlu0 %v1892_v21  ;;  %6874 = vmatprep.mubr.msk.f32.mxu1 %vm1321_vm1, %v9829_v55  ;;  %v3566_v21 = vmul.f32 1.442695, %v3469_v24  ;;  %v1841_v32 = vsel %vm1321_vm1, %v9394_v4, 0.0 }
 0x46f   :  { %v2659_v3 = vmul.f32 %v9819_v10, %v2547_v41  ;;  %v9846_v61 = vadd.f32 %v2731_v46, %v2730_v60  ;;  %7311 = vrcp.f32 %v1747_v5  ;;  %6875 = vmatmul.mubr.msk.f32.gmra.mxu1 %vm1321_vm1, %v9839_v29  ;;  %v3342_v22 = vpop.xlane.xlu0 %3341  ;;  %v2541_v41 = vmul.f32 %v7292_v18, %v9767_v43  ;;  %v11830_v5 = vld [vmem:[#allocation50_spill] sm:$0xff] }
 0x470   :  { %v2270_v0 = vpop.f32.mrf.mxu1  ;;  %1833 = vadd.xlane.f32.xlu1 %v1832_v56  ;;  %v3468_v27 = vsub.f32 %v11829_v57, %v3342_v22  ;;  %v3471_v52 = vsub.f32 %v11830_v5, %v9814_v42  ;;  %v11831_v22 = vld [vmem:[#allocation51_spill] sm:$0xff]  ;;  %v1844_v4 = vsel %vm1321_vm1, %v9408_v39, 0.0 }
 0x471   :  { %v2716_v14 = vsel %vm51_vm0, %v2659_v3, 0.0  ;;  %v1744_v38 = vpop.xlane.xlu1 %1743  ;;  %v2653_v3 = vmul.f32 %v9808_v15, %v2541_v41 }
 0x472   :  { %v9858_v60 = vadd.f32 %v2716_v14, %v2715_v11  ;;  %7313 = vrcp.f32 %v1744_v38  ;;  %v6631_v56 = vpop.f32.mrf.mxu1  ;;  %v3564_v46 = vmul.f32 1.442695, %v3468_v27  ;;  %1836 = vadd.xlane.f32.xlu0 %v1835_v63  ;;  %v3570_v57 = vmul.f32 1.442695, %v3471_v52  ;;  %v11832_v63 = vld [vmem:[#allocation53_spill] sm:$0xff] }
 0x473   :  { %v7298_v40 = vpop.eup %7297  ;;  %v3348_v43 = vpop.xlane.xlu0 %3347 }
 0x474   :  { %v9862_v18 = vpop.f32.mrf.mxu1  ;;  %1839 = vadd.xlane.f32.xlu1 %v1838_v33  ;;  %7315 = vpow2.f32 %v3564_v46  ;;  %v2549_v24 = vmul.f32 %v7298_v40, %v2270_v0  ;;  %v3470_v42 = vsub.f32 %v11831_v22, %v3348_v43  ;;  %v1847_v0 = vsel %vm1321_vm1, %v9414_v9, 0.0 }
 0x475   :  { %v3357_v11 = vpop.xlane.xlu1 %3356  ;;  %v9866_v14 = vpop.eup %7299  ;;  %7317 = vpow2.f32 %v3566_v21  ;;  %v2745_v40 = vsel %vm51_vm0, %v2653_v3, 0.0  ;;  %v1853_v3 = vsel %vm1321_vm1, %v9432_v19, 0.0 }
 0x476   :  { %v3473_v27 = vsub.f32 %v11832_v63, %v3357_v11  ;;  %v9869_v38 = vpop.f32.mrf.mxu1  ;;  %v9873_v5 = vpop.eup %7301  ;;  %v2661_v41 = vmul.f32 %v9819_v10, %v2549_v24  ;;  %v3568_v46 = vmul.f32 1.442695, %v3470_v42  ;;  %1842 = vadd.xlane.f32.xlu0 %v1841_v32  ;;  %6877 = vmatprep.mubr.msk.f32.mxu1 %vm1321_vm1, %v9866_v14  ;;  %v11835_v24 = vld [vmem:[#allocation54_spill] sm:$0xff] }
 0x477   :  { %11833 = vst [vmem:[#allocation37_spill] sm:$0xff] %v9869_v38  ;;  %6878 = vmatmul.mubr.msk.f32.gmra.mxu1 %vm1321_vm1, %v9873_v5  ;;  %v3354_v21 = vpop.xlane.xlu0 %3353  ;;  %v7304_v33 = vpop.eup %7303  ;;  %v11836_v32 = vld [vmem:[#allocation10_spill] sm:$0xff] }
 0x478   :  { %v9882_v52 = vpop.f32.mrf.mxu1  ;;  %1848 = vadd.xlane.f32.xlu1 %v1847_v0  ;;  %v2746_v43 = vsel %vm51_vm0, %v2661_v41, 0.0  ;;  %7319 = vpow2.f32 %v3568_v46  ;;  %v3472_v22 = vsub.f32 %v11835_v24, %v3354_v21  ;;  %v3574_v63 = vmul.f32 1.442695, %v3473_v27 }
 0x479   :  { %11834 = vst [vmem:[#allocation44_spill] sm:$0xff] %v9882_v52  ;;  %v3363_v42 = vpop.xlane.xlu1 %3362  ;;  %v9889_v9 = vpop.eup %7305  ;;  %7321 = vpow2.f32 %v3570_v57  ;;  %v9891_v11 = vadd.f32 %v2746_v43, %v2745_v40  ;;  %v2654_v57 = vmul.f32 %v9808_v15, %v9754_v47  ;;  %v2543_v27 = vmul.f32 %v7304_v33, %v9782_v17 }
 0x47a   :  { %v3475_v0 = vsub.f32 %v11836_v32, %v3363_v42  ;;  %v9894_v38 = vpop.f32.mrf.mxu1  ;;  %v9896_v39 = vpop.eup %7307  ;;  %v3572_v52 = vmul.f32 1.442695, %v3472_v22  ;;  %1845 = vadd.xlane.f32.xlu0 %v1844_v4  ;;  %6880 = vmatprep.mubr.msk.f32.mxu1 %vm1321_vm1, %v9889_v9  ;;  %v2656_v43 = vmul.f32 %v9808_v15, %v9801_v26  ;;  %v1850_v33 = vsel %vm1321_vm1, %v9426_v53, 0.0 }
 0x47b   :  { %v7310_v41 = vpop.eup %7309  ;;  %6881 = vmatmul.mubr.msk.f32.gmra.mxu1 %vm1321_vm1, %v9896_v39  ;;  %v3360_v21 = vpop.xlane.xlu0 %3359  ;;  %v1859_v42 = vsel %vm1321_vm1, %v9450_v1, 0.0  ;;  %v2760_v1 = vsel %vm51_vm0, %v2654_v57, 0.0 }
 0x47c   :  { %v3578_v46 = vmul.f32 1.442695, %v3475_v0  ;;  %v9907_v40 = vpop.f32.mrf.mxu1  ;;  %1854 = vadd.xlane.f32.xlu1 %v1853_v3  ;;  %v7312_v4 = vpop.eup %7311  ;;  %v2550_v19 = vmul.f32 %v7310_v41, %v9833_v49  ;;  %7323 = vpow2.f32 %v3572_v52  ;;  %v3474_v24 = vsub.f32 %v9326_v23, %v3360_v21 }
 0x47d   :  { %v1759_v47 = vpop.xlane.xlu1 %1758  ;;  %v2552_v22 = vmul.f32 %v7312_v4, %v6631_v56  ;;  %7325 = vpow2.f32 %v3574_v63  ;;  %v1856_v23 = vsel %vm1321_vm1, %v9444_v51, 0.0  ;;  %v2655_v52 = vmul.f32 %v9808_v15, %v2543_v27 }
 0x47e   :  { %v9913_v17 = vpop.f32.mrf.mxu1  ;;  %v2662_v0 = vmul.f32 %v9819_v10, %v2550_v19  ;;  %v3576_v26 = vmul.f32 1.442695, %v3474_v24  ;;  %7327 = vrcp.f32 %v1759_v47  ;;  %1851 = vadd.xlane.f32.xlu0 %v1850_v33  ;;  %v2790_v3 = vsel %vm51_vm0, %v2656_v43, 0.0 }
 0x47f   :  { %v7314_v32 = vpop.eup %7313  ;;  %v2664_v49 = vmul.f32 %v9819_v10, %v2552_v22  ;;  %7329 = vpow2.f32 %v3578_v46  ;;  %v1756_v53 = vpop.xlane.xlu0 %1755  ;;  %v1862_v43 = vsel %vm1321_vm1, %v9464_v8, 0.0  ;;  %v2775_v19 = vsel %vm51_vm0, %v2655_v52, 0.0 }
 0x480   :  { %v2551_v56 = vmul.f32 %v7314_v32, %v9862_v18  ;;  %v9925_v63 = vpop.f32.mrf.mxu1  ;;  %1860 = vadd.xlane.f32.xlu1 %v1859_v42  ;;  %v2761_v41 = vsel %vm51_vm0, %v2662_v0, 0.0  ;;  %7331 = vpow2.f32 %v3576_v26  ;;  %v1865_v0 = vsel %vm1321_vm1, %v9468_v30, 0.0 }
 0x481   :  { %v3369_v21 = vpop.xlane.xlu1 %3368  ;;  %v9930_v51 = vpop.eup %7315  ;;  %v9932_v4 = vadd.f32 %v2761_v41, %v2760_v1  ;;  %v2791_v18 = vsel %vm51_vm0, %v2664_v49, 0.0  ;;  %7333 = vrcp.f32 %v1756_v53 }
 0x482   :  { %v2663_v15 = vmul.f32 %v9819_v10, %v2551_v56  ;;  %v9936_v27 = vpop.f32.mrf.mxu1  ;;  %v9938_v46 = vpop.eup %7317  ;;  %v9940_v57 = vadd.f32 %v2791_v18, %v2790_v3  ;;  %1857 = vadd.xlane.f32.xlu0 %v1856_v23  ;;  %6883 = vmatprep.mubr.msk.f32.mxu1 %vm1321_vm1, %v9930_v51  ;;  %v3477_v10 = vsub.f32 %v9337_v62, %v3369_v21  ;;  %v1871_v62 = vsel %vm1321_vm1, %v9482_v45, 0.0  ;;  %v9987_v18 = vld [vmem:[%s11549_s2 + $0x2] ss:$0 sm:$0xff] }
 0x483   :  { %6884 = vmatmul.mubr.msk.f32.gmra.mxu1 %vm1321_vm1, %v9938_v46  ;;  %v1765_v47 = vpop.xlane.xlu0 %1764  ;;  %v1868_v3 = vsel %vm1321_vm1, %v9480_v35, 0.0  ;;  %v3628_v21 = vsel %vm1321_vm1, %v9585_v2, 0.0 }
 0x484   :  { %v2776_v24 = vsel %vm51_vm0, %v2663_v15, 0.0  ;;  %v9951_v22 = vpop.f32.mrf.mxu1  ;;  %1863 = vadd.xlane.f32.xlu1 %v1862_v43  ;;  %7335 = vrcp.f32 %v1765_v47  ;;  %v3582_v23 = vmul.f32 1.442695, %v3477_v10  ;;  %v11837_v10 = vld [vmem:[#allocation14_spill] sm:$0xff] }
 0x485   :  { %v9953_v33 = vadd.f32 %v2776_v24, %v2775_v19  ;;  %v3375_v42 = vpop.xlane.xlu1 %3374  ;;  %v9955_v32 = vpop.eup %7319 }
 0x486   :  { %v9957_v8 = vpop.f32.mrf.mxu1  ;;  %v9961_v26 = vpop.eup %7321  ;;  %1866 = vadd.xlane.f32.xlu0 %v1865_v0  ;;  %6886 = vmatprep.mubr.msk.f32.mxu1 %vm1321_vm1, %v9955_v32  ;;  %v3479_v47 = vsub.f32 %v11837_v10, %v3375_v42  ;;  %v3634_v10 = vsel %vm1321_vm1, %v9604_v48, 0.0  ;;  %v11839_v48 = vld [vmem:[#allocation5_spill] sm:$0xff] }
 0x487   :  { %6887 = vmatmul.mubr.msk.f32.gmra.mxu1 %vm1321_vm1, %v9961_v26  ;;  %v3366_v49 = vpop.xlane.xlu0 %3365 }
 0x488   :  { %v9969_v56 = vpop.f32.mrf.mxu1  ;;  %1872 = vadd.xlane.f32.xlu1 %v1871_v62  ;;  %v3476_v52 = vsub.f32 %v9353_v31, %v3366_v49  ;;  %v3631_v62 = vsel %vm1321_vm1, %v9588_v36, 0.0 }
 0x489   :  { %v1771_v30 = vpop.xlane.xlu1 %1770  ;;  %v9972_v53 = vpop.eup %7323 }
 0x48a   :  { %v9974_v1 = vpop.f32.mrf.mxu1  ;;  %v9978_v41 = vpop.eup %7325  ;;  %v3580_v45 = vmul.f32 1.442695, %v3476_v52  ;;  %7337 = vrcp.f32 %v1771_v30  ;;  %1869 = vadd.xlane.f32.xlu0 %v1868_v3  ;;  %6889 = vmatprep.mubr.msk.f32.mxu1 %vm1321_vm1, %v9972_v53  ;;  %v11838_v3 = vld [vmem:[#allocation4_spill] sm:$0xff] }
 0x48b   :  { %v7328_v31 = vpop.eup %7327  ;;  %7339 = vpow2.f32 %v3582_v23  ;;  %6890 = vmatmul.mubr.msk.f32.gmra.mxu1 %vm1321_vm1, %v9978_v41  ;;  %v1762_v35 = vpop.xlane.xlu0 %1761 }
 0x48c   :  { %v9991_v15 = vpop.f32.mrf.mxu1  ;;  %3629 = vadd.xlane.f32.xlu1 %v3628_v21  ;;  %v9993_v43 = vpop.eup %7329  ;;  %v2556_v19 = vmul.f32 %v7328_v31, %v9894_v38  ;;  %7341 = vpow2.f32 %v3580_v45  ;;  %v3637_v38 = vsel %vm1321_vm1, %v9611_v54, 0.0 }
 0x48d   :  { %v3381_v2 = vpop.xlane.xlu1 %3380  ;;  %v9996_v24 = vpop.eup %7331  ;;  %7343 = vrcp.f32 %v1762_v35 }
 0x48e   :  { %v9999_v0 = vpop.f32.mrf.mxu1  ;;  %v7334_v23 = vpop.eup %7333  ;;  %v2668_v49 = vmul.f32 %v9987_v18, %v2556_v19  ;;  %3632 = vadd.xlane.f32.xlu0 %v3631_v62  ;;  %6892 = vmatprep.mubr.msk.f32.mxu1 %vm1321_vm1, %v9996_v24 }
 0x48f   :  { %v2555_v52 = vmul.f32 %v7334_v23, %v9907_v40  ;;  %6893 = vmatmul.mubr.msk.f32.gmra.mxu1 %vm1321_vm1, %v9993_v43  ;;  %v3372_v42 = vpop.xlane.xlu0 %3371  ;;  %v3586_v40 = vmul.f32 1.442695, %v3479_v47 }
 0x490   :  { %v10011_v30 = vpop.f32.mrf.mxu1  ;;  %3638 = vadd.xlane.f32.xlu1 %v3637_v38  ;;  %v2733_v36 = vsel %vm51_vm0, %v2668_v49, 0.0  ;;  %v3478_v45 = vsub.f32 %v11838_v3, %v3372_v42  ;;  %v3640_v49 = vsel %vm1321_vm1, %v9620_v34, 0.0  ;;  %v3643_v34 = vsel %vm1321_vm1, %v9627_v58, 0.0 }
 0x491   :  { %v10015_v21 = vpop.xlane.xlu1 %3386  ;;  %v7336_v31 = vpop.eup %7335  ;;  %v10018_v35 = vadd.f32 %v2733_v36, %v9846_v61  ;;  %v2667_v54 = vmul.f32 %v9987_v18, %v2555_v52 }
 0x492   :  { %v10021_v19 = vpop.f32.mrf.mxu1  ;;  %v2558_v62 = vmul.f32 %v7336_v31, %v9913_v17  ;;  %v3584_v23 = vmul.f32 1.442695, %v3478_v45  ;;  %3635 = vadd.xlane.f32.xlu0 %v3634_v10  ;;  %v3481_v17 = vsub.f32 %v11839_v48, %v3381_v2  ;;  %v3649_v31 = vsel %vm1321_vm1, %v9641_v12, 0.0  ;;  %v5981_v48 = vld [vmem:[%s11546_s3 + $0x58] sm:$0xff] }
 0x493   :  { %v1768_v38 = vpop.xlane.xlu0 %1767  ;;  %v2718_v61 = vsel %vm51_vm0, %v2667_v54, 0.0  ;;  %6931 = vmatprep.subr.mxu0 %v5981_v48 }
 0x494   :  { %v10028_v42 = vpop.f32.mrf.mxu1  ;;  %3641 = vadd.xlane.f32.xlu1 %v3640_v49  ;;  %v2670_v47 = vmul.f32 %v9987_v18, %v2558_v62  ;;  %7345 = vpow2.f32 %v3584_v23  ;;  %v10033_v36 = vadd.f32 %v2718_v61, %v9858_v60  ;;  %v11840_v62 = vld [vmem:[#allocation6_spill] sm:$0xff]  ;;  %v3590_v12 = vmul.f32 1.442695, %v3481_v17  ;;  %v11841_v61 = vld [vmem:[#allocation7_spill] sm:$0xff]  ;;  %6932 = vmatpush3.msra.mxu0 %v5981_v48 }
 0x495   :  { %v1783_v52 = vpop.xlane.xlu1 %1782  ;;  %7347 = vpow2.f32 %v3586_v40 }
 0x496   :  { %v10036_v3 = vpop.f32.mrf.mxu1  ;;  %v2763_v45 = vsel %vm51_vm0, %v2670_v47, 0.0  ;;  %7349 = vrcp.f32 %v1768_v38  ;;  %3644 = vadd.xlane.f32.xlu0 %v3643_v34 }
 0x497   :  { %v7338_v54 = vpop.eup %7337  ;;  %v10044_v10 = vadd.f32 %v2763_v45, %v9932_v4  ;;  %7351 = vrcp.f32 %v1783_v52  ;;  %v3378_v60 = vpop.xlane.xlu0 %3377  ;;  %v3483_v4 = vsub.f32 %v11841_v61, %v10015_v21  ;;  %v3646_v52 = vsel %vm1321_vm1, %v9636_v13, 0.0 }
 0x498   :  { %v10046_v40 = vpop.f32.mrf.mxu1  ;;  %3650 = vadd.xlane.f32.xlu1 %v3649_v31  ;;  %v10048_v2 = vpop.eup %7339  ;;  %v2560_v58 = vmul.f32 %v7338_v54, %v9936_v27  ;;  %v3480_v23 = vsub.f32 %v11840_v62, %v3378_v60  ;;  %v3655_v21 = vsel %vm1321_vm1, %v9653_v25, 0.0  ;;  %v5980_v54 = vld [vmem:[%s11546_s3 + $0x50] sm:$0xff]  ;;  %v3652_v25 = vsel %vm1321_vm1, %v9648_v44, 0.0 }
 0x499   :  { %v10052_v49 = vpop.xlane.xlu1 %3392  ;;  %v10054_v38 = vpop.eup %7341  ;;  %v3658_v44 = vsel %vm1321_vm1, %v9662_v6, 0.0  ;;  %6933 = vmatprep.subr.mxu0 %v5980_v54  ;;  %v3661_v6 = vsel %vm1321_vm1, %v9667_v16, 0.0 }
 0x49a   :  { %v10058_v47 = vpop.f32.mrf.mxu1  ;;  %v7344_v27 = vpop.eup %7343  ;;  %v2672_v34 = vmul.f32 %v9987_v18, %v2560_v58  ;;  %v3588_v45 = vmul.f32 1.442695, %v3480_v23  ;;  %3647 = vadd.xlane.f32.xlu0 %v3646_v52  ;;  %6895 = vmatprep.mubr.msk.f32.mxu1 %vm1321_vm1, %v10054_v38  ;;  %v11842_v58 = vld [vmem:[#allocation17_spill] sm:$0xff]  ;;  %v3594_v52 = vmul.f32 1.442695, %v3483_v4 }
 0x49b   :  { %v2557_v17 = vmul.f32 %v7344_v27, %v9925_v63  ;;  %6896 = vmatmul.mubr.msk.f32.gmra.mxu1 %vm1321_vm1, %v10048_v2  ;;  %v3384_v13 = vpop.xlane.xlu0 %3383  ;;  %6934 = vmatpush3.msra.mxu0 %v5980_v54  ;;  %v5978_v54 = vld [vmem:[%s11546_s3 + $0x40] sm:$0xff] }
 0x49c   :  { %v10073_v31 = vpop.f32.mrf.mxu1  ;;  %3656 = vadd.xlane.f32.xlu1 %v3655_v21  ;;  %v2793_v60 = vsel %vm51_vm0, %v2672_v34, 0.0  ;;  %7353 = vpow2.f32 %v3588_v45  ;;  %v3482_v62 = vsub.f32 %v11842_v58, %v3384_v13  ;;  %v5979_v34 = vld [vmem:[%s11546_s3 + $0x48] sm:$0xff] }
 0x49d   :  { %v10080_v23 = vpop.xlane.xlu1 %3398  ;;  %v10085_v63 = vadd.f32 %v2793_v60, %v9940_v57  ;;  %v2669_v61 = vmul.f32 %v9987_v18, %v2557_v17  ;;  %7355 = vpow2.f32 %v3590_v12  ;;  %6935 = vmatprep.subr.mxu0 %v5979_v34 }
 0x49e   :  { %v10088_v27 = vpop.f32.mrf.mxu1  ;;  %v3592_v45 = vmul.f32 1.442695, %v3482_v62  ;;  %3653 = vadd.xlane.f32.xlu0 %v3652_v25  ;;  %6936 = vmatpush3.msra.mxu0 %v5979_v34  ;;  %v11843_v62 = vld [vmem:[#allocation8_spill] sm:$0xff] }
 0x49f   :  { %v1780_v21 = vpop.xlane.xlu0 %1779  ;;  %v2748_v12 = vsel %vm51_vm0, %v2669_v61, 0.0  ;;  %v3485_v25 = vsub.f32 %v11843_v62, %v10052_v49  ;;  %6937 = vmatprep.subr.mxu0 %v5978_v54 }
 0x4a0   :  { %v10095_v57 = vpop.f32.mrf.mxu1  ;;  %3659 = vadd.xlane.f32.xlu1 %v3658_v44  ;;  %7357 = vpow2.f32 %v3592_v45  ;;  %v10101_v48 = vadd.f32 %v2748_v12, %v9891_v11  ;;  %v3667_v11 = vsel %vm1321_vm1, %v9682_v50, 0.0  ;;  %v10128_v45 = vld [vmem:[%s11549_s2 + $0x3] ss:$0 sm:$0xff]  ;;  %6938 = vmatpush3.msra.mxu0 %v5978_v54 }
 0x4a1   :  { %v10098_v4 = vpop.xlane.xlu1 %3404  ;;  %v10103_v17 = vpop.eup %7345  ;;  %7359 = vpow2.f32 %v3594_v52 }
 0x4a2   :  { %v10105_v13 = vpop.f32.mrf.mxu1  ;;  %v10112_v60 = vpop.eup %7347  ;;  %7361 = vrcp.f32 %v1780_v21  ;;  %3662 = vadd.xlane.f32.xlu0 %v3661_v6  ;;  %6898 = vmatprep.mubr.msk.f32.mxu1 %vm1321_vm1, %v10103_v17  ;;  %v3664_v21 = vsel %vm1321_vm1, %v9678_v59, 0.0 }
 0x4a3   :  { %v7350_v58 = vpop.eup %7349  ;;  %6899 = vmatmul.mubr.msk.f32.gmra.mxu1 %vm1321_vm1, %v10112_v60  ;;  %v1789_v16 = vpop.xlane.xlu0 %1788 }
 0x4a4   :  { %v10122_v61 = vpop.f32.mrf.mxu1  ;;  %3668 = vadd.xlane.f32.xlu1 %v3667_v11  ;;  %v7352_v52 = vpop.eup %7351  ;;  %v2559_v34 = vmul.f32 %v7350_v58, %v9951_v22  ;;  %7363 = vrcp.f32 %v1789_v16  ;;  %v3670_v22 = vsel %vm1321_vm1, %v9690_v28, 0.0  ;;  %v3598_v11 = vmul.f32 1.442695, %v3485_v25 }
 0x4a5   :  { %v10130_v50 = vpop.xlane.xlu1 %3410  ;;  %v2564_v49 = vmul.f32 %v7352_v52, %v9974_v1  ;;  %v3673_v28 = vsel %vm1321_vm1, %v9695_v7, 0.0 }
 0x4a6   :  { %v10133_v44 = vpop.f32.mrf.mxu1  ;;  %v2671_v12 = vmul.f32 %v9987_v18, %v2559_v34  ;;  %3665 = vadd.xlane.f32.xlu0 %v3664_v21  ;;  %v3679_v21 = vsel %vm1321_vm1, %v9708_v37, 0.0 }
 0x4a7   :  { %v2676_v6 = vmul.f32 %v10128_v45, %v2564_v49  ;;  %v3390_v58 = vpop.xlane.xlu0 %3389 }
 0x4a8   :  { %v10141_v62 = vpop.f32.mrf.mxu1  ;;  %3671 = vadd.xlane.f32.xlu1 %v3670_v22  ;;  %v3484_v1 = vsub.f32 %v9478_v20, %v3390_v58  ;;  %v2778_v52 = vsel %vm51_vm0, %v2671_v12, 0.0  ;;  %v11847_v22 = vld [vmem:[#allocation9_spill] sm:$0xff] }
 0x4a9   :  { %11844 = vst [vmem:[#allocation41_spill] sm:$0xff] %v10141_v62  ;;  %v1807_v16 = vpop.xlane.xlu1 %1806  ;;  %v10145_v59 = vpop.eup %7353  ;;  %v2735_v18 = vsel %vm51_vm0, %v2676_v6, 0.0  ;;  %v10153_v25 = vadd.f32 %v2778_v52, %v9953_v33  ;;  %v3487_v6 = vsub.f32 %v11847_v22, %v10080_v23 }
 0x4aa   :  { %v10148_v54 = vpop.f32.mrf.mxu1  ;;  %v10155_v34 = vpop.eup %7355  ;;  %v10158_v49 = vadd.f32 %v2735_v18, %v10018_v35  ;;  %v3596_v20 = vmul.f32 1.442695, %v3484_v1  ;;  %7365 = vrcp.f32 %v1807_v16  ;;  %3674 = vadd.xlane.f32.xlu0 %v3673_v28  ;;  %6901 = vmatprep.mubr.msk.f32.mxu1 %vm1321_vm1, %v10145_v59  ;;  %v11849_v1 = vld [vmem:[#allocation31_spill] sm:$0xff]  ;;  %v11850_v16 = vld [vmem:[#allocation32_spill] sm:$0xff] }
 0x4ab   :  { %11845 = vst [vmem:[#allocation42_spill] sm:$0xff] %v10153_v25  ;;  %7367 = vpow2.f32 %v3598_v11  ;;  %6902 = vmatmul.mubr.msk.f32.gmra.mxu1 %vm1321_vm1, %v10155_v34  ;;  %v1786_v7 = vpop.xlane.xlu0 %1785  ;;  %v3676_v37 = vsel %vm1321_vm1, %v11849_v1, 0.0  ;;  %v3682_v52 = vsel %vm1321_vm1, %v11850_v16, 0.0  ;;  %v3602_v1 = vmul.f32 1.442695, %v3487_v6  ;;  %v11858_v6 = vld [vmem:[#allocation34_spill] sm:$0xff] }
 0x4ac   :  { %v10166_v33 = vpop.f32.mrf.mxu1  ;;  %3680 = vadd.xlane.f32.xlu1 %v3679_v21  ;;  %7369 = vpow2.f32 %v3596_v20  ;;  %v11852_v21 = vld [vmem:[#allocation16_spill] sm:$0xff] }
 0x4ad   :  { %11846 = vst [vmem:[#allocation52_spill] sm:$0xff] %v10166_v33  ;;  %v1804_v35 = vpop.xlane.xlu1 %1803  ;;  %v10168_v12 = vpop.eup %7357  ;;  %7371 = vrcp.f32 %v1786_v7  ;;  %v11855_v33 = vld [vmem:[#allocation33_spill] sm:$0xff] }
 0x4ae   :  { %v10172_v58 = vpop.f32.mrf.mxu1  ;;  %v10176_v11 = vpop.eup %7359  ;;  %7373 = vrcp.f32 %v1804_v35  ;;  %3677 = vadd.xlane.f32.xlu0 %v3676_v37  ;;  %6904 = vmatprep.mubr.msk.f32.mxu1 %vm1321_vm1, %v10168_v12  ;;  %v11853_v37 = vld [vmem:[#allocation19_spill] sm:$0xff]  ;;  %v3685_v62 = vsel %vm1321_vm1, %v11855_v33, 0.0  ;;  %v11859_v33 = vld [vmem:[#allocation18_spill] sm:$0xff] }
 0x4af   :  { %11848 = vst [vmem:[#allocation12_spill] sm:$0xff] %v10172_v58  ;;  %v7362_v18 = vpop.eup %7361  ;;  %6905 = vmatmul.mubr.msk.f32.gmra.mxu1 %vm1321_vm1, %v10176_v11  ;;  %v3396_v23 = vpop.xlane.xlu0 %3395  ;;  %v3489_v58 = vsub.f32 %v11853_v37, %v10098_v4  ;;  %v3688_v4 = vsel %vm1321_vm1, %v11858_v6, 0.0 }
 0x4b0   :  { %v10184_v28 = vpop.f32.mrf.mxu1  ;;  %3683 = vadd.xlane.f32.xlu1 %v3682_v52  ;;  %v2563_v20 = vmul.f32 %v7362_v18, %v9991_v15  ;;  %v3486_v7 = vsub.f32 %v11852_v21, %v3396_v23  ;;  %v11856_v15 = vld [vmem:[#allocation35_spill] sm:$0xff] }
 0x4b1   :  { %11851 = vst [vmem:[#allocation43_spill] sm:$0xff] %v10184_v28  ;;  %v10188_v35 = vpop.xlane.xlu1 %3416  ;;  %v7364_v22 = vpop.eup %7363  ;;  %v3691_v18 = vsel %vm1321_vm1, %v11856_v15, 0.0 }
 0x4b2   :  { %v10192_v16 = vpop.f32.mrf.mxu1  ;;  %v2675_v25 = vmul.f32 %v10128_v45, %v2563_v20  ;;  %v2566_v52 = vmul.f32 %v7364_v22, %v9999_v0  ;;  %v3600_v28 = vmul.f32 1.442695, %v3486_v7  ;;  %3686 = vadd.xlane.f32.xlu0 %v3685_v62  ;;  %v3606_v62 = vmul.f32 1.442695, %v3489_v58  ;;  %v11860_v7 = vld [vmem:[#allocation21_spill] sm:$0xff] }
 0x4b3   :  { %11854 = vst [vmem:[#allocation45_spill] sm:$0xff] %v10192_v16  ;;  %v3402_v23 = vpop.xlane.xlu0 %3401  ;;  %v3491_v22 = vsub.f32 %v11860_v7, %v10130_v50 }
 0x4b4   :  { %v10200_v21 = vpop.f32.mrf.mxu1  ;;  %3692 = vadd.xlane.f32.xlu1 %v3691_v18  ;;  %v2678_v37 = vmul.f32 %v10128_v45, %v2566_v52  ;;  %7375 = vpow2.f32 %v3600_v28  ;;  %v3488_v16 = vsub.f32 %v11859_v33, %v3402_v23  ;;  %v2720_v0 = vsel %vm51_vm0, %v2675_v25, 0.0  ;;  %v11862_v28 = vld [vmem:[#allocation29_spill] sm:$0xff]  ;;  %v10218_v25 = vld [vmem:[%s11549_s2 + $0x4] ss:$0 sm:$0xff] }
 0x4b5   :  { %11857 = vst [vmem:[#allocation46_spill] sm:$0xff] %v10200_v21  ;;  %v1810_v20 = vpop.xlane.xlu1 %1809  ;;  %7377 = vpow2.f32 %v3602_v1  ;;  %v2721_v18 = vadd.f32 %v2720_v0, %v10033_v36  ;;  %v3697_v52 = vsel %vm1321_vm1, %v11862_v28, 0.0  ;;  %v3610_v0 = vmul.f32 1.442695, %v3491_v22  ;;  %v11865_v28 = vld [vmem:[#allocation36_spill] sm:$0xff] }
 0x4b6   :  { %v10209_v15 = vpop.f32.mrf.mxu1  ;;  %v2765_v21 = vsel %vm51_vm0, %v2678_v37, 0.0  ;;  %v3604_v6 = vmul.f32 1.442695, %v3488_v16  ;;  %7379 = vrcp.f32 %v1810_v20  ;;  %3689 = vadd.xlane.f32.xlu0 %v3688_v4  ;;  %v11864_v4 = vld [vmem:[#allocation20_spill] sm:$0xff] }
 0x4b7   :  { %11861 = vst [vmem:[#allocation11_spill] sm:$0xff] %v10209_v15  ;;  %v7366_v23 = vpop.eup %7365  ;;  %v3408_v58 = vpop.xlane.xlu0 %3407  ;;  %v10223_v36 = vadd.f32 %v2765_v21, %v10044_v10 }
 0x4b8   :  { %v10220_v50 = vpop.f32.mrf.mxu1  ;;  %3698 = vadd.xlane.f32.xlu1 %v3697_v52  ;;  %v10225_v1 = vpop.eup %7367  ;;  %v2572_v16 = vmul.f32 %v7366_v23, %v10058_v47  ;;  %7381 = vpow2.f32 %v3604_v6  ;;  %v3490_v37 = vsub.f32 %v11864_v4, %v3408_v58  ;;  %v3694_v52 = vsel %vm1321_vm1, %v11865_v28, 0.0  ;;  %v11866_v47 = vld [vmem:[#allocation28_spill] sm:$0xff]  ;;  %v11867_v28 = vld [vmem:[#allocation38_spill] sm:$0xff] }
 0x4b9   :  { %11863 = vst [vmem:[#allocation47_spill] sm:$0xff] %v10220_v50  ;;  %v3423_v33 = vpop.xlane.xlu1 %3422  ;;  %v10229_v20 = vpop.eup %7369  ;;  %7383 = vpow2.f32 %v3606_v62  ;;  %v3703_v6 = vsel %vm1321_vm1, %v11866_v47, 0.0  ;;  %v11868_v47 = vld [vmem:[#allocation23_spill] sm:$0xff] }
 0x4ba   :  { %v10231_v7 = vpop.f32.mrf.mxu1  ;;  %v7372_v50 = vpop.eup %7371  ;;  %v2684_v10 = vmul.f32 %v10218_v25, %v2572_v16  ;;  %v3608_v21 = vmul.f32 1.442695, %v3490_v37  ;;  %3695 = vadd.xlane.f32.xlu0 %v3694_v52  ;;  %6907 = vmatprep.mubr.msk.f32.mxu1 %vm1321_vm1, %v10229_v20  ;;  %v3700_v52 = vsel %vm1321_vm1, %v11867_v28, 0.0  ;;  %v3493_v15 = vsub.f32 %v11868_v47, %v10188_v35 }
 0x4bb   :  { %v7374_v23 = vpop.eup %7373  ;;  %v2565_v62 = vmul.f32 %v7372_v50, %v10011_v30  ;;  %6908 = vmatmul.mubr.msk.f32.gmra.mxu1 %vm1321_vm1, %v10225_v1  ;;  %v1813_v22 = vpop.xlane.xlu0 %1812 }
 0x4bc   :  { %v10243_v58 = vpop.f32.mrf.mxu1  ;;  %3704 = vadd.xlane.f32.xlu1 %v3703_v6  ;;  %v2737_v16 = vsel %vm51_vm0, %v2684_v10, 0.0  ;;  %v2571_v4 = vmul.f32 %v7374_v23, %v10073_v31  ;;  %7385 = vpow2.f32 %v3608_v21  ;;  %v3706_v31 = vsel %vm1321_vm1, %v9829_v55, 0.0  ;;  %v11871_v55 = vld [vmem:[#allocation24_spill] sm:$0xff] }
 0x4bd   :  { %v10247_v37 = vpop.xlane.xlu1 %3428  ;;  %7387 = vpow2.f32 %v3610_v0  ;;  %v10252_v30 = vadd.f32 %v2737_v16, %v10158_v49  ;;  %v2677_v50 = vmul.f32 %v10128_v45, %v2565_v62  ;;  %v11870_v0 = vld [vmem:[#allocation22_spill] sm:$0xff]  ;;  %v3495_v47 = vsub.f32 %v11871_v55, %v3423_v33 }
 0x4be   :  { %v10257_v6 = vpop.f32.mrf.mxu1  ;;  %7389 = vrcp.f32 %v1813_v22  ;;  %3701 = vadd.xlane.f32.xlu0 %v3700_v52  ;;  %v2683_v10 = vmul.f32 %v10218_v25, %v2571_v4  ;;  %v3614_v52 = vmul.f32 1.442695, %v3493_v15 }
 0x4bf   :  { %v3414_v21 = vpop.xlane.xlu0 %3413  ;;  %v2750_v49 = vsel %vm51_vm0, %v2677_v50, 0.0 }
 0x4c0   :  { %v10262_v23 = vpop.f32.mrf.mxu1  ;;  %3707 = vadd.xlane.f32.xlu1 %v3706_v31  ;;  %v3492_v62 = vsub.f32 %v11870_v0, %v3414_v21  ;;  %v2722_v35 = vsel %vm51_vm0, %v2683_v10, 0.0  ;;  %v2751_v22 = vadd.f32 %v2750_v49, %v10101_v48  ;;  %v3709_v31 = vsel %vm1321_vm1, %v9839_v29, 0.0 }
 0x4c1   :  { %11869 = vst [vmem:[#allocation13_spill] sm:$0xff] %v10262_v23  ;;  %v10266_v16 = vpop.xlane.xlu1 %3434  ;;  %v10270_v28 = vpop.eup %7375  ;;  %v10277_v23 = vadd.f32 %v2722_v35, %v2721_v18  ;;  %v3715_v48 = vsel %vm1321_vm1, %v9873_v5, 0.0  ;;  %v11874_v18 = vld [vmem:[#allocation25_spill] sm:$0xff]  ;;  %v3618_v35 = vmul.f32 1.442695, %v3495_v47  ;;  %v11875_v5 = vld [vmem:[#allocation26_spill] sm:$0xff] }
 0x4c2   :  { %v10273_v4 = vpop.f32.mrf.mxu1  ;;  %v10279_v50 = vpop.eup %7377  ;;  %v3612_v21 = vmul.f32 1.442695, %v3492_v62  ;;  %3710 = vadd.xlane.f32.xlu0 %v3709_v31  ;;  %6910 = vmatprep.mubr.msk.f32.mxu1 %vm1321_vm1, %v10270_v28  ;;  %v3497_v55 = vsub.f32 %v11875_v5, %v10247_v37 }
 0x4c3   :  { %11872 = vst [vmem:[#allocation48_spill] sm:$0xff] %v10273_v4  ;;  %v7380_v15 = vpop.eup %7379  ;;  %6911 = vmatmul.mubr.msk.f32.gmra.mxu1 %vm1321_vm1, %v10279_v50  ;;  %v3420_v33 = vpop.xlane.xlu0 %3419  ;;  %v3712_v4 = vsel %vm1321_vm1, %v9866_v14, 0.0  ;;  %v11877_v14 = vld [vmem:[#allocation27_spill] sm:$0xff] }
 0x4c4   :  { %v10287_v10 = vpop.f32.mrf.mxu1  ;;  %3716 = vadd.xlane.f32.xlu1 %v3715_v48  ;;  %v2573_v29 = vmul.f32 %v7380_v15, %v10095_v57  ;;  %7391 = vpow2.f32 %v3612_v21  ;;  %v3494_v49 = vsub.f32 %v11874_v18, %v3420_v33  ;;  %v3721_v57 = vsel %vm1321_vm1, %v9896_v39, 0.0  ;;  %v11879_v18 = vld [vmem:[#allocation15_spill] sm:$0xff] }
 0x4c5   :  { %11873 = vst [vmem:[#allocation2_spill] sm:$0xff] %v10287_v10  ;;  %v1831_v0 = vpop.xlane.xlu1 %1830  ;;  %v10291_v62 = vpop.eup %7381  ;;  %7393 = vpow2.f32 %v3614_v52 }
 0x4c6   :  { %v10295_v31 = vpop.f32.mrf.mxu1  ;;  %v10299_v10 = vpop.eup %7383  ;;  %v3616_v48 = vmul.f32 1.442695, %v3494_v49  ;;  %7395 = vrcp.f32 %v1831_v0  ;;  %3713 = vadd.xlane.f32.xlu0 %v3712_v4  ;;  %6913 = vmatprep.mubr.msk.f32.mxu1 %vm1321_vm1, %v10291_v62  ;;  %v2685_v52 = vmul.f32 %v10218_v25, %v2573_v29  ;;  %v3718_v4 = vsel %vm1321_vm1, %v9889_v9, 0.0 }
 0x4c7   :  { %11876 = vst [vmem:[#allocation3_spill] sm:$0xff] %v10295_v31  ;;  %6914 = vmatmul.mubr.msk.f32.gmra.mxu1 %vm1321_vm1, %v10299_v10  ;;  %v3426_v37 = vpop.xlane.xlu0 %3425  ;;  %v3622_v29 = vmul.f32 1.442695, %v3497_v55  ;;  %v3499_v49 = vsub.f32 %v11879_v18, %v10266_v16  ;;  %v3727_v9 = vsel %vm1321_vm1, %v9938_v46, 0.0  ;;  %v11880_v55 = vld [vmem:[#allocation30_spill] sm:$0xff]  ;;  %v3724_v46 = vsel %vm1321_vm1, %v9930_v51, 0.0 }
 0x4c8   :  { %3722 = vadd.xlane.f32.xlu1 %v3721_v57  ;;  %7397 = vpow2.f32 %v3616_v48  ;;  %v3496_v47 = vsub.f32 %v11877_v14, %v3426_v37  ;;  %v10309_v21 = vpop.f32.mrf.mxu1  ;;  %v2752_v33 = vsel %vm51_vm0, %v2685_v52, 0.0  ;;  %v3733_v51 = vsel %vm1321_vm1, %v9961_v26, 0.0 }
 0x4c9   :  { %11878 = vst [vmem:[#allocation49_spill] sm:$0xff] %v10309_v21  ;;  %v10311_v15 = vpop.xlane.xlu1 %1749  ;;  %v10316_v39 = vpop.eup %7385  ;;  %7399 = vpow2.f32 %v3618_v35  ;;  %v10320_v0 = vadd.f32 %v2752_v33, %v2751_v22  ;;  %v3626_v14 = vmul.f32 1.442695, %v3499_v49  ;;  %v3730_v33 = vsel %vm1321_vm1, %v9955_v32, 0.0 }
 0x4ca   :  { %v10322_v5 = vpop.eup %7387  ;;  %v3620_v48 = vmul.f32 1.442695, %v3496_v47  ;;  %3719 = vadd.xlane.f32.xlu0 %v3718_v4  ;;  %6916 = vmatprep.mubr.msk.f32.mxu1 %vm1321_vm1, %v10316_v39  ;;  %v10331_v22 = vpop.f32.mrf.mxu1 }
 0x4cb   :  { %v7390_v57 = vpop.eup %7389  ;;  %6917 = vmatmul.mubr.msk.f32.gmra.mxu1 %vm1321_vm1, %v10322_v5  ;;  %v3432_v35 = vpop.xlane.xlu0 %3431 }
 0x4cc   :  { %3728 = vadd.xlane.f32.xlu1 %v3727_v9  ;;  %v2574_v16 = vmul.f32 %v7390_v57, %v10088_v27  ;;  %7401 = vpow2.f32 %v3620_v48  ;;  %v3498_v52 = vsub.f32 %v11880_v55, %v3432_v35  ;;  %v10343_v18 = vpop.f32.mrf.mxu1  ;;  %v3736_v57 = vsel %vm1321_vm1, %v9972_v53, 0.0 }
 0x4cd   :  { %v10334_v37 = vpop.xlane.xlu1 %1728  ;;  %7403 = vpow2.f32 %v3622_v29  ;;  %v3739_v53 = vsel %vm1321_vm1, %v9978_v41, 0.0 }
 0x4ce   :  { %v2686_v47 = vmul.f32 %v10218_v25, %v2574_v16  ;;  %v3624_v4 = vmul.f32 1.442695, %v3498_v52  ;;  %3725 = vadd.xlane.f32.xlu0 %v3724_v46  ;;  %v10364_v16 = vld [vmem:[%s11549_s2 + $0x5] ss:$0 sm:$0xff]  ;;  %v10371_v55 = vpop.f32.mrf.mxu1 }
 0x4cf   :  { %v10341_v27 = vpop.xlane.xlu0 %1725 }
 0x4d0   :  { %3731 = vadd.xlane.f32.xlu1 %v3730_v33  ;;  %7405 = vpow2.f32 %v3624_v4  ;;  %v2767_v29 = vsel %vm51_vm0, %v2686_v47, 0.0  ;;  %v10391_v41 = vpop.f32.mrf.mxu1 }
 0x4d1   :  { %v10345_v48 = vpop.xlane.xlu1 %1794  ;;  %v10348_v49 = vpop.eup %7391  ;;  %7407 = vpow2.f32 %v3626_v14  ;;  %v10353_v9 = vadd.f32 %v2767_v29, %v10223_v36 }
 0x4d2   :  { %v10355_v32 = vpop.eup %7393  ;;  %3734 = vadd.xlane.f32.xlu0 %v3733_v51  ;;  %6919 = vmatprep.mubr.msk.f32.mxu1 %vm1321_vm1, %v10348_v49  ;;  %7409 = vrcp.f32 %v10311_v15 }
 0x4d3   :  { %11881 = vst [vmem:[#allocation50_spill] sm:$0xff] %v10353_v9  ;;  %v7396_v35 = vpop.eup %7395  ;;  %6920 = vmatmul.mubr.msk.f32.gmra.mxu1 %vm1321_vm1, %v10355_v32  ;;  %v10368_v26 = vpop.xlane.xlu0 %1791  ;;  %7411 = vrcp.f32 %v10341_v27 }
 0x4d4   :  { %3737 = vadd.xlane.f32.xlu1 %v3736_v57  ;;  %v2580_v36 = vmul.f32 %v7396_v35, %v10148_v54  ;;  %v3751_v54 = vsel %vm1321_vm1, %v10048_v2, 0.0  ;;  %v3745_v35 = vsel %vm1321_vm1, %v9993_v43, 0.0  ;;  %v3742_v43 = vsel %vm1321_vm1, %v9996_v24, 0.0 }
 0x4d5   :  { %v10373_v52 = vpop.xlane.xlu1 %1878  ;;  %v10375_v14 = vpop.eup %7397  ;;  %v3748_v24 = vsel %vm1321_vm1, %v10054_v38, 0.0  ;;  %7413 = vrcp.f32 %v10345_v48 }
 0x4d6   :  { %v10379_v46 = vpop.eup %7399  ;;  %v2692_v47 = vmul.f32 %v10364_v16, %v2580_v36  ;;  %3740 = vadd.xlane.f32.xlu0 %v3739_v53  ;;  %6922 = vmatprep.mubr.msk.f32.mxu1 %vm1321_vm1, %v10375_v14  ;;  %v3754_v36 = vsel %vm1321_vm1, %v10103_v17, 0.0  ;;  %v3760_v17 = vsel %vm1321_vm1, %v10145_v59, 0.0  ;;  %7415 = vrcp.f32 %v10334_v37 }
 0x4d7   :  { %6923 = vmatmul.mubr.msk.f32.gmra.mxu1 %vm1321_vm1, %v10379_v46  ;;  %v10388_v4 = vpop.xlane.xlu0 %1875  ;;  %7417 = vrcp.f32 %v10368_v26  ;;  %v3784_v37 = vsel %vm1321_vm1, %v10291_v62, 0.0 }
 0x4d8   :  { %3752 = vadd.xlane.f32.xlu1 %v3751_v54  ;;  %v2739_v33 = vsel %vm51_vm0, %v2692_v47, 0.0  ;;  %v10408_v47 = vpop.f32.mrf.mxu1  ;;  %7419 = vrcp.f32 %v10373_v52  ;;  %v3766_v52 = vsel %vm1321_vm1, %v10168_v12, 0.0  ;;  %v3772_v12 = vsel %vm1321_vm1, %v10229_v20, 0.0 }
 0x4d9   :  { %v1816_v29 = vpop.xlane.xlu1 %1815  ;;  %v10393_v51 = vpop.eup %7401  ;;  %v10396_v57 = vadd.f32 %v2739_v33, %v10252_v30 }
 0x4da   :  { %v10400_v2 = vpop.eup %7403  ;;  %3746 = vadd.xlane.f32.xlu0 %v3745_v35  ;;  %6925 = vmatprep.mubr.msk.f32.mxu1 %vm1321_vm1, %v10393_v51 }
 0x4db   :  { %11882 = vst [vmem:[#allocation51_spill] sm:$0xff] %v10396_v57  ;;  %6926 = vmatmul.mubr.msk.f32.gmra.mxu1 %vm1321_vm1, %v10400_v2  ;;  %v1753_v53 = vpop.xlane.xlu0 %1752  ;;  %v3757_v57 = vsel %vm1321_vm1, %v10112_v60, 0.0 }
 0x4dc   :  { %3755 = vadd.xlane.f32.xlu1 %v3754_v36  ;;  %v10422_v36 = vpop.f32.mrf.mxu1  ;;  %7421 = vrcp.f32 %v1753_v53 }
 0x4dd   :  { %v1777_v30 = vpop.xlane.xlu1 %1776  ;;  %v10410_v54 = vpop.eup %7405  ;;  %7423 = vrcp.f32 %v1816_v29 }
 0x4de   :  { %v10414_v33 = vpop.eup %7407  ;;  %3743 = vadd.xlane.f32.xlu0 %v3742_v43  ;;  %6928 = vmatprep.mubr.msk.f32.mxu1 %vm1321_vm1, %v10410_v54  ;;  %v3775_v43 = vsel %vm1321_vm1, %v10225_v1, 0.0  ;;  %v10428_v9 = vpop.f32.mrf.mxu1  ;;  %7425 = vrcp.f32 %v1777_v30 }
 0x4df   :  { %6929 = vmatmul.mubr.msk.f32.gmra.mxu1 %vm1321_vm1, %v10414_v33  ;;  %v1774_v35 = vpop.xlane.xlu0 %1773  ;;  %v7410_v53 = vpop.eup %7409 }
 0x4e0   :  { %3761 = vadd.xlane.f32.xlu1 %v3760_v17  ;;  %v3781_v17 = vsel %vm1321_vm1, %v10279_v50, 0.0  ;;  %v10437_v1 = vpop.f32.mrf.mxu1  ;;  %v3787_v50 = vsel %vm1321_vm1, %v10299_v10, 0.0  ;;  %7427 = vrcp.f32 %v1774_v35  ;;  %v7412_v29 = vpop.eup %7411  ;;  %v11884_v35 = vld [vmem:[#allocation44_spill] sm:$0xff] }
 0x4e1   :  { %v1801_v21 = vpop.xlane.xlu1 %1800  ;;  %7429 = vrcp.f32 %v10388_v4 }
 0x4e2   :  { %3749 = vadd.xlane.f32.xlu0 %v3748_v24  ;;  %7431 = vrcp.f32 %v1801_v21 }
 0x4e3   :  { %v1819_v31 = vpop.xlane.xlu0 %1818 }
 0x4e4   :  { %3776 = vadd.xlane.f32.xlu1 %v3775_v43  ;;  %v3763_v43 = vsel %vm1321_vm1, %v10155_v34, 0.0  ;;  %v3769_v34 = vsel %vm1321_vm1, %v10176_v11, 0.0  ;;  %v3799_v11 = vsel %vm1321_vm1, %v10355_v32, 0.0  ;;  %7433 = vrcp.f32 %v1819_v31 }
 0x4e5   :  { %v1885_v59 = vpop.xlane.xlu1 %1884  ;;  %v3805_v32 = vsel %vm1321_vm1, %v10379_v46, 0.0  ;;  %v3778_v46 = vsel %vm1321_vm1, %v10270_v28, 0.0  ;;  %v10500_v28 = vld [vmem:[%s11549_s2] ss:$0 sm:$0xff] }
 0x4e6   :  { %3758 = vadd.xlane.f32.xlu0 %v3757_v57 }
 0x4e7   :  { %v1798_v38 = vpop.xlane.xlu0 %1797 }
 0x4e8   :  { %3782 = vadd.xlane.f32.xlu1 %v3781_v17  ;;  %7435 = vrcp.f32 %v1798_v38 }
 0x4e9   :  { %v1825_v24 = vpop.xlane.xlu1 %1824 }
 0x4ea   :  { %3764 = vadd.xlane.f32.xlu0 %v3763_v43  ;;  %v10442_v60 = vpop.f32.mrf.mxu1  ;;  %7437 = vrcp.f32 %v1825_v24  ;;  %v3811_v24 = vsel %vm1321_vm1, %v10400_v2, 0.0 }
 0x4eb   :  { %v1882_v15 = vpop.xlane.xlu0 %1881  ;;  %7439 = vrcp.f32 %v1885_v59 }
 0x4ec   :  { %3788 = vadd.xlane.f32.xlu1 %v3787_v50  ;;  %v10449_v48 = vpop.f32.mrf.mxu1  ;;  %v7414_v50 = vpop.eup %7413  ;;  %7441 = vrcp.f32 %v1882_v15 }
 0x4ed   :  { %v10447_v27 = vpop.xlane.xlu1 %1887  ;;  %v7416_v4 = vpop.eup %7415  ;;  %v2568_v31 = vmul.f32 %v7414_v50, %v10021_v19  ;;  %v10494_v19 = vld [vmem:[%s11549_s2 + $0x1] ss:$0 sm:$0xff] }
 0x4ee   :  { %3770 = vadd.xlane.f32.xlu0 %v3769_v34  ;;  %v7418_v38 = vpop.eup %7417 }
 0x4ef   :  { %v10456_v57 = vpop.f32.mrf.mxu1  ;;  %v1822_v10 = vpop.xlane.xlu0 %1821  ;;  %v2680_v2 = vmul.f32 %v10128_v45, %v2568_v31 }
 0x4f0   :  { %3785 = vadd.xlane.f32.xlu1 %v3784_v37  ;;  %v2553_v37 = vmul.f32 %v7410_v53, %v11884_v35  ;;  %v7420_v53 = vpop.eup %7419  ;;  %v11887_v35 = vld [vmem:[#allocation39_spill] sm:$0xff]  ;;  %7443 = vrcp.f32 %v1822_v10 }
 0x4f1   :  { %v10458_v26 = vpop.xlane.xlu1 %1896  ;;  %v10460_v17 = vpop.f32.mrf.mxu1 }
 0x4f2   :  { %3767 = vadd.xlane.f32.xlu0 %v3766_v52  ;;  %v11885_v52 = vld [vmem:[#allocation40_spill] sm:$0xff]  ;;  %v2665_v59 = vmul.f32 %v10494_v19, %v2553_v37  ;;  %v3793_v37 = vsel %vm1321_vm1, %v10322_v5, 0.0  ;;  %v10525_v5 = vld [vmem:[%s11549_s2 + $0x7] ss:$0 sm:$0xff] }
 0x4f3   :  { %v10467_v62 = vpop.f32.mrf.mxu1  ;;  %v10469_v43 = vpop.xlane.xlu0 %1890 }
 0x4f4   :  { %11883 = vst [vmem:[#allocation53_spill] sm:$0xff] %v10467_v62  ;;  %3800 = vadd.xlane.f32.xlu1 %v3799_v11  ;;  %v2545_v11 = vmul.f32 %v7412_v29, %v11885_v52  ;;  %v2546_v29 = vmul.f32 %v7416_v4, %v11887_v35  ;;  %v2567_v4 = vmul.f32 %v7418_v38, %v10028_v42  ;;  %v10519_v42 = vsel %vm1321_vm1, %v10414_v33, 0.0 }
 0x4f5   :  { %v1828_v30 = vpop.xlane.xlu1 %1827  ;;  %v10471_v34 = vpop.f32.mrf.mxu1  ;;  %v2596_v35 = vmul.f32 %v7420_v53, %v10331_v22  ;;  %v11890_v22 = vld [vmem:[#allocation37_spill] sm:$0xff]  ;;  %v2806_v53 = vsel %vm51_vm0, %v2665_v59, 0.0 }
 0x4f6   :  { %3773 = vadd.xlane.f32.xlu0 %v3772_v12  ;;  %v2657_v15 = vmul.f32 %v10500_v28, %v2545_v11  ;;  %7445 = vrcp.f32 %v1828_v30  ;;  %v3796_v30 = vsel %vm1321_vm1, %v10348_v49, 0.0  ;;  %v3790_v11 = vsel %vm1321_vm1, %v10316_v39, 0.0 }
 0x4f7   :  { %v10479_v21 = vpop.f32.mrf.mxu1  ;;  %v10481_v62 = vpop.xlane.xlu0 %1893  ;;  %7447 = vrcp.f32 %v10447_v27  ;;  %v2658_v31 = vmul.f32 %v10500_v28, %v2546_v29  ;;  %v3808_v49 = vsel %vm1321_vm1, %v10393_v51, 0.0 }
 0x4f8   :  { %3806 = vadd.xlane.f32.xlu1 %v3805_v32  ;;  %v7422_v32 = vpop.eup %7421  ;;  %v2805_v33 = vsel %vm51_vm0, %v2657_v15, 0.0  ;;  %v2708_v15 = vmul.f32 %v10525_v5, %v2596_v35 }
 0x4f9   :  { %v1834_v20 = vpop.xlane.xlu1 %1833  ;;  %v10484_v12 = vpop.f32.mrf.mxu1  ;;  %v2554_v38 = vmul.f32 %v7422_v32, %v11890_v22  ;;  %v2679_v32 = vmul.f32 %v10128_v45, %v2567_v4  ;;  %v2807_v35 = vadd.f32 %v2806_v53, %v2805_v33 }
 0x4fa   :  { %11886 = vst [vmem:[#allocation54_spill] sm:$0xff] %v10484_v12  ;;  %3779 = vadd.xlane.f32.xlu0 %v3778_v46  ;;  %v7424_v46 = vpop.eup %7423  ;;  %7449 = vrcp.f32 %v1834_v20  ;;  %v2795_v20 = vsel %vm51_vm0, %v2680_v2, 0.0  ;;  %v2820_v2 = vsel %vm51_vm0, %v2658_v31, 0.0 }
 0x4fb   :  { %v10503_v10 = vpop.f32.mrf.mxu1  ;;  %v1837_v50 = vpop.xlane.xlu0 %1836  ;;  %v2575_v51 = vmul.f32 %v7424_v46, %v10122_v61  ;;  %v2666_v4 = vmul.f32 %v10494_v19, %v2554_v38  ;;  %v10561_v38 = vsel %vm51_vm0, %v2708_v15, 0.0 }
 0x4fc   :  { %11888 = vst [vmem:[#allocation10_spill] sm:$0xff] %v10503_v10  ;;  %3812 = vadd.xlane.f32.xlu1 %v3811_v24  ;;  %v7426_v27 = vpop.eup %7425  ;;  %7451 = vrcp.f32 %v1837_v50 }
 0x4fd   :  { %v1840_v52 = vpop.xlane.xlu1 %1839  ;;  %v10511_v12 = vpop.f32.mrf.mxu1  ;;  %v2562_v50 = vmul.f32 %v7426_v27, %v9957_v8 }
 0x4fe   :  { %11889 = vst [vmem:[#allocation14_spill] sm:$0xff] %v10511_v12  ;;  %3797 = vadd.xlane.f32.xlu0 %v3796_v30  ;;  %v7428_v39 = vpop.eup %7427  ;;  %v3802_v12 = vsel %vm1321_vm1, %v10375_v14, 0.0  ;;  %7453 = vrcp.f32 %v1840_v52  ;;  %v3814_v14 = vsel %vm1321_vm1, %v10410_v54, 0.0  ;;  %v10555_v54 = vadd.f32 %v2795_v20, %v10085_v63 }
 0x4ff   :  { %v10532_v24 = vpop.f32.mrf.mxu1  ;;  %v1843_v29 = vpop.xlane.xlu0 %1842  ;;  %7455 = vrcp.f32 %v10469_v43  ;;  %v2561_v61 = vmul.f32 %v7428_v39, %v9969_v56  ;;  %v2821_v39 = vsel %vm51_vm0, %v2666_v4, 0.0 }
 0x500   :  { %3809 = vadd.xlane.f32.xlu1 %v3808_v49  ;;  %v7430_v10 = vpop.eup %7429  ;;  %7457 = vrcp.f32 %v10458_v26  ;;  %v2687_v26 = vmul.f32 %v10218_v25, %v2575_v51  ;;  %v2822_v4 = vadd.f32 %v2821_v39, %v2820_v2 }
 0x501   :  { %v1849_v30 = vpop.xlane.xlu1 %1848  ;;  %v7432_v59 = vpop.eup %7431  ;;  %7459 = vrcp.f32 %v10481_v62  ;;  %v2595_v46 = vmul.f32 %v7430_v10, %v10343_v18  ;;  %v10566_v18 = vld [vmem:[%s11549_s2 + $0x2] ss:$0 sm:$0xff] }
 0x502   :  { %v10542_v22 = vpop.f32.mrf.mxu1  ;;  %v7434_v49 = vpop.eup %7433  ;;  %3803 = vadd.xlane.f32.xlu0 %v3802_v12  ;;  %v2570_v31 = vmul.f32 %v7432_v59, %v10036_v3  ;;  %7461 = vrcp.f32 %v1843_v29  ;;  %v2780_v12 = vsel %vm51_vm0, %v2679_v32, 0.0  ;;  %v2674_v63 = vmul.f32 %v10566_v18, %v2562_v50  ;;  %v11891_v59 = vld [vmem:[#allocation42_spill] sm:$0xff] }
 0x503   :  { %v7436_v52 = vpop.eup %7435  ;;  %v1846_v43 = vpop.xlane.xlu0 %1845  ;;  %v2576_v10 = vmul.f32 %v7434_v49, %v10105_v13  ;;  %v2673_v53 = vmul.f32 %v10566_v18, %v2561_v61  ;;  %v2707_v13 = vmul.f32 %v10525_v5, %v2595_v46  ;;  %v2781_v15 = vadd.f32 %v2780_v12, %v11891_v59 }
 0x504   :  { %v10551_v8 = vpop.f32.mrf.mxu1  ;;  %3794 = vadd.xlane.f32.xlu1 %v3793_v37  ;;  %v7438_v27 = vpop.eup %7437  ;;  %v2569_v33 = vmul.f32 %v7436_v52, %v10046_v40  ;;  %v2682_v49 = vmul.f32 %v10128_v45, %v2570_v31  ;;  %v2823_v61 = vsel %vm51_vm0, %v2674_v63, 0.0 }
 0x505   :  { %v1855_v56 = vpop.xlane.xlu1 %1854  ;;  %v7440_v62 = vpop.eup %7439  ;;  %v2578_v20 = vmul.f32 %v7438_v27, %v10133_v44  ;;  %v2688_v52 = vmul.f32 %v10218_v25, %v2576_v10  ;;  %v10595_v63 = vsel %vm51_vm0, %v2707_v13, 0.0  ;;  %v11894_v13 = vld [vmem:[#allocation43_spill] sm:$0xff] }
 0x506   :  { %7463 = vrcp.f32 %v1855_v56  ;;  %v10570_v3 = vpop.f32.mrf.mxu1  ;;  %v7442_v37 = vpop.eup %7441  ;;  %3791 = vadd.xlane.f32.xlu0 %v3790_v11  ;;  %v2598_v40 = vmul.f32 %v7440_v62, %v10371_v55  ;;  %v2808_v55 = vsel %vm51_vm0, %v2673_v53, 0.0 }
 0x507   :  { %7465 = vrcp.f32 %v1849_v30  ;;  %v7444_v29 = vpop.eup %7443  ;;  %v1852_v51 = vpop.xlane.xlu0 %1851  ;;  %v2782_v30 = vsel %vm51_vm0, %v2687_v26, 0.0  ;;  %v2597_v27 = vmul.f32 %v7442_v37, %v10391_v41  ;;  %v2690_v56 = vmul.f32 %v10218_v25, %v2578_v20  ;;  %v11893_v26 = vld [vmem:[#allocation52_spill] sm:$0xff] }
 0x508   :  { %7467 = vrcp.f32 %v1846_v43  ;;  %v10576_v32 = vpop.f32.mrf.mxu1  ;;  %3818 = vadd.xlane.f32.xlu1 %v10519_v42  ;;  %v7446_v50 = vpop.eup %7445  ;;  %v2681_v42 = vmul.f32 %v10128_v45, %v2569_v33  ;;  %v11892_v43 = vld [vmem:[#allocation41_spill] sm:$0xff]  ;;  %v10597_v10 = vadd.f32 %v2782_v30, %v2781_v15  ;;  %v2710_v37 = vmul.f32 %v10525_v5, %v2598_v40  ;;  %v11895_v30 = vld [vmem:[#allocation12_spill] sm:$0xff] }
 0x509   :  { %7469 = vrcp.f32 %v1852_v51  ;;  %v1861_v11 = vpop.xlane.xlu1 %1860  ;;  %v7448_v44 = vpop.eup %7447  ;;  %v2577_v46 = vmul.f32 %v7444_v29, %v11892_v43  ;;  %v2579_v12 = vmul.f32 %v7446_v50, %v11893_v26  ;;  %v2824_v33 = vadd.f32 %v2823_v61, %v2822_v4 }
 0x50a   :  { %7471 = vrcp.f32 %v1861_v11  ;;  %3815 = vadd.xlane.f32.xlu0 %v3814_v14  ;;  %v7450_v31 = vpop.eup %7449  ;;  %v10592_v2 = vpop.f32.mrf.mxu1  ;;  %v2825_v14 = vsel %vm51_vm0, %v2682_v49, 0.0  ;;  %v2599_v39 = vmul.f32 %v7448_v44, %v10422_v36  ;;  %v2797_v29 = vsel %vm51_vm0, %v2688_v52, 0.0  ;;  %v11896_v52 = vld [vmem:[#allocation46_spill] sm:$0xff] }
 0x50b   :  { %v1858_v62 = vpop.xlane.xlu0 %1857  ;;  %v7452_v45 = vpop.eup %7451  ;;  %v2809_v20 = vadd.f32 %v2808_v55, %v2807_v35  ;;  %v2581_v59 = vmul.f32 %v7450_v31, %v11894_v13  ;;  %v2709_v15 = vmul.f32 %v10525_v5, %v2597_v27  ;;  %v2689_v50 = vmul.f32 %v10218_v25, %v2577_v46  ;;  %v11897_v13 = vld [vmem:[#allocation45_spill] sm:$0xff] }
 0x50c   :  { %7473 = vrcp.f32 %v1858_v62  ;;  %v7454_v53 = vpop.eup %7453  ;;  %v2810_v49 = vsel %vm51_vm0, %v2681_v42, 0.0  ;;  %v2582_v40 = vmul.f32 %v7452_v45, %v11895_v30  ;;  %v10608_v43 = vpop.f32.mrf.mxu1  ;;  %v2691_v44 = vmul.f32 %v10364_v16, %v2579_v12 }
 0x50d   :  { %v1864_v41 = vpop.xlane.xlu1 %1863  ;;  %v7456_v51 = vpop.eup %7455  ;;  %v2826_v4 = vadd.f32 %v2825_v14, %v2824_v33  ;;  %v2827_v35 = vsel %vm51_vm0, %v2690_v56, 0.0  ;;  %v2583_v55 = vmul.f32 %v7454_v53, %v11896_v52  ;;  %v10614_v25 = vsel %vm51_vm0, %v2710_v37, 0.0  ;;  %v10624_v56 = vld [vmem:[%s11549_s2 + $0x6] ss:$0 sm:$0xff]  ;;  %v11898_v52 = vld [vmem:[#allocation11_spill] sm:$0xff] }
 0x50e   :  { %7475 = vrcp.f32 %v1864_v41  ;;  %v7458_v11 = vpop.eup %7457  ;;  %v2711_v42 = vmul.f32 %v10525_v5, %v2599_v39  ;;  %v2600_v31 = vmul.f32 %v7456_v51, %v10408_v47  ;;  %v10619_v26 = vadd.f32 %v2797_v29, %v10555_v54  ;;  %v10638_v33 = vpop.f32.mrf.mxu1 }
 0x50f   :  { %v1867_v36 = vpop.xlane.xlu0 %1866  ;;  %v7460_v61 = vpop.eup %7459  ;;  %v2811_v12 = vadd.f32 %v2810_v49, %v2809_v20  ;;  %v2693_v45 = vmul.f32 %v10364_v16, %v2581_v59  ;;  %v10628_v14 = vsel %vm51_vm0, %v2709_v15, 0.0  ;;  %v2812_v41 = vsel %vm51_vm0, %v2689_v50, 0.0 }
 0x510   :  { %7477 = vrcp.f32 %v1867_v36  ;;  %v7462_v46 = vpop.eup %7461  ;;  %v10631_v37 = vadd.f32 %v2827_v35, %v2826_v4  ;;  %v10634_v54 = vmul.f32 %v7458_v11, %v10428_v9  ;;  %v2694_v39 = vmul.f32 %v10364_v16, %v2582_v40 }
 0x511   :  { %v1873_v27 = vpop.xlane.xlu1 %1872  ;;  %v2724_v20 = vsel %vm51_vm0, %v2691_v44, 0.0  ;;  %v2584_v59 = vmul.f32 %v7462_v46, %v11897_v13  ;;  %v2695_v50 = vmul.f32 %v10364_v16, %v2583_v55  ;;  %v10644_v49 = vsel %vm51_vm0, %v2711_v42, 0.0  ;;  %v10661_v46 = vpop.f32.mrf.mxu1  ;;  %v11901_v13 = vld [vmem:[#allocation13_spill] sm:$0xff] }
 0x512   :  { %7479 = vrcp.f32 %v1873_v27  ;;  %v10650_v30 = vadd.f32 %v2812_v41, %v2811_v12  ;;  %v2725_v44 = vadd.f32 %v2724_v20, %v10277_v23  ;;  %v2754_v4 = vsel %vm51_vm0, %v2693_v45, 0.0  ;;  %v11899_v45 = vld [vmem:[#allocation47_spill] sm:$0xff] }
 0x513   :  { %v7464_v62 = vpop.eup %7463  ;;  %v1870_v29 = vpop.xlane.xlu0 %1869  ;;  %v10656_v35 = vmul.f32 %v7460_v61, %v10437_v1  ;;  %v2769_v12 = vsel %vm51_vm0, %v2694_v39, 0.0  ;;  %v2784_v1 = vsel %vm51_vm0, %v2695_v50, 0.0 }
 0x514   :  { %v7466_v47 = vpop.eup %7465  ;;  %v2588_v53 = vmul.f32 %v7464_v62, %v10231_v7  ;;  %7481 = vrcp.f32 %v1870_v29  ;;  %v10648_v7 = vmul.f32 %v10525_v5, %v2600_v31  ;;  %v11900_v29 = vld [vmem:[#allocation51_spill] sm:$0xff] }
 0x515   :  { %v7468_v51 = vpop.eup %7467  ;;  %v3630_v15 = vpop.xlane.xlu1 %3629  ;;  %v2586_v55 = vmul.f32 %v7466_v47, %v11898_v52  ;;  %v2755_v47 = vadd.f32 %v2754_v4, %v10320_v0  ;;  %v2785_v0 = vadd.f32 %v2784_v1, %v10597_v10  ;;  %v11904_v10 = vld [vmem:[#allocation48_spill] sm:$0xff] }
 0x516   :  { %v7470_v9 = vpop.eup %7469  ;;  %v2700_v11 = vmul.f32 %v10624_v56, %v2588_v53  ;;  %7483 = vrcp.f32 %v3630_v15  ;;  %v2585_v41 = vmul.f32 %v7468_v51, %v11899_v45  ;;  %v11902_v15 = vld [vmem:[#allocation50_spill] sm:$0xff] }
 0x517   :  { %v7472_v40 = vpop.eup %7471  ;;  %v2587_v36 = vmul.f32 %v7470_v9, %v10243_v58  ;;  %v3633_v31 = vpop.xlane.xlu0 %3632  ;;  %v2696_v58 = vmul.f32 %v10364_v16, %v2584_v59  ;;  %v2770_v9 = vadd.f32 %v2769_v12, %v11902_v15  ;;  %v2698_v4 = vmul.f32 %v10364_v16, %v2586_v55 }
 0x518   :  { %v2741_v27 = vsel %vm51_vm0, %v2700_v11, 0.0  ;;  %v2590_v42 = vmul.f32 %v7472_v40, %v10257_v6  ;;  %7485 = vrcp.f32 %v3633_v31  ;;  %v10674_v11 = vpop.f32.mrf.mxu1 }
 0x519   :  { %v3639_v23 = vpop.xlane.xlu1 %3638  ;;  %v2699_v62 = vmul.f32 %v10624_v56, %v2587_v36  ;;  %v7474_v61 = vpop.eup %7473  ;;  %v2742_v20 = vadd.f32 %v2741_v27, %v11900_v29  ;;  %v11903_v36 = vld [vmem:[#allocation2_spill] sm:$0xff]  ;;  %v2799_v31 = vsel %vm51_vm0, %v2696_v58, 0.0 }
 0x51a   :  { %7487 = vrcp.f32 %v3639_v23  ;;  %v2702_v6 = vmul.f32 %v10624_v56, %v2590_v42  ;;  %v2589_v59 = vmul.f32 %v7474_v61, %v11901_v13 }
 0x51b   :  { %v7476_v53 = vpop.eup %7475  ;;  %v2726_v39 = vsel %vm51_vm0, %v2699_v62, 0.0  ;;  %v3636_v50 = vpop.xlane.xlu0 %3635  ;;  %v2697_v62 = vmul.f32 %v10364_v16, %v2585_v41  ;;  %v2744_v45 = vadd.f32 %v10561_v38, %v2742_v20  ;;  %v2800_v16 = vadd.f32 %v2799_v31, %v10619_v26 }
 0x51c   :  { %v2727_v40 = vadd.f32 %v2726_v39, %v2725_v44  ;;  %v2771_v51 = vsel %vm51_vm0, %v2702_v6, 0.0  ;;  %v2591_v52 = vmul.f32 %v7476_v53, %v11903_v36  ;;  %7489 = vrcp.f32 %v3636_v50  ;;  %v11905_v53 = vld [vmem:[#allocation3_spill] sm:$0xff]  ;;  %v10689_v39 = vpop.f32.mrf.mxu1 }
 0x51d   :  { %v3642_v27 = vpop.xlane.xlu1 %3641  ;;  %v2701_v42 = vmul.f32 %v10624_v56, %v2589_v59  ;;  %v7478_v23 = vpop.eup %7477  ;;  %v2772_v6 = vadd.f32 %v2771_v51, %v2770_v9  ;;  %v2829_v59 = vsel %vm51_vm0, %v2698_v4, 0.0  ;;  %v2803_v31 = vsel %vm51_vm0, %v10648_v7, 0.0 }
 0x51e   :  { %7491 = vrcp.f32 %v3642_v27  ;;  %v2729_v12 = vadd.f32 %v10595_v63, %v2727_v40  ;;  %v2703_v44 = vmul.f32 %v10624_v56, %v2591_v52  ;;  %v2592_v1 = vmul.f32 %v7478_v23, %v11904_v10  ;;  %v11906_v52 = vld [vmem:[#allocation49_spill] sm:$0xff]  ;;  %v10707_v4 = vpop.f32.mrf.mxu1 }
 0x51f   :  { %v7480_v61 = vpop.eup %7479  ;;  %v2756_v55 = vsel %vm51_vm0, %v2701_v42, 0.0  ;;  %v3645_v58 = vpop.xlane.xlu0 %3644  ;;  %v2774_v26 = vadd.f32 %v10614_v25, %v2772_v6 }
 0x520   :  { %v2594_v29 = vmul.f32 %v7480_v61, %v11905_v53  ;;  %6939 = vmatprep.mubr.msk.f32.mxu0 %vm51_vm0, %v2729_v12  ;;  %v2757_v63 = vadd.f32 %v2756_v55, %v2755_v47  ;;  %v2786_v13 = vsel %vm51_vm0, %v2703_v44, 0.0  ;;  %7493 = vrcp.f32 %v3645_v58 }
 0x521   :  { %6940 = vmatmul.mubr.msk.f32.vlgmr.msra.gmra.mxu0 %vm51_vm0, %v2744_v45  ;;  %v3651_v38 = vpop.xlane.xlu1 %3650  ;;  %v2787_v41 = vadd.f32 %v2786_v13, %v2785_v0  ;;  %v2704_v20 = vmul.f32 %v10624_v56, %v2592_v1  ;;  %v7482_v15 = vpop.eup %7481  ;;  %v2814_v47 = vsel %vm51_vm0, %v2697_v62, 0.0  ;;  %v2830_v12 = vadd.f32 %v2829_v59, %v10631_v37 }
 0x522   :  { %v2706_v9 = vmul.f32 %v10624_v56, %v2594_v29  ;;  %7495 = vrcp.f32 %v3651_v38  ;;  %v2759_v50 = vadd.f32 %v10628_v14, %v2757_v63  ;;  %v2593_v0 = vmul.f32 %v7482_v15, %v11906_v52  ;;  %v10718_v62 = vpop.f32.mrf.mxu1  ;;  %v11908_v52 = vld [vmem:[#allocation54_spill] sm:$0xff] }
 0x523   :  { %v7484_v40 = vpop.eup %7483  ;;  %v2789_v51 = vadd.f32 %v10644_v49, %v2787_v41  ;;  %v2801_v36 = vsel %vm51_vm0, %v2704_v20, 0.0  ;;  %v3648_v42 = vpop.xlane.xlu0 %3647  ;;  %v2815_v61 = vadd.f32 %v2814_v47, %v10650_v30  ;;  %v2714_v45 = vmul.f32 %v10525_v5, %v10634_v54 }
 0x524   :  { %v10705_v27 = vmul.f32 %v7484_v40, %v10449_v48  ;;  %6942 = vmatprep.mubr.msk.f32.mxu0 %vm51_vm0, %v2759_v50  ;;  %v2802_v14 = vadd.f32 %v2801_v36, %v2800_v16  ;;  %v2831_v25 = vsel %vm51_vm0, %v2706_v9, 0.0  ;;  %7497 = vrcp.f32 %v3648_v42  ;;  %v10729_v63 = vpop.f32.mrf.mxu1  ;;  %v11907_v9 = vld [vmem:[#allocation53_spill] sm:$0xff] }
 0x525   :  { %6943 = vmatmul.mubr.msk.f32.gmra.mxu0 %vm51_vm0, %v2774_v26  ;;  %v3657_v49 = vpop.xlane.xlu1 %3656  ;;  %v2705_v23 = vmul.f32 %v10624_v56, %v2593_v0  ;;  %v2713_v48 = vmul.f32 %v10525_v5, %v10656_v35  ;;  %v7486_v44 = vpop.eup %7485  ;;  %v2832_v35 = vadd.f32 %v2831_v25, %v2830_v12 }
 0x526   :  { %7499 = vrcp.f32 %v3657_v49  ;;  %6945 = vmatprep.mubr.msk.f32.mxu0 %vm51_vm0, %v2789_v51  ;;  %v2804_v7 = vadd.f32 %v2803_v31, %v2802_v14  ;;  %v4462_v1 = vmul.f32 %v7486_v44, %v10442_v60  ;;  %v2833_v60 = vsel %vm51_vm0, %v2714_v45, 0.0  ;;  %v10736_v38 = vpop.f32.mrf.mxu1  ;;  %v11909_v14 = vld [vmem:[#allocation10_spill] sm:$0xff] }
 0x527   :  { %v7488_v10 = vpop.eup %7487  ;;  %v2816_v55 = vsel %vm51_vm0, %v2705_v23, 0.0  ;;  %v3654_v6 = vpop.xlane.xlu0 %3653  ;;  %v2818_v58 = vsel %vm51_vm0, %v2713_v48, 0.0  ;;  %v2834_v16 = vadd.f32 %v2833_v60, %v2832_v35  ;;  %v4525_v44 = vmul.f32 %v10500_v28, %v10705_v27 }
 0x528   :  { %v4464_v37 = vmul.f32 %v7488_v10, %v10456_v57  ;;  %v2817_v53 = vadd.f32 %v2816_v55, %v2815_v61  ;;  %7501 = vrcp.f32 %v3654_v6  ;;  %v10744_v47 = vpop.f32.mrf.mxu1  ;;  %v4526_v42 = vmul.f32 %v10500_v28, %v4462_v1 }
 0x529   :  { %6946 = vmatmul.mubr.msk.f32.gmra.mxu0 %vm51_vm0, %v2804_v7  ;;  %v3660_v29 = vpop.xlane.xlu1 %3659  ;;  %v7490_v30 = vpop.eup %7489  ;;  %v11910_v7 = vld [vmem:[#allocation14_spill] sm:$0xff] }
 0x52a   :  { %7503 = vrcp.f32 %v3660_v29  ;;  %v2819_v5 = vadd.f32 %v2818_v58, %v2817_v53  ;;  %v4463_v13 = vmul.f32 %v7490_v30, %v10460_v17  ;;  %v4604_v35 = vsel %vm51_vm0, %v4526_v42, 0.0 }
 0x52b   :  { %v7492_v54 = vpop.eup %7491  ;;  %v3663_v41 = vpop.xlane.xlu0 %3662  ;;  %v4528_v30 = vmul.f32 %v10500_v28, %v4464_v37 }
 0x52c   :  { %v10734_v57 = vmul.f32 %v7492_v54, %v10471_v34  ;;  %6948 = vmatprep.mubr.msk.f32.mxu0 %vm51_vm0, %v2819_v5  ;;  %7505 = vrcp.f32 %v3663_v41  ;;  %v4527_v45 = vmul.f32 %v10500_v28, %v4463_v13  ;;  %v4589_v13 = vsel %vm51_vm0, %v4525_v44, 0.0 }
 0x52d   :  { %6949 = vmatmul.mubr.msk.f32.gmra.mxu0 %vm51_vm0, %v2834_v16  ;;  %v3669_v20 = vpop.xlane.xlu1 %3668  ;;  %v7494_v59 = vpop.eup %7493 }
 0x52e   :  { %7507 = vrcp.f32 %v3669_v20  ;;  %v4466_v50 = vmul.f32 %v7494_v59, %v11907_v9  ;;  %v4529_v42 = vmul.f32 %v10500_v28, %v10734_v57 }
 0x52f   :  { %v7496_v15 = vpop.eup %7495  ;;  %v3666_v34 = vpop.xlane.xlu0 %3665 }
 0x530   :  { %v10742_v17 = vmul.f32 %v7496_v15, %v10479_v21  ;;  %7509 = vrcp.f32 %v3666_v34  ;;  %v10746_v51 = vpop.f32.mrf.mxu1  ;;  %v4530_v60 = vmul.f32 %v10500_v28, %v4466_v50  ;;  %v4619_v15 = vsel %vm51_vm0, %v4527_v45, 0.0 }
 0x531   :  { %v3672_v40 = vpop.xlane.xlu1 %3671  ;;  %v7498_v26 = vpop.eup %7497 }
 0x532   :  { %7511 = vrcp.f32 %v3672_v40  ;;  %v4467_v0 = vmul.f32 %v7498_v26, %v11908_v52  ;;  %v10752_v48 = vpop.f32.mrf.mxu1 }
 0x533   :  { %v7500_v36 = vpop.eup %7499  ;;  %v3675_v25 = vpop.xlane.xlu0 %3674 }
 0x534   :  { %v4470_v31 = vmul.f32 %v7500_v36, %v11909_v14  ;;  %7513 = vrcp.f32 %v3675_v25  ;;  %v4531_v25 = vmul.f32 %v10500_v28, %v4467_v0  ;;  %v4532_v0 = vmul.f32 %v10500_v28, %v10742_v17 }
 0x535   :  { %v3681_v21 = vpop.xlane.xlu1 %3680  ;;  %v7502_v49 = vpop.eup %7501 }
 0x536   :  { %v4534_v23 = vmul.f32 %v10494_v19, %v4470_v31  ;;  %7515 = vrcp.f32 %v3681_v21  ;;  %v4469_v61 = vmul.f32 %v7502_v49, %v11910_v7  ;;  %v4664_v31 = vsel %vm51_vm0, %v4530_v60, 0.0 }
 0x537   :  { %v7504_v12 = vpop.eup %7503  ;;  %v10759_v1 = vpop.f32.mrf.mxu1 }
 0x538   :  { %v4471_v10 = vmul.f32 %v7504_v12, %v10542_v22  ;;  %v3678_v55 = vpop.xlane.xlu0 %3677  ;;  %v4605_v6 = vsel %vm51_vm0, %v4534_v23, 0.0  ;;  %v4533_v53 = vmul.f32 %v10494_v19, %v4469_v61 }
 0x539   :  { %7517 = vrcp.f32 %v3678_v55  ;;  %v3684_v29 = vpop.xlane.xlu1 %3683  ;;  %v10764_v58 = vadd.f32 %v4605_v6, %v4604_v35  ;;  %v7506_v27 = vpop.eup %7505  ;;  %v4649_v55 = vsel %vm51_vm0, %v4529_v42, 0.0 }
 0x53a   :  { %v4535_v5 = vmul.f32 %v10494_v19, %v4471_v10  ;;  %7519 = vrcp.f32 %v3684_v29  ;;  %v4472_v54 = vmul.f32 %v7506_v27, %v10532_v24  ;;  %v4590_v16 = vsel %vm51_vm0, %v4533_v53, 0.0  ;;  %v10773_v20 = vpop.f32.mrf.mxu1 }
 0x53b   :  { %v7508_v22 = vpop.eup %7507  ;;  %v10777_v9 = vadd.f32 %v4590_v16, %v4589_v13  ;;  %v4694_v16 = vsel %vm51_vm0, %v4532_v0, 0.0 }
 0x53c   :  { %v4474_v41 = vmul.f32 %v7508_v22, %v10551_v8  ;;  %v3687_v59 = vpop.xlane.xlu0 %3686  ;;  %v4620_v37 = vsel %vm51_vm0, %v4535_v5, 0.0  ;;  %v4536_v34 = vmul.f32 %v10494_v19, %v4472_v54  ;;  %v4634_v8 = vsel %vm51_vm0, %v4528_v30, 0.0  ;;  %v10791_v49 = vpop.f32.mrf.mxu1 }
 0x53d   :  { %7521 = vrcp.f32 %v3687_v59  ;;  %v3693_v50 = vpop.xlane.xlu1 %3692  ;;  %v10780_v24 = vadd.f32 %v4620_v37, %v4619_v15  ;;  %v7510_v40 = vpop.eup %7509  ;;  %v4679_v30 = vsel %vm51_vm0, %v4531_v25, 0.0 }
 0x53e   :  { %v4538_v26 = vmul.f32 %v10494_v19, %v4474_v41  ;;  %7523 = vrcp.f32 %v3693_v50  ;;  %v4473_v52 = vmul.f32 %v7510_v40, %v10570_v3  ;;  %v4635_v14 = vsel %vm51_vm0, %v4536_v34, 0.0  ;;  %v10802_v53 = vpop.f32.mrf.mxu1 }
 0x53f   :  { %v7512_v36 = vpop.eup %7511  ;;  %v4636_v12 = vadd.f32 %v4635_v14, %v4634_v8 }
 0x540   :  { %v4475_v21 = vmul.f32 %v7512_v36, %v10592_v2  ;;  %v3690_v23 = vpop.xlane.xlu0 %3689  ;;  %v4665_v44 = vsel %vm51_vm0, %v4538_v26, 0.0  ;;  %v4537_v3 = vmul.f32 %v10494_v19, %v4473_v52 }
 0x541   :  { %7525 = vrcp.f32 %v3690_v23  ;;  %v3699_v7 = vpop.xlane.xlu1 %3698  ;;  %v4666_v61 = vadd.f32 %v4665_v44, %v4664_v31  ;;  %v7514_v57 = vpop.eup %7513 }
 0x542   :  { %v4539_v45 = vmul.f32 %v10494_v19, %v4475_v21  ;;  %7527 = vrcp.f32 %v3699_v7  ;;  %v4476_v2 = vmul.f32 %v7514_v57, %v10576_v32  ;;  %v4650_v35 = vsel %vm51_vm0, %v4537_v3, 0.0 }
 0x543   :  { %v7516_v10 = vpop.eup %7515  ;;  %v4651_v27 = vadd.f32 %v4650_v35, %v4649_v55  ;;  %v10809_v60 = vpop.f32.mrf.mxu1 }
 0x544   :  { %v4478_v6 = vmul.f32 %v7516_v10, %v10608_v43  ;;  %v3696_v29 = vpop.xlane.xlu0 %3695  ;;  %v4680_v5 = vsel %vm51_vm0, %v4539_v45, 0.0  ;;  %v4540_v22 = vmul.f32 %v10494_v19, %v4476_v2 }
 0x545   :  { %7529 = vrcp.f32 %v3696_v29  ;;  %v10807_v28 = vpop.xlane.xlu1 %3704  ;;  %v4681_v32 = vadd.f32 %v4680_v5, %v4679_v30  ;;  %v10821_v8 = vpop.f32.mrf.mxu1 }
 0x546   :  { %v7518_v17 = vpop.eup %7517  ;;  %v4542_v54 = vmul.f32 %v10566_v18, %v4478_v6  ;;  %v4695_v41 = vsel %vm51_vm0, %v4540_v22, 0.0  ;;  %7531 = vrcp.f32 %v10807_v28 }
 0x547   :  { %v7520_v43 = vpop.eup %7519  ;;  %v4477_v13 = vmul.f32 %v7518_v17, %v10638_v33  ;;  %v4696_v37 = vadd.f32 %v4695_v41, %v4694_v16  ;;  %v10835_v7 = vpop.f32.mrf.mxu1 }
 0x548   :  { %v4479_v59 = vmul.f32 %v7520_v43, %v10674_v11  ;;  %v3702_v15 = vpop.xlane.xlu0 %3701  ;;  %v4607_v19 = vsel %vm51_vm0, %v4542_v54, 0.0 }
 0x549   :  { %v4541_v34 = vmul.f32 %v10566_v18, %v4477_v13  ;;  %v3708_v50 = vpop.xlane.xlu1 %3707  ;;  %v10819_v40 = vadd.f32 %v4607_v19, %v10764_v58  ;;  %v10848_v29 = vpop.f32.mrf.mxu1  ;;  %7533 = vrcp.f32 %v3702_v15 }
 0x54a   :  { %v7522_v26 = vpop.eup %7521  ;;  %v4543_v33 = vmul.f32 %v10566_v18, %v4479_v59  ;;  %7535 = vrcp.f32 %v3708_v50 }
 0x54b   :  { %v7524_v36 = vpop.eup %7523  ;;  %v4480_v52 = vmul.f32 %v7522_v26, %v10661_v46  ;;  %v4592_v11 = vsel %vm51_vm0, %v4541_v34, 0.0 }
 0x54c   :  { %v4482_v42 = vmul.f32 %v7524_v36, %v10689_v39  ;;  %v3711_v14 = vpop.xlane.xlu0 %3710  ;;  %v4622_v31 = vsel %vm51_vm0, %v4543_v33, 0.0  ;;  %v10829_v25 = vadd.f32 %v4592_v11, %v10777_v9 }
 0x54d   :  { %v3717_v58 = vpop.xlane.xlu1 %3716  ;;  %v4544_v21 = vmul.f32 %v10566_v18, %v4480_v52  ;;  %v10833_v23 = vadd.f32 %v4622_v31, %v10780_v24  ;;  %7537 = vrcp.f32 %v3711_v14 }
 0x54e   :  { %v7526_v44 = vpop.eup %7525  ;;  %v4546_v46 = vmul.f32 %v10566_v18, %v4482_v42  ;;  %7539 = vrcp.f32 %v3717_v58 }
 0x54f   :  { %v7528_v3 = vpop.eup %7527  ;;  %v4481_v39 = vmul.f32 %v7526_v44, %v10707_v4  ;;  %v4637_v57 = vsel %vm51_vm0, %v4544_v21, 0.0 }
 0x550   :  { %v4484_v45 = vmul.f32 %v7528_v3, %v10718_v62  ;;  %v3714_v9 = vpop.xlane.xlu0 %3713  ;;  %v10841_v10 = vadd.f32 %v4637_v57, %v4636_v12  ;;  %v4667_v0 = vsel %vm51_vm0, %v4546_v46, 0.0 }
 0x551   :  { %v3723_v2 = vpop.xlane.xlu1 %3722  ;;  %v4545_v24 = vmul.f32 %v10566_v18, %v4481_v39  ;;  %v10845_v55 = vadd.f32 %v4667_v0, %v4666_v61  ;;  %v10858_v61 = vpop.f32.mrf.mxu1  ;;  %7541 = vrcp.f32 %v3714_v9 }
 0x552   :  { %v7530_v35 = vpop.eup %7529  ;;  %v4548_v6 = vmul.f32 %v10566_v18, %v4484_v45  ;;  %7543 = vrcp.f32 %v3723_v2 }
 0x553   :  { %v4483_v4 = vmul.f32 %v7530_v35, %v10729_v63  ;;  %v4652_v30 = vsel %vm51_vm0, %v4545_v24, 0.0  ;;  %v10863_v41 = vpop.f32.mrf.mxu1  ;;  %v7532_v21 = vpop.eup %7531 }
 0x554   :  { %v3720_v62 = vpop.xlane.xlu0 %3719  ;;  %v10852_v5 = vadd.f32 %v4652_v30, %v4651_v27  ;;  %v4697_v12 = vsel %vm51_vm0, %v4548_v6, 0.0  ;;  %v4486_v2 = vmul.f32 %v7532_v21, %v10736_v38 }
 0x555   :  { %v4547_v22 = vmul.f32 %v10566_v18, %v4483_v4  ;;  %v3729_v17 = vpop.xlane.xlu1 %3728  ;;  %v10856_v54 = vadd.f32 %v4697_v12, %v4696_v37  ;;  %v10865_v19 = vpop.f32.mrf.mxu1  ;;  %7545 = vrcp.f32 %v3720_v62 }
 0x556   :  { %7547 = vrcp.f32 %v3729_v17  ;;  %v7534_v58 = vpop.eup %7533 }
 0x557   :  { %v4682_v43 = vsel %vm51_vm0, %v4547_v22, 0.0  ;;  %v10867_v18 = vpop.f32.mrf.mxu1  ;;  %v7536_v46 = vpop.eup %7535  ;;  %v4485_v24 = vmul.f32 %v7534_v58, %v10744_v47 }
 0x558   :  { %v3726_v13 = vpop.xlane.xlu0 %3725  ;;  %v10861_v16 = vadd.f32 %v4682_v43, %v4681_v32  ;;  %v4487_v6 = vmul.f32 %v7536_v46, %v10752_v48 }
 0x559   :  { %v3732_v63 = vpop.xlane.xlu1 %3731  ;;  %7549 = vrcp.f32 %v3726_v13 }
 0x55a   :  { %7551 = vrcp.f32 %v3732_v63  ;;  %v7538_v3 = vpop.eup %7537 }
 0x55b   :  { %v10870_v37 = vpop.f32.mrf.mxu1  ;;  %v7540_v39 = vpop.eup %7539  ;;  %v4488_v4 = vmul.f32 %v7538_v3, %v10746_v51  ;;  %v7678_v51 = vld [vmem:[%s11549_s2 + $0x3] ss:$0 sm:$0xff] }
 0x55c   :  { %v3735_v59 = vpop.xlane.xlu0 %3734  ;;  %v4490_v30 = vmul.f32 %v7540_v39, %v10759_v1  ;;  %v4550_v48 = vmul.f32 %v7678_v51, %v4486_v2  ;;  %v4549_v1 = vmul.f32 %v7678_v51, %v4485_v24  ;;  %v4551_v63 = vmul.f32 %v7678_v51, %v4487_v6  ;;  %v10918_v2 = vld [vmem:[%s11549_s2 + $0x4] ss:$0 sm:$0xff] }
 0x55d   :  { %v3738_v27 = vpop.xlane.xlu1 %3737  ;;  %v10872_v36 = vpop.f32.mrf.mxu1  ;;  %7553 = vrcp.f32 %v3735_v59  ;;  %v4552_v13 = vmul.f32 %v7678_v51, %v4488_v4 }
 0x55e   :  { %7555 = vrcp.f32 %v3738_v27  ;;  %v7542_v9 = vpop.eup %7541  ;;  %v4554_v59 = vmul.f32 %v7678_v51, %v4490_v30  ;;  %v4609_v58 = vsel %vm51_vm0, %v4550_v48, 0.0  ;;  %v4594_v3 = vsel %vm51_vm0, %v4549_v1, 0.0 }
 0x55f   :  { %v7544_v35 = vpop.eup %7543  ;;  %v4489_v12 = vmul.f32 %v7542_v9, %v10773_v20 }
 0x560   :  { %v3741_v34 = vpop.xlane.xlu0 %3740  ;;  %v4492_v20 = vmul.f32 %v7544_v35, %v10791_v49  ;;  %v4669_v46 = vsel %vm51_vm0, %v4554_v59, 0.0 }
 0x561   :  { %v3753_v26 = vpop.xlane.xlu1 %3752  ;;  %7557 = vrcp.f32 %v3741_v34  ;;  %v4553_v34 = vmul.f32 %v7678_v51, %v4489_v12  ;;  %v10933_v1 = vadd.f32 %v4669_v46, %v10845_v55 }
 0x562   :  { %7559 = vrcp.f32 %v3753_v26  ;;  %v7546_v62 = vpop.eup %7545 }
 0x563   :  { %v10874_v42 = vpop.f32.mrf.mxu1  ;;  %v7548_v43 = vpop.eup %7547  ;;  %v4491_v27 = vmul.f32 %v7546_v62, %v10802_v53  ;;  %v4639_v53 = vsel %vm51_vm0, %v4552_v13, 0.0  ;;  %v4610_v62 = vadd.f32 %v4609_v58, %v10819_v40 }
 0x564   :  { %v3747_v33 = vpop.xlane.xlu0 %3746 }
 0x565   :  { %v3756_v32 = vpop.xlane.xlu1 %3755  ;;  %v10876_v15 = vpop.f32.mrf.mxu1  ;;  %7561 = vrcp.f32 %v3747_v33  ;;  %v4555_v9 = vmul.f32 %v7678_v51, %v4491_v27 }
 0x566   :  { %7563 = vrcp.f32 %v3756_v32  ;;  %v7550_v47 = vpop.eup %7549 }
 0x567   :  { %v4493_v32 = vmul.f32 %v7550_v47, %v10821_v8  ;;  %v4654_v8 = vsel %vm51_vm0, %v4553_v34, 0.0  ;;  %v4595_v47 = vadd.f32 %v4594_v3, %v10829_v25  ;;  %v4684_v25 = vsel %vm51_vm0, %v4555_v9, 0.0 }
 0x568   :  { %v3744_v52 = vpop.xlane.xlu0 %3743  ;;  %v4655_v40 = vadd.f32 %v4654_v8, %v10852_v5  ;;  %v10954_v58 = vadd.f32 %v4684_v25, %v10861_v16 }
 0x569   :  { %v3762_v11 = vpop.xlane.xlu1 %3761  ;;  %7565 = vrcp.f32 %v3744_v52  ;;  %v4494_v52 = vmul.f32 %v7548_v43, %v10809_v60  ;;  %v4557_v4 = vmul.f32 %v10918_v2, %v4493_v32 }
 0x56a   :  { %7567 = vrcp.f32 %v3762_v11 }
 0x56b   :  { %v10878_v50 = vpop.f32.mrf.mxu1  ;;  %v4558_v24 = vmul.f32 %v10918_v2, %v4494_v52  ;;  %v4596_v55 = vsel %vm51_vm0, %v4557_v4, 0.0 }
 0x56c   :  { %v3750_v31 = vpop.xlane.xlu0 %3749  ;;  %v10963_v16 = vadd.f32 %v4596_v55, %v4595_v47 }
 0x56d   :  { %v3777_v28 = vpop.xlane.xlu1 %3776  ;;  %v10882_v57 = vpop.f32.mrf.mxu1  ;;  %7569 = vrcp.f32 %v3750_v31 }
 0x56e   :  { %7571 = vrcp.f32 %v3777_v28  ;;  %v7552_v31 = vpop.eup %7551  ;;  %v4624_v28 = vsel %vm51_vm0, %v4551_v63, 0.0 }
 0x56f   :  { %v10892_v22 = vpop.f32.mrf.mxu1  ;;  %v7554_v49 = vpop.eup %7553  ;;  %v4495_v6 = vmul.f32 %v7552_v31, %v10848_v29  ;;  %v4625_v43 = vadd.f32 %v4624_v28, %v10833_v23  ;;  %v4640_v29 = vadd.f32 %v4639_v53, %v10841_v10 }
 0x570   :  { %v3759_v14 = vpop.xlane.xlu0 %3758  ;;  %v7556_v39 = vpop.eup %7555  ;;  %v4496_v12 = vmul.f32 %v7554_v49, %v10835_v7 }
 0x571   :  { %v10880_v44 = vpop.xlane.xlu1 %3782  ;;  %v10901_v26 = vpop.f32.mrf.mxu1  ;;  %7573 = vrcp.f32 %v3759_v14  ;;  %v4556_v14 = vmul.f32 %v7678_v51, %v4492_v20  ;;  %v4497_v48 = vmul.f32 %v7556_v39, %v10863_v41  ;;  %v4611_v41 = vsel %vm51_vm0, %v4558_v24, 0.0 }
 0x572   :  { %v7558_v30 = vpop.eup %7557  ;;  %v4559_v10 = vmul.f32 %v10918_v2, %v4495_v6 }
 0x573   :  { %v7560_v51 = vpop.eup %7559  ;;  %v4699_v23 = vsel %vm51_vm0, %v4556_v14, 0.0  ;;  %v4498_v34 = vmul.f32 %v7558_v30, %v10858_v61  ;;  %v4561_v52 = vmul.f32 %v10918_v2, %v4497_v48 }
 0x574   :  { %v3765_v45 = vpop.xlane.xlu0 %3764  ;;  %v7562_v13 = vpop.eup %7561  ;;  %v4502_v5 = vmul.f32 %v7560_v51, %v10870_v37  ;;  %v10951_v31 = vadd.f32 %v4699_v23, %v10856_v54  ;;  %v4612_v37 = vadd.f32 %v4611_v41, %v4610_v62  ;;  %v4626_v54 = vsel %vm51_vm0, %v4559_v10, 0.0 }
 0x575   :  { %v10884_v0 = vpop.xlane.xlu1 %3788  ;;  %7575 = vrcp.f32 %v3765_v45  ;;  %v7564_v59 = vpop.eup %7563  ;;  %v4656_v14 = vsel %vm51_vm0, %v4561_v52, 0.0  ;;  %v4627_v6 = vadd.f32 %v4626_v54, %v4625_v43 }
 0x576   :  { %v7566_v20 = vpop.eup %7565  ;;  %v4503_v53 = vmul.f32 %v7564_v59, %v10876_v15  ;;  %v4657_v48 = vadd.f32 %v4656_v14, %v4655_v40 }
 0x577   :  { %v7568_v32 = vpop.eup %7567 }
 0x578   :  { %v3771_v17 = vpop.xlane.xlu0 %3770 }
 0x579   :  { %v10894_v38 = vpop.xlane.xlu1 %3785 }
 0x57a   :  { %v7570_v49 = vpop.eup %7569 }
 0x57b   :  { %v10907_v21 = vpop.f32.mrf.mxu1  ;;  %v7572_v46 = vpop.eup %7571 }
 0x57c   :  { %v10903_v33 = vpop.xlane.xlu0 %3767  ;;  %v4510_v9 = vmul.f32 %v7572_v46, %v10907_v21 }
 0x57d   :  { %v3801_v11 = vpop.xlane.xlu1 %3800  ;;  %v10924_v45 = vpop.f32.mrf.mxu1 }
 0x57e   :  { %v7574_v39 = vpop.eup %7573  ;;  %v4574_v23 = vmul.f32 %v10624_v56, %v4510_v9  ;;  %v11027_v9 = vld [vmem:[%s11549_s2 + $0x7] ss:$0 sm:$0xff] }
 0x580   :  { %v3774_v60 = vpop.xlane.xlu0 %3773 }
 0x581   :  { %7577 = vrcp.f32 %v3774_v60  ;;  %v3807_v35 = vpop.xlane.xlu1 %3806  ;;  %v4505_v60 = vmul.f32 %v7568_v32, %v10882_v57 }
 0x582   :  { %7579 = vrcp.f32 %v10880_v44  ;;  %v7576_v62 = vpop.eup %7575 }
 0x583   :  { %7581 = vrcp.f32 %v3771_v17  ;;  %v10936_v63 = vpop.f32.mrf.mxu1  ;;  %v4560_v17 = vmul.f32 %v10918_v2, %v4496_v12  ;;  %v4504_v12 = vmul.f32 %v7574_v39, %v10874_v42  ;;  %v4506_v10 = vmul.f32 %v7576_v62, %v10878_v50 }
 0x584   :  { %v3780_v7 = vpop.xlane.xlu0 %3779 }
 0x585   :  { %7583 = vrcp.f32 %v3780_v7  ;;  %v3813_v44 = vpop.xlane.xlu1 %3812  ;;  %v10946_v27 = vpop.f32.mrf.mxu1 }
 0x586   :  { %7585 = vrcp.f32 %v10894_v38  ;;  %v4500_v38 = vmul.f32 %v7562_v13, %v10865_v19  ;;  %v10969_v19 = vld [vmem:[%s11549_s2 + $0x5] ss:$0 sm:$0xff] }
 0x587   :  { %7587 = vrcp.f32 %v3801_v11  ;;  %v10959_v28 = vpop.f32.mrf.mxu1  ;;  %v4499_v11 = vmul.f32 %v7566_v20, %v10867_v18  ;;  %v4566_v15 = vmul.f32 %v10969_v19, %v4502_v5  ;;  %v4562_v18 = vmul.f32 %v10918_v2, %v4498_v34 }
 0x588   :  { %7589 = vrcp.f32 %v10903_v33  ;;  %v3798_v61 = vpop.xlane.xlu0 %3797  ;;  %v4641_v33 = vsel %vm51_vm0, %v4560_v17, 0.0  ;;  %v4567_v24 = vmul.f32 %v10969_v19, %v4503_v53  ;;  %v4564_v30 = vmul.f32 %v10918_v2, %v4500_v38 }
 0x589   :  { %7591 = vrcp.f32 %v3798_v61  ;;  %v3810_v3 = vpop.xlane.xlu1 %3809  ;;  %v10974_v8 = vpop.f32.mrf.mxu1  ;;  %v10983_v47 = vadd.f32 %v4641_v33, %v4640_v29  ;;  %v4563_v51 = vmul.f32 %v10918_v2, %v4499_v11  ;;  %v4671_v21 = vsel %vm51_vm0, %v4562_v18, 0.0 }
 0x58a   :  { %7593 = vrcp.f32 %v10884_v0  ;;  %v4501_v0 = vmul.f32 %v7570_v49, %v10872_v36  ;;  %v4613_v36 = vsel %vm51_vm0, %v4566_v15, 0.0  ;;  %v4569_v43 = vmul.f32 %v10969_v19, %v4505_v60 }
 0x58b   :  { %7595 = vrcp.f32 %v3807_v35  ;;  %v10988_v13 = vpop.f32.mrf.mxu1  ;;  %v4628_v2 = vsel %vm51_vm0, %v4567_v24, 0.0  ;;  %v4701_v25 = vsel %vm51_vm0, %v4564_v30, 0.0  ;;  %v4568_v41 = vmul.f32 %v10969_v19, %v4504_v12 }
 0x58c   :  { %v3804_v4 = vpop.xlane.xlu0 %3803  ;;  %v4565_v29 = vmul.f32 %v10969_v19, %v4501_v0  ;;  %v4614_v20 = vadd.f32 %v4613_v36, %v4612_v37  ;;  %v11001_v17 = vadd.f32 %v4671_v21, %v10933_v1  ;;  %v4658_v52 = vsel %vm51_vm0, %v4569_v43, 0.0  ;;  %v7682_v43 = vld [vmem:[%s11549_s2 + $0x6] ss:$0 sm:$0xff] }
 0x58d   :  { %7597 = vrcp.f32 %v3804_v4  ;;  %v3795_v57 = vpop.xlane.xlu1 %3794  ;;  %v11003_v34 = vpop.f32.mrf.mxu1  ;;  %v4615_v37 = vsel %vm51_vm0, %v4574_v23, 0.0  ;;  %v4629_v61 = vadd.f32 %v4628_v2, %v4627_v6  ;;  %v11011_v1 = vadd.f32 %v4701_v25, %v10951_v31 }
 0x58e   :  { %v7578_v35 = vpop.eup %7577  ;;  %7599 = vrcp.f32 %v3795_v57  ;;  %v4598_v38 = vsel %vm51_vm0, %v4565_v29, 0.0  ;;  %v11018_v33 = vadd.f32 %v4658_v52, %v4657_v48  ;;  %v4616_v62 = vadd.f32 %v4615_v37, %v4614_v20 }
 0x58f   :  { %7601 = vrcp.f32 %v3813_v44  ;;  %v4509_v42 = vmul.f32 %v7578_v35, %v10924_v45  ;;  %v7580_v7 = vpop.eup %7579  ;;  %v4686_v45 = vsel %vm51_vm0, %v4563_v51, 0.0  ;;  %v4599_v31 = vadd.f32 %v4598_v38, %v10963_v16 }
 0x590   :  { %7603 = vrcp.f32 %v3810_v3  ;;  %v3792_v40 = vpop.xlane.xlu0 %3791  ;;  %v7582_v59 = vpop.eup %7581  ;;  %v4512_v5 = vmul.f32 %v7580_v7, %v10936_v63  ;;  %v11014_v11 = vadd.f32 %v4686_v45, %v10954_v58  ;;  %v4643_v3 = vsel %vm51_vm0, %v4568_v41, 0.0 }
 0x591   :  { %7605 = vrcp.f32 %v3792_v40  ;;  %v3819_v44 = vpop.xlane.xlu1 %3818  ;;  %v4573_v50 = vmul.f32 %v10624_v56, %v4509_v42  ;;  %v4508_v57 = vmul.f32 %v7582_v59, %v10892_v22 }
 0x592   :  { %v7584_v55 = vpop.eup %7583  ;;  %7607 = vrcp.f32 %v3819_v44  ;;  %v4576_v18 = vmul.f32 %v10624_v56, %v4512_v5 }
 0x593   :  { %v7586_v32 = vpop.eup %7585  ;;  %v4511_v49 = vmul.f32 %v7584_v55, %v10946_v27  ;;  %v6921_v63 = vpop.f32.mrf.mxu1  ;;  %v4570_v27 = vmul.f32 %v10969_v19, %v4506_v10  ;;  %v4600_v4 = vsel %vm51_vm0, %v4573_v50, 0.0  ;;  %v4572_v44 = vmul.f32 %v10969_v19, %v4508_v57 }
 0x594   :  { %v7588_v53 = vpop.eup %7587  ;;  %v3816_v46 = vpop.xlane.xlu0 %3815  ;;  %v4513_v60 = vmul.f32 %v7586_v32, %v10974_v8  ;;  %v4644_v8 = vadd.f32 %v4643_v3, %v10983_v47  ;;  %v4645_v21 = vsel %vm51_vm0, %v4576_v18, 0.0  ;;  %v4601_v42 = vadd.f32 %v4600_v4, %v4599_v31 }
 0x595   :  { %v7590_v54 = vpop.eup %7589  ;;  %v4518_v39 = vmul.f32 %v7588_v53, %v6921_v63  ;;  %7609 = vrcp.f32 %v3816_v46  ;;  %v4422_v14 = vpop.f32.mrf.mxu1  ;;  %v4575_v58 = vmul.f32 %v10624_v56, %v4511_v49  ;;  %v4673_v56 = vsel %vm51_vm0, %v4570_v27, 0.0 }
 0x596   :  { %v7592_v15 = vpop.eup %7591  ;;  %v4507_v48 = vmul.f32 %v7590_v54, %v10901_v26  ;;  %v4577_v47 = vmul.f32 %v7682_v43, %v4513_v60  ;;  %v4646_v49 = vadd.f32 %v4645_v21, %v4644_v8  ;;  %v4674_v3 = vadd.f32 %v4673_v56, %v11001_v17 }
 0x597   :  { %v7594_v0 = vpop.eup %7593  ;;  %v4582_v24 = vmul.f32 %v11027_v9, %v4518_v39  ;;  %v4517_v6 = vmul.f32 %v7592_v15, %v4422_v14  ;;  %v6924_v16 = vpop.f32.mrf.mxu1  ;;  %v4630_v7 = vsel %vm51_vm0, %v4575_v58, 0.0 }
 0x598   :  { %v7596_v30 = vpop.eup %7595  ;;  %v4514_v12 = vmul.f32 %v7594_v0, %v10959_v28  ;;  %v4571_v32 = vmul.f32 %v10969_v19, %v4507_v48  ;;  %v4631_v50 = vadd.f32 %v4630_v7, %v4629_v61  ;;  %v4660_v38 = vsel %vm51_vm0, %v4577_v47, 0.0 }
 0x599   :  { %v4581_v51 = vmul.f32 %v11027_v9, %v4517_v6  ;;  %v4520_v35 = vmul.f32 %v7596_v30, %v6924_v16  ;;  %v4617_v28 = vsel %vm51_vm0, %v4582_v24, 0.0  ;;  %v4432_v29 = vpop.f32.mrf.mxu1  ;;  %v4661_v58 = vadd.f32 %v4660_v38, %v11018_v33 }
 0x59a   :  { %v7598_v36 = vpop.eup %7597  ;;  %v4578_v25 = vmul.f32 %v7682_v43, %v4514_v12  ;;  %v4618_v55 = vadd.f32 %v4617_v28, %v4616_v62  ;;  %v4688_v31 = vsel %vm51_vm0, %v4571_v32, 0.0 }
 0x59b   :  { %v7600_v22 = vpop.eup %7599  ;;  %v4602_v23 = vsel %vm51_vm0, %v4581_v51, 0.0  ;;  %v4584_v2 = vmul.f32 %v11027_v9, %v4520_v35  ;;  %v4519_v26 = vmul.f32 %v7598_v36, %v4432_v29  ;;  %v6927_v41 = vpop.f32.mrf.mxu1  ;;  %v4689_v33 = vadd.f32 %v4688_v31, %v11014_v11  ;;  %v7683_v29 = vld [vmem:[%s11545_s0 + $0x8] sm:$0xff] }
 0x59c   :  { %v7602_v40 = vpop.eup %7601  ;;  %v4603_v59 = vadd.f32 %v4602_v23, %v4601_v42  ;;  %v4516_v10 = vmul.f32 %v7600_v22, %v10988_v13  ;;  %v4675_v61 = vsel %vm51_vm0, %v4578_v25, 0.0 }
 0x59d   :  { %v7604_v45 = vpop.eup %7603  ;;  %v4583_v20 = vmul.f32 %v11027_v9, %v4519_v26  ;;  %v4522_v5 = vmul.f32 %v7602_v40, %v6927_v41  ;;  %v4647_v53 = vsel %vm51_vm0, %v4584_v2, 0.0  ;;  %v4442_v37 = vpop.f32.mrf.mxu1  ;;  %v4676_v4 = vadd.f32 %v4675_v61, %v4674_v3  ;;  %v7684_v2 = vld [vmem:[%s11545_s0] sm:$0xff]  ;;  %v7685_v41 = vld [vmem:[%s11545_s0 + $0x18] sm:$0xff] }
 0x59e   :  { %v7606_v52 = vpop.eup %7605  ;;  %6951 = vmatprep.mubr.msk.f32.mxu0 %vm51_vm0, %v4603_v59  ;;  %v4521_v54 = vmul.f32 %v7604_v45, %v4442_v37  ;;  %v4580_v15 = vmul.f32 %v7682_v43, %v4516_v10  ;;  %v4648_v18 = vadd.f32 %v4647_v53, %v4646_v49  ;;  %v7689_v61 = vld [vmem:[%s11545_s0 + $0x38] sm:$0xff] }
 0x59f   :  { %v7608_v13 = vpop.eup %7607  ;;  %v4632_v63 = vsel %vm51_vm0, %v4583_v20, 0.0  ;;  %v4586_v46 = vmul.f32 %v11027_v9, %v4522_v5  ;;  %6952 = vmatmul.mubr.msk.f32.gmra.mxu0 %vm51_vm0, %v4618_v55  ;;  %v4515_v19 = vmul.f32 %v7606_v52, %v11003_v34  ;;  %v6930_v39 = vpop.f32.mrf.mxu1  ;;  %v4703_v34 = vsel %vm51_vm0, %v4572_v44, 0.0  ;;  %v7686_v20 = vld [vmem:[%s11545_s0 + $0x10] sm:$0xff] }
 0x5a0   :  { %v4633_v27 = vadd.f32 %v4632_v63, %v4631_v50  ;;  %v4585_v60 = vmul.f32 %v11027_v9, %v4521_v54  ;;  %v4524_v14 = vmul.f32 %v7608_v13, %v6930_v39  ;;  %v4705_v16 = vsel %vm51_vm0, %v4580_v15, 0.0  ;;  %v7687_v50 = vld [vmem:[%s11545_s0 + $0x28] sm:$0xff]  ;;  %v7688_v63 = vld [vmem:[%s11545_s0 + $0x20] sm:$0xff] }
 0x5a1   :  { %v4677_v24 = vsel %vm51_vm0, %v4586_v46, 0.0  ;;  %v4452_v6 = vpop.f32.mrf.mxu1  ;;  %v4579_v17 = vmul.f32 %v7682_v43, %v4515_v19  ;;  %v4704_v51 = vadd.f32 %v4703_v34, %v11011_v1  ;;  %v11081_v1 = vld [vmem:[%s11547_s4 + $0x4] ss:$0 sm:$0xff]  ;;  %v7691_v34 = vld [vmem:[%s11545_s0 + $0x48] sm:$0xff] }
 0x5a2   :  { %v7610_v0 = vpop.eup %7609  ;;  %6954 = vmatprep.mubr.msk.f32.mxu0 %vm51_vm0, %v4633_v27  ;;  %v4662_v30 = vsel %vm51_vm0, %v4585_v60, 0.0  ;;  %v4588_v62 = vmul.f32 %v11027_v9, %v4524_v14  ;;  %v4678_v56 = vadd.f32 %v4677_v24, %v4676_v4 }
 0x5a3   :  { %v4523_v8 = vmul.f32 %v7610_v0, %v4452_v6  ;;  %6955 = vmatmul.mubr.msk.f32.gmra.mxu0 %vm51_vm0, %v4648_v18  ;;  %v4663_v12 = vadd.f32 %v4662_v30, %v4661_v58  ;;  %v4690_v57 = vsel %vm51_vm0, %v4579_v17, 0.0  ;;  %v4706_v21 = vadd.f32 %v4705_v16, %v4704_v51  ;;  %v7690_v18 = vld [vmem:[%s11545_s0 + $0x30] sm:$0xff]  ;;  %v7692_v30 = vld [vmem:[%s11545_s0 + $0x40] sm:$0xff] }
 0x5a4   :  { %v4707_v48 = vsel %vm51_vm0, %v4588_v62, 0.0  ;;  %v4691_v36 = vadd.f32 %v4690_v57, %v4689_v33  ;;  %v7693_v33 = vld [vmem:[%s11545_s0 + $0x58] sm:$0xff] }
 0x5a5   :  { %v4587_v35 = vmul.f32 %v11027_v9, %v4523_v8  ;;  %6957 = vmatprep.mubr.msk.f32.mxu0 %vm51_vm0, %v4663_v12  ;;  %v4708_v28 = vadd.f32 %v4707_v48, %v4706_v21  ;;  %v7694_v48 = vld [vmem:[%s11545_s0 + $0x50] sm:$0xff] }
 0x5a7   :  { %v4692_v43 = vsel %vm51_vm0, %v4587_v35, 0.0  ;;  %6958 = vmatmul.mubr.msk.f32.gmra.mxu0 %vm51_vm0, %v4678_v56 }
 0x5a8   :  { %v4693_v47 = vadd.f32 %v4692_v43, %v4691_v36 }
 0x5aa   :  { %6960 = vmatprep.mubr.msk.f32.mxu0 %vm51_vm0, %v4693_v47 }
 0x5ab   :  { %6961 = vmatmul.mubr.msk.f32.gmra.mxu0 %vm51_vm0, %v4708_v28  ;;  %v7695_v28 = vld [vmem:[%s11545_s0 + $0x68] sm:$0xff] }
 0x5e1   :  { %v6941_v11 = vpop.f32.mrf.mxu0 }
 0x5e2   :  { %v4838_v9 = vadd.f32 %v6941_v11, %v11081_v1 }
 0x5e3   :  { %v4832_v42 = vpop.f32.mrf.mxu0 }
 0x5e4   :  { %v11087_v22 = vadd.f32 %v7683_v29, %v4838_v9  ;;  %v4833_v7 = vadd.f32 %v11081_v1, %v4832_v42 }
 0x5e5   :  { %v6944_v23 = vpop.f32.mrf.mxu0 }
 0x5e6   :  { %v11093_v26 = vadd.f32 %v7684_v2, %v4833_v7  ;;  %v4848_v40 = vadd.f32 %v6944_v23, %v11081_v1  ;;  %v4930_v25 = vsel %vm51_vm0, %v11087_v22, 0.0  ;;  %v7696_v7 = vld [vmem:[%s11545_s0 + $0x60] sm:$0xff] }
 0x5e7   :  { %4931 = vadd.xlane.f32.xlu1 %v4930_v25  ;;  %v4842_v59 = vpop.f32.mrf.mxu0 }
 0x5e8   :  { %v11101_v10 = vadd.f32 %v7685_v41, %v4848_v40  ;;  %v4843_v44 = vadd.f32 %v11081_v1, %v4842_v59  ;;  %v4927_v45 = vsel %vm51_vm0, %v11093_v26, 0.0  ;;  %v7697_v59 = vld [vmem:[%s11545_s0 + $0x78] sm:$0xff] }
 0x5e9   :  { %4928 = vadd.xlane.f32.xlu0 %v4927_v45  ;;  %v6947_v55 = vpop.f32.mrf.mxu0 }
 0x5ea   :  { %v11109_v5 = vadd.f32 %v7686_v20, %v4843_v44  ;;  %v4858_v32 = vadd.f32 %v6947_v55, %v11081_v1  ;;  %v4936_v52 = vsel %vm51_vm0, %v11101_v10, 0.0  ;;  %v7698_v55 = vld [vmem:[%s11545_s0 + $0x70] sm:$0xff] }
 0x5eb   :  { %4937 = vadd.xlane.f32.xlu1 %v4936_v52  ;;  %v4852_v49 = vpop.f32.mrf.mxu0 }
 0x5ec   :  { %v11117_v38 = vadd.f32 %v7687_v50, %v4858_v32  ;;  %v4853_v53 = vadd.f32 %v11081_v1, %v4852_v49  ;;  %v4933_v37 = vsel %vm51_vm0, %v11109_v5, 0.0 }
 0x5ed   :  { %4934 = vadd.xlane.f32.xlu0 %v4933_v37  ;;  %v6950_v13 = vpop.f32.mrf.mxu0 }
 0x5ee   :  { %v11125_v46 = vadd.f32 %v7688_v63, %v4853_v53  ;;  %v4868_v54 = vadd.f32 %v6950_v13, %v11081_v1  ;;  %v4942_v19 = vsel %vm51_vm0, %v11117_v38, 0.0 }
 0x5ef   :  { %4943 = vadd.xlane.f32.xlu1 %v4942_v19  ;;  %v4862_v3 = vpop.f32.mrf.mxu0 }
 0x5f0   :  { %v11133_v27 = vadd.f32 %v7689_v61, %v4868_v54  ;;  %v4863_v39 = vadd.f32 %v11081_v1, %v4862_v3  ;;  %v4939_v15 = vsel %vm51_vm0, %v11125_v46, 0.0 }
 0x5f1   :  { %4940 = vadd.xlane.f32.xlu0 %v4939_v15 }
 0x5f2   :  { %v11141_v60 = vadd.f32 %v7690_v18, %v4863_v39  ;;  %v4948_v14 = vsel %vm51_vm0, %v11133_v27, 0.0 }
 0x5f3   :  { %4949 = vadd.xlane.f32.xlu1 %v4948_v14 }
 0x5f4   :  { %v4945_v31 = vsel %vm51_vm0, %v11141_v60, 0.0 }
 0x5f5   :  { %4946 = vadd.xlane.f32.xlu0 %v4945_v31 }
 0x65f   :  { %v6953_v0 = vpop.f32.mrf.mxu0 }
 0x660   :  { %v4878_v58 = vadd.f32 %v6953_v0, %v11081_v1 }
 0x661   :  { %v4872_v24 = vpop.f32.mrf.mxu0 }
 0x662   :  { %v11151_v6 = vadd.f32 %v7691_v34, %v4878_v58  ;;  %v4873_v17 = vadd.f32 %v11081_v1, %v4872_v24 }
 0x663   :  { %v6956_v4 = vpop.f32.mrf.mxu0 }
 0x664   :  { %v11157_v62 = vadd.f32 %v7692_v30, %v4873_v17  ;;  %v4888_v8 = vadd.f32 %v6956_v4, %v11081_v1  ;;  %v4954_v12 = vsel %vm51_vm0, %v11151_v6, 0.0 }
 0x665   :  { %4955 = vadd.xlane.f32.xlu1 %v4954_v12  ;;  %v4882_v16 = vpop.f32.mrf.mxu0 }
 0x666   :  { %v11165_v57 = vadd.f32 %v7693_v33, %v4888_v8  ;;  %v4883_v56 = vadd.f32 %v11081_v1, %v4882_v16  ;;  %v4951_v51 = vsel %vm51_vm0, %v11157_v62, 0.0 }
 0x667   :  { %4952 = vadd.xlane.f32.xlu0 %v4951_v51  ;;  %v6959_v35 = vpop.f32.mrf.mxu0 }
 0x668   :  { %v11173_v36 = vadd.f32 %v7694_v48, %v4883_v56  ;;  %v4898_v21 = vadd.f32 %v6959_v35, %v11081_v1  ;;  %v4960_v43 = vsel %vm51_vm0, %v11165_v57, 0.0 }
 0x669   :  { %4961 = vadd.xlane.f32.xlu1 %v4960_v43  ;;  %v4892_v47 = vpop.f32.mrf.mxu0 }
 0x66a   :  { %v11181_v11 = vadd.f32 %v7695_v28, %v4898_v21  ;;  %v4893_v9 = vadd.f32 %v11081_v1, %v4892_v47  ;;  %v4957_v42 = vsel %vm51_vm0, %v11173_v36, 0.0 }
 0x66b   :  { %4958 = vadd.xlane.f32.xlu0 %v4957_v42  ;;  %v6962_v29 = vpop.f32.mrf.mxu0 }
 0x66c   :  { %v11189_v23 = vadd.f32 %v7696_v7, %v4893_v9  ;;  %v4908_v2 = vadd.f32 %v6962_v29, %v11081_v1  ;;  %v4966_v40 = vsel %vm51_vm0, %v11181_v11, 0.0 }
 0x66d   :  { %4967 = vadd.xlane.f32.xlu1 %v4966_v40  ;;  %v4902_v25 = vpop.f32.mrf.mxu0  ;;  %v5178_v40 = vld [vmem:[%s11550_s5 + $0x18] sm:$0xff] }
 0x66e   :  { %v11197_v41 = vadd.f32 %v7697_v59, %v4908_v2  ;;  %v4903_v44 = vadd.f32 %v11081_v1, %v4902_v25  ;;  %v4963_v45 = vsel %vm51_vm0, %v11189_v23, 0.0  ;;  %6963 = vmatprep.subr.mxu1 %v5178_v40  ;;  %v5177_v25 = vld [vmem:[%s11550_s5 + $0x10] sm:$0xff]  ;;  %v5176_v59 = vld [vmem:[%s11550_s5 + $0x8] sm:$0xff] }
 0x66f   :  { %4964 = vadd.xlane.f32.xlu0 %v4963_v45  ;;  %6964 = vmatpush3.msra.mxu1 %v5178_v40 }
 0x670   :  { %v11205_v20 = vadd.f32 %v7698_v55, %v4903_v44  ;;  %v4932_v32 = vpop.xlane.xlu1 %4931  ;;  %v4972_v52 = vsel %vm51_vm0, %v11197_v41, 0.0  ;;  %6965 = vmatprep.subr.mxu1 %v5177_v25  ;;  %v5175_v44 = vld [vmem:[%s11550_s5] sm:$0xff] }
 0x671   :  { %v4976_v49 = vmul.f32 0.03125, %v4932_v32  ;;  %4973 = vadd.xlane.f32.xlu1 %v4972_v52  ;;  %6966 = vmatpush3.msra.mxu1 %v5177_v25 }
 0x672   :  { %v4929_v50 = vpop.xlane.xlu0 %4928  ;;  %v4969_v1 = vsel %vm51_vm0, %v11205_v20, 0.0  ;;  %6967 = vmatprep.subr.mxu1 %v5176_v59 }
 0x673   :  { %v11212_v53 = vsub.f32 %v11087_v22, %v4976_v49  ;;  %v4975_v37 = vmul.f32 0.03125, %v4929_v50  ;;  %4970 = vadd.xlane.f32.xlu0 %v4969_v1  ;;  %6968 = vmatpush3.msra.mxu1 %v5176_v59 }
 0x674   :  { %v4938_v13 = vpop.xlane.xlu1 %4937  ;;  %6969 = vmatprep.subr.mxu1 %v5175_v44 }
 0x675   :  { %v11215_v63 = vsub.f32 %v11093_v26, %v4975_v37  ;;  %v4978_v54 = vmul.f32 0.03125, %v4938_v13  ;;  %v5008_v19 = vmul.f32 %v11212_v53, %v11212_v53  ;;  %6970 = vmatpush3.msra.mxu1 %v5175_v44 }
 0x676   :  { %v4935_v3 = vpop.xlane.xlu0 %4934 }
 0x677   :  { %v11220_v61 = vsub.f32 %v11101_v10, %v4978_v54  ;;  %v4977_v39 = vmul.f32 0.03125, %v4935_v3  ;;  %v5026_v15 = vsel %vm51_vm0, %v5008_v19, 0.0  ;;  %v5007_v18 = vmul.f32 %v11215_v63, %v11215_v63 }
 0x678   :  { %v4944_v14 = vpop.xlane.xlu1 %4943  ;;  %5027 = vadd.xlane.f32.xlu1 %v5026_v15 }
 0x679   :  { %v11226_v31 = vsub.f32 %v11109_v5, %v4977_v39  ;;  %v4980_v0 = vmul.f32 0.03125, %v4944_v14  ;;  %v5023_v58 = vsel %vm51_vm0, %v5007_v18, 0.0  ;;  %v5010_v24 = vmul.f32 %v11220_v61, %v11220_v61 }
 0x67a   :  { %5024 = vadd.xlane.f32.xlu0 %v5023_v58  ;;  %v4941_v34 = vpop.xlane.xlu0 %4940 }
 0x67b   :  { %v11232_v17 = vsub.f32 %v11117_v38, %v4980_v0  ;;  %v4979_v4 = vmul.f32 0.03125, %v4941_v34  ;;  %v5032_v30 = vsel %vm51_vm0, %v5010_v24, 0.0  ;;  %v5009_v8 = vmul.f32 %v11226_v31, %v11226_v31 }
 0x67c   :  { %v4950_v12 = vpop.xlane.xlu1 %4949  ;;  %5033 = vadd.xlane.f32.xlu1 %v5032_v30 }
 0x67d   :  { %v11238_v16 = vsub.f32 %v11125_v46, %v4979_v4  ;;  %v4982_v33 = vmul.f32 0.03125, %v4950_v12  ;;  %v5029_v56 = vsel %vm51_vm0, %v5009_v8, 0.0  ;;  %v5012_v51 = vmul.f32 %v11232_v17, %v11232_v17 }
 0x67e   :  { %5030 = vadd.xlane.f32.xlu0 %v5029_v56  ;;  %v4947_v35 = vpop.xlane.xlu0 %4946 }
 0x67f   :  { %v11244_v48 = vsub.f32 %v11133_v27, %v4982_v33  ;;  %v4981_v21 = vmul.f32 0.03125, %v4947_v35  ;;  %v5038_v43 = vsel %vm51_vm0, %v5012_v51, 0.0  ;;  %v5011_v47 = vmul.f32 %v11238_v16, %v11238_v16 }
 0x680   :  { %5039 = vadd.xlane.f32.xlu1 %v5038_v43 }
 0x681   :  { %v11250_v28 = vsub.f32 %v11141_v60, %v4981_v21  ;;  %v5035_v9 = vsel %vm51_vm0, %v5011_v47, 0.0  ;;  %v5014_v42 = vmul.f32 %v11244_v48, %v11244_v48 }
 0x682   :  { %5036 = vadd.xlane.f32.xlu0 %v5035_v9 }
 0x683   :  { %v5044_v29 = vsel %vm51_vm0, %v5014_v42, 0.0  ;;  %v5013_v7 = vmul.f32 %v11250_v28, %v11250_v28 }
 0x684   :  { %5045 = vadd.xlane.f32.xlu1 %v5044_v29 }
 0x685   :  { %v5041_v2 = vsel %vm51_vm0, %v5013_v7, 0.0 }
 0x686   :  { %5042 = vadd.xlane.f32.xlu0 %v5041_v2 }
 0x6ee   :  { %v4956_v45 = vpop.xlane.xlu1 %4955 }
 0x6ef   :  { %v4984_v55 = vmul.f32 0.03125, %v4956_v45 }
 0x6f0   :  { %v4953_v32 = vpop.xlane.xlu0 %4952 }
 0x6f1   :  { %v11272_v52 = vsub.f32 %v11151_v6, %v4984_v55  ;;  %v4983_v49 = vmul.f32 0.03125, %v4953_v32 }
 0x6f2   :  { %v4962_v50 = vpop.xlane.xlu1 %4961 }
 0x6f3   :  { %v11275_v1 = vsub.f32 %v11157_v62, %v4983_v49  ;;  %v4986_v37 = vmul.f32 0.03125, %v4962_v50  ;;  %v5016_v13 = vmul.f32 %v11272_v52, %v11272_v52 }
 0x6f4   :  { %v4959_v54 = vpop.xlane.xlu0 %4958 }
 0x6f5   :  { %v11280_v19 = vsub.f32 %v11165_v57, %v4986_v37  ;;  %v4985_v3 = vmul.f32 0.03125, %v4959_v54  ;;  %v5050_v39 = vsel %vm51_vm0, %v5016_v13, 0.0  ;;  %v5015_v15 = vmul.f32 %v11275_v1, %v11275_v1 }
 0x6f6   :  { %v4968_v18 = vpop.xlane.xlu1 %4967  ;;  %5051 = vadd.xlane.f32.xlu1 %v5050_v39 }
 0x6f7   :  { %v11286_v14 = vsub.f32 %v11173_v36, %v4985_v3  ;;  %v4988_v0 = vmul.f32 0.03125, %v4968_v18  ;;  %v5047_v58 = vsel %vm51_vm0, %v5015_v15, 0.0  ;;  %v5018_v24 = vmul.f32 %v11280_v19, %v11280_v19 }
 0x6f8   :  { %5048 = vadd.xlane.f32.xlu0 %v5047_v58  ;;  %v4965_v34 = vpop.xlane.xlu0 %4964 }
 0x6f9   :  { %v11292_v4 = vsub.f32 %v11181_v11, %v4988_v0  ;;  %v4987_v30 = vmul.f32 0.03125, %v4965_v34  ;;  %v5056_v8 = vsel %vm51_vm0, %v5018_v24, 0.0  ;;  %v5017_v12 = vmul.f32 %v11286_v14, %v11286_v14 }
 0x6fa   :  { %5057 = vadd.xlane.f32.xlu1 %v5056_v8  ;;  %v4974_v33 = vpop.xlane.xlu1 %4973 }
 0x6fb   :  { %v11298_v56 = vsub.f32 %v11189_v23, %v4987_v30  ;;  %v4990_v51 = vmul.f32 0.03125, %v4974_v33  ;;  %v5053_v35 = vsel %vm51_vm0, %v5017_v12, 0.0  ;;  %v5020_v21 = vmul.f32 %v11292_v4, %v11292_v4 }
 0x6fc   :  { %5054 = vadd.xlane.f32.xlu0 %v5053_v35  ;;  %v4971_v43 = vpop.xlane.xlu0 %4970 }
 0x6fd   :  { %v11304_v47 = vsub.f32 %v11197_v41, %v4990_v51  ;;  %v4989_v9 = vmul.f32 0.03125, %v4971_v43  ;;  %v5062_v42 = vsel %vm51_vm0, %v5020_v21, 0.0  ;;  %v5019_v29 = vmul.f32 %v11298_v56, %v11298_v56 }
 0x6fe   :  { %5063 = vadd.xlane.f32.xlu1 %v5062_v42  ;;  %v11322_v42 = vld [vmem:[%s11547_s4 + $0x2] ss:$0 sm:$0xff] }
 0x6ff   :  { %v11310_v7 = vsub.f32 %v11205_v20, %v4989_v9  ;;  %v5059_v2 = vsel %vm51_vm0, %v5019_v29, 0.0  ;;  %v5022_v40 = vmul.f32 %v11304_v47, %v11304_v47 }
 0x700   :  { %5060 = vadd.xlane.f32.xlu0 %v5059_v2 }
 0x701   :  { %v5028_v25 = vpop.xlane.xlu1 %5027  ;;  %v5068_v59 = vsel %vm51_vm0, %v5022_v40, 0.0  ;;  %v5021_v44 = vmul.f32 %v11310_v7, %v11310_v7 }
 0x702   :  { %v5072_v45 = vmul.f32 0.03125, %v5028_v25  ;;  %5069 = vadd.xlane.f32.xlu1 %v5068_v59 }
 0x703   :  { %v5025_v55 = vpop.xlane.xlu0 %5024  ;;  %v5065_v32 = vsel %vm51_vm0, %v5021_v44, 0.0  ;;  %v11330_v44 = vld [vmem:[%s11547_s4 + $0x3] ss:$0 sm:$0xff] }
 0x704   :  { %v5088_v49 = vadd.f32 1e-05, %v5072_v45  ;;  %v5071_v50 = vmul.f32 0.03125, %v5025_v55  ;;  %5066 = vadd.xlane.f32.xlu0 %v5065_v32 }
 0x705   :  { %v5034_v37 = vpop.xlane.xlu1 %5033 }
 0x706   :  { %7611 = vrsqrt.f32 %v5088_v49  ;;  %v5087_v13 = vadd.f32 1e-05, %v5071_v50  ;;  %v5074_v54 = vmul.f32 0.03125, %v5034_v37 }
 0x707   :  { %v5031_v3 = vpop.xlane.xlu0 %5030 }
 0x708   :  { %7613 = vrsqrt.f32 %v5087_v13  ;;  %v5090_v39 = vadd.f32 1e-05, %v5074_v54  ;;  %v5073_v15 = vmul.f32 0.03125, %v5031_v3 }
 0x709   :  { %v5040_v18 = vpop.xlane.xlu1 %5039 }
 0x70a   :  { %7615 = vrsqrt.f32 %v5090_v39  ;;  %v5089_v0 = vadd.f32 1e-05, %v5073_v15  ;;  %v5076_v58 = vmul.f32 0.03125, %v5040_v18 }
 0x70b   :  { %v5037_v24 = vpop.xlane.xlu0 %5036 }
 0x70c   :  { %7617 = vrsqrt.f32 %v5089_v0  ;;  %v5092_v34 = vadd.f32 1e-05, %v5076_v58  ;;  %v5075_v30 = vmul.f32 0.03125, %v5037_v24 }
 0x70d   :  { %v5046_v8 = vpop.xlane.xlu1 %5045 }
 0x70e   :  { %7619 = vrsqrt.f32 %v5092_v34  ;;  %v5091_v12 = vadd.f32 1e-05, %v5075_v30  ;;  %v5078_v33 = vmul.f32 0.03125, %v5046_v8 }
 0x70f   :  { %v5043_v51 = vpop.xlane.xlu0 %5042 }
 0x710   :  { %7621 = vrsqrt.f32 %v5091_v12  ;;  %v5094_v35 = vadd.f32 1e-05, %v5078_v33  ;;  %v5077_v21 = vmul.f32 0.03125, %v5043_v51  ;;  %v5473_v33 = vld [vmem:[%s11551_s7 + $0x70] sm:$0xff]  ;;  %v5472_v51 = vld [vmem:[%s11551_s7 + $0x68] sm:$0xff] }
 0x712   :  { %7623 = vrsqrt.f32 %v5094_v35  ;;  %v5093_v43 = vadd.f32 1e-05, %v5077_v21  ;;  %v5471_v35 = vld [vmem:[%s11551_s7 + $0x60] sm:$0xff]  ;;  %v5470_v21 = vld [vmem:[%s11551_s7 + $0x58] sm:$0xff] }
 0x713   :  { %v7612_v9 = vpop.eup %7611 }
 0x714   :  { %v5120_v29 = vmul.f32 %v7612_v9, %v11212_v53  ;;  %7625 = vrsqrt.f32 %v5093_v43  ;;  %v5469_v43 = vld [vmem:[%s11551_s7 + $0x50] sm:$0xff]  ;;  %v5468_v9 = vld [vmem:[%s11551_s7 + $0x48] sm:$0xff] }
 0x715   :  { %v7614_v2 = vpop.eup %7613 }
 0x716   :  { %v5119_v40 = vmul.f32 %v7614_v2, %v11215_v63  ;;  %v5140_v59 = vmul.f32 %v11322_v42, %v5120_v29  ;;  %v5467_v29 = vld [vmem:[%s11551_s7 + $0x40] sm:$0xff]  ;;  %v5466_v2 = vld [vmem:[%s11551_s7 + $0x38] sm:$0xff] }
 0x717   :  { %v7616_v25 = vpop.eup %7615 }
 0x718   :  { %v5122_v45 = vmul.f32 %v7616_v25, %v11220_v61  ;;  %v5139_v55 = vmul.f32 %v11322_v42, %v5119_v40  ;;  %v5160_v63 = vadd.f32 %v11330_v44, %v5140_v59  ;;  %v5465_v40 = vld [vmem:[%s11551_s7 + $0x30] sm:$0xff]  ;;  %v5464_v25 = vld [vmem:[%s11551_s7 + $0x28] sm:$0xff]  ;;  %v5463_v59 = vld [vmem:[%s11551_s7 + $0x20] sm:$0xff] }
 0x719   :  { %v7618_v32 = vpop.eup %7617 }
 0x71a   :  { %v5159_v49 = vadd.f32 %v11330_v44, %v5139_v55  ;;  %v5121_v53 = vmul.f32 %v7618_v32, %v11226_v31  ;;  %v5142_v37 = vmul.f32 %v11322_v42, %v5122_v45  ;;  %v5462_v45 = vld [vmem:[%s11551_s7 + $0x18] sm:$0xff]  ;;  %v5461_v55 = vld [vmem:[%s11551_s7 + $0x10] sm:$0xff]  ;;  %v5460_v32 = vld [vmem:[%s11551_s7 + $0x8] sm:$0xff] }
 0x71b   :  { %v7620_v50 = vpop.eup %7619 }
 0x71c   :  { %v5124_v13 = vmul.f32 %v7620_v50, %v11232_v17  ;;  %6971 = vmatprep.mubr.msk.f32.mxu1 %vm51_vm0, %v5159_v49  ;;  %v5141_v54 = vmul.f32 %v11322_v42, %v5121_v53  ;;  %v5162_v31 = vadd.f32 %v11330_v44, %v5142_v37  ;;  %v5459_v49 = vld [vmem:[%s11551_s7] sm:$0xff] }
 0x71d   :  { %v7622_v3 = vpop.eup %7621  ;;  %6972 = vmatmul.mubr.msk.f32.vlgmr.msra.gmra.mxu1 %vm51_vm0, %v5160_v63 }
 0x71e   :  { %v5161_v61 = vadd.f32 %v11330_v44, %v5141_v54  ;;  %v5123_v39 = vmul.f32 %v7622_v3, %v11238_v16  ;;  %v5144_v18 = vmul.f32 %v11322_v42, %v5124_v13 }
 0x71f   :  { %v7624_v15 = vpop.eup %7623 }
 0x720   :  { %v5126_v0 = vmul.f32 %v7624_v15, %v11244_v48  ;;  %6974 = vmatprep.mubr.msk.f32.mxu1 %vm51_vm0, %v5161_v61  ;;  %v5143_v17 = vmul.f32 %v11322_v42, %v5123_v39  ;;  %v5164_v16 = vadd.f32 %v11330_v44, %v5144_v18 }
 0x721   :  { %v7626_v58 = vpop.eup %7625  ;;  %6975 = vmatmul.mubr.msk.f32.gmra.mxu1 %vm51_vm0, %v5162_v31 }
 0x722   :  { %v5163_v24 = vadd.f32 %v11330_v44, %v5143_v17  ;;  %v5125_v34 = vmul.f32 %v7626_v58, %v11250_v28  ;;  %v5146_v30 = vmul.f32 %v11322_v42, %v5126_v0  ;;  %v5474_v28 = vld [vmem:[%s11551_s7 + $0x78] sm:$0xff] }
 0x723   :  { %6995 = vmatprep.subr.mxu0 %v5474_v28 }
 0x724   :  { %6977 = vmatprep.mubr.msk.f32.mxu1 %vm51_vm0, %v5163_v24  ;;  %v5145_v8 = vmul.f32 %v11322_v42, %v5125_v34  ;;  %v5166_v12 = vadd.f32 %v11330_v44, %v5146_v30  ;;  %6996 = vmatpush3.msra.mxu0 %v5474_v28 }
 0x725   :  { %6978 = vmatmul.mubr.msk.f32.gmra.mxu1 %vm51_vm0, %v5164_v16  ;;  %6997 = vmatprep.subr.mxu0 %v5473_v33 }
 0x726   :  { %v5165_v48 = vadd.f32 %v11330_v44, %v5145_v8  ;;  %6998 = vmatpush3.msra.mxu0 %v5473_v33 }
 0x727   :  { %6999 = vmatprep.subr.mxu0 %v5472_v51 }
 0x728   :  { %6980 = vmatprep.mubr.msk.f32.mxu1 %vm51_vm0, %v5165_v48  ;;  %7000 = vmatpush3.msra.mxu0 %v5472_v51 }
 0x729   :  { %6981 = vmatmul.mubr.msk.f32.gmra.mxu1 %vm51_vm0, %v5166_v12  ;;  %7001 = vmatprep.subr.mxu0 %v5471_v35 }
 0x72a   :  { %7002 = vmatpush3.msra.mxu0 %v5471_v35 }
 0x72b   :  { %7003 = vmatprep.subr.mxu0 %v5470_v21 }
 0x72c   :  { %7004 = vmatpush3.msra.mxu0 %v5470_v21 }
 0x72d   :  { %7005 = vmatprep.subr.mxu0 %v5469_v43 }
 0x72e   :  { %7006 = vmatpush3.msra.mxu0 %v5469_v43 }
 0x72f   :  { %7007 = vmatprep.subr.mxu0 %v5468_v9 }
 0x730   :  { %7008 = vmatpush3.msra.mxu0 %v5468_v9 }
 0x731   :  { %7009 = vmatprep.subr.mxu0 %v5467_v29 }
 0x732   :  { %7010 = vmatpush3.msra.mxu0 %v5467_v29 }
 0x733   :  { %7011 = vmatprep.subr.mxu0 %v5466_v2 }
 0x734   :  { %7012 = vmatpush3.msra.mxu0 %v5466_v2 }
 0x735   :  { %7013 = vmatprep.subr.mxu0 %v5465_v40 }
 0x736   :  { %7014 = vmatpush3.msra.mxu0 %v5465_v40 }
 0x737   :  { %7015 = vmatprep.subr.mxu0 %v5464_v25 }
 0x738   :  { %7016 = vmatpush3.msra.mxu0 %v5464_v25 }
 0x739   :  { %7017 = vmatprep.subr.mxu0 %v5463_v59 }
 0x73a   :  { %7018 = vmatpush3.msra.mxu0 %v5463_v59 }
 0x73b   :  { %7019 = vmatprep.subr.mxu0 %v5462_v45 }
 0x73c   :  { %7020 = vmatpush3.msra.mxu0 %v5462_v45 }
 0x73d   :  { %7021 = vmatprep.subr.mxu0 %v5461_v55 }
 0x73e   :  { %7022 = vmatpush3.msra.mxu0 %v5461_v55 }
 0x73f   :  { %7023 = vmatprep.subr.mxu0 %v5460_v32 }
 0x740   :  { %7024 = vmatpush3.msra.mxu0 %v5460_v32 }
 0x741   :  { %7025 = vmatprep.subr.mxu0 %v5459_v49 }
 0x742   :  { %7026 = vmatpush3.msra.mxu0 %v5459_v49 }
 0x77f   :  { %v5052_v53 = vpop.xlane.xlu1 %5051 }
 0x780   :  { %v5080_v50 = vmul.f32 0.03125, %v5052_v53 }
 0x781   :  { %v5049_v63 = vpop.xlane.xlu0 %5048 }
 0x782   :  { %v5096_v37 = vadd.f32 1e-05, %v5080_v50  ;;  %v5079_v13 = vmul.f32 0.03125, %v5049_v63 }
 0x783   :  { %v5058_v54 = vpop.xlane.xlu1 %5057 }
 0x784   :  { %7627 = vrsqrt.f32 %v5096_v37  ;;  %v5095_v3 = vadd.f32 1e-05, %v5079_v13  ;;  %v5082_v61 = vmul.f32 0.03125, %v5058_v54 }
 0x785   :  { %v5055_v39 = vpop.xlane.xlu0 %5054 }
 0x786   :  { %7629 = vrsqrt.f32 %v5095_v3  ;;  %v5098_v15 = vadd.f32 1e-05, %v5082_v61  ;;  %v5081_v31 = vmul.f32 0.03125, %v5055_v39 }
 0x787   :  { %v5064_v18 = vpop.xlane.xlu1 %5063 }
 0x788   :  { %7631 = vrsqrt.f32 %v5098_v15  ;;  %v5097_v0 = vadd.f32 1e-05, %v5081_v31  ;;  %v5084_v17 = vmul.f32 0.03125, %v5064_v18 }
 0x789   :  { %v5061_v58 = vpop.xlane.xlu0 %5060 }
 0x78a   :  { %7633 = vrsqrt.f32 %v5097_v0  ;;  %v5100_v24 = vadd.f32 1e-05, %v5084_v17  ;;  %v5083_v34 = vmul.f32 0.03125, %v5061_v58 }
 0x78b   :  { %v5070_v16 = vpop.xlane.xlu1 %5069 }
 0x78c   :  { %7635 = vrsqrt.f32 %v5100_v24  ;;  %v5099_v30 = vadd.f32 1e-05, %v5083_v34  ;;  %v5086_v8 = vmul.f32 0.03125, %v5070_v16 }
 0x78d   :  { %v5067_v48 = vpop.xlane.xlu0 %5066 }
 0x78e   :  { %7637 = vrsqrt.f32 %v5099_v30  ;;  %v5102_v12 = vadd.f32 1e-05, %v5086_v8  ;;  %v5085_v28 = vmul.f32 0.03125, %v5067_v48 }
 0x790   :  { %7639 = vrsqrt.f32 %v5102_v12  ;;  %v5101_v33 = vadd.f32 1e-05, %v5085_v28 }
 0x791   :  { %v7628_v51 = vpop.eup %7627 }
 0x792   :  { %v5128_v35 = vmul.f32 %v7628_v51, %v11272_v52  ;;  %7641 = vrsqrt.f32 %v5101_v33 }
 0x793   :  { %v7630_v21 = vpop.eup %7629 }
 0x794   :  { %v5127_v43 = vmul.f32 %v7630_v21, %v11275_v1  ;;  %v5148_v29 = vmul.f32 %v11322_v42, %v5128_v35 }
 0x795   :  { %v7632_v9 = vpop.eup %7631 }
 0x796   :  { %v5130_v2 = vmul.f32 %v7632_v9, %v11280_v19  ;;  %v5147_v40 = vmul.f32 %v11322_v42, %v5127_v43  ;;  %v5168_v32 = vadd.f32 %v11330_v44, %v5148_v29 }
 0x797   :  { %v7634_v25 = vpop.eup %7633 }
 0x798   :  { %v5167_v59 = vadd.f32 %v11330_v44, %v5147_v40  ;;  %v5129_v45 = vmul.f32 %v7634_v25, %v11286_v14  ;;  %v5150_v52 = vmul.f32 %v11322_v42, %v5130_v2 }
 0x799   :  { %v7636_v55 = vpop.eup %7635 }
 0x79a   :  { %v5132_v49 = vmul.f32 %v7636_v55, %v11292_v4  ;;  %6983 = vmatprep.mubr.msk.f32.mxu1 %vm51_vm0, %v5167_v59  ;;  %v5149_v1 = vmul.f32 %v11322_v42, %v5129_v45  ;;  %v5170_v14 = vadd.f32 %v11330_v44, %v5150_v52 }
 0x79b   :  { %v7638_v53 = vpop.eup %7637  ;;  %6984 = vmatmul.mubr.msk.f32.gmra.mxu1 %vm51_vm0, %v5168_v32 }
 0x79c   :  { %v5169_v19 = vadd.f32 %v11330_v44, %v5149_v1  ;;  %v5131_v50 = vmul.f32 %v7638_v53, %v11298_v56  ;;  %v5152_v37 = vmul.f32 %v11322_v42, %v5132_v49 }
 0x79d   :  { %v7640_v63 = vpop.eup %7639 }
 0x79e   :  { %v5134_v13 = vmul.f32 %v7640_v63, %v11304_v47  ;;  %6986 = vmatprep.mubr.msk.f32.mxu1 %vm51_vm0, %v5169_v19  ;;  %v5151_v4 = vmul.f32 %v11322_v42, %v5131_v50  ;;  %v5172_v56 = vadd.f32 %v11330_v44, %v5152_v37 }
 0x79f   :  { %v7642_v54 = vpop.eup %7641  ;;  %6987 = vmatmul.mubr.msk.f32.gmra.mxu1 %vm51_vm0, %v5170_v14 }
 0x7a0   :  { %v5171_v3 = vadd.f32 %v11330_v44, %v5151_v4  ;;  %v5133_v61 = vmul.f32 %v7642_v54, %v11310_v7  ;;  %v5154_v39 = vmul.f32 %v11322_v42, %v5134_v13  ;;  %v11444_v7 = vld [vmem:[%s11552_s6] ss:$0 sm:$0xff] }
 0x7a2   :  { %6989 = vmatprep.mubr.msk.f32.mxu1 %vm51_vm0, %v5171_v3  ;;  %v5153_v15 = vmul.f32 %v11322_v42, %v5133_v61  ;;  %v5174_v31 = vadd.f32 %v11330_v44, %v5154_v39 }
 0x7a3   :  { %6990 = vmatmul.mubr.msk.f32.gmra.mxu1 %vm51_vm0, %v5172_v56 }
 0x7a4   :  { %v5173_v47 = vadd.f32 %v11330_v44, %v5153_v15 }
 0x7a6   :  { %6992 = vmatprep.mubr.msk.f32.mxu1 %vm51_vm0, %v5173_v47 }
 0x7a7   :  { %6993 = vmatmul.mubr.msk.f32.gmra.mxu1 %vm51_vm0, %v5174_v31 }
 0x7dd   :  { %v6973_v18 = vpop.f32.mrf.mxu1 }
 0x7de   :  { %v5306_v0 = vadd.f32 %v6973_v18, %v11444_v7 }
 0x7df   :  { %v5300_v17 = vpop.f32.mrf.mxu1 }
 0x7e0   :  { %v5396_v42 = vmul.f32 0.70710677, %v5306_v0  ;;  %v5301_v58 = vadd.f32 %v11444_v7, %v5300_v17  ;;  %v5380_v1 = vmul.f32 0.5, %v5306_v0 }
 0x7e1   :  { %v6976_v24 = vpop.f32.mrf.mxu1 }
 0x7e2   :  { %7643 = verf.f32 %v5396_v42  ;;  %v5395_v34 = vmul.f32 0.70710677, %v5301_v58  ;;  %v5316_v44 = vadd.f32 %v6976_v24, %v11444_v7  ;;  %v5379_v32 = vmul.f32 0.5, %v5301_v58 }
 0x7e3   :  { %v5310_v16 = vpop.f32.mrf.mxu1 }
 0x7e4   :  { %7645 = verf.f32 %v5395_v34  ;;  %v5398_v30 = vmul.f32 0.70710677, %v5316_v44  ;;  %v5311_v8 = vadd.f32 %v11444_v7, %v5310_v16  ;;  %v5382_v4 = vmul.f32 0.5, %v5316_v44 }
 0x7e5   :  { %v6979_v48 = vpop.f32.mrf.mxu1 }
 0x7e6   :  { %7647 = verf.f32 %v5398_v30  ;;  %v5397_v12 = vmul.f32 0.70710677, %v5311_v8  ;;  %v5326_v28 = vadd.f32 %v6979_v48, %v11444_v7  ;;  %v5381_v14 = vmul.f32 0.5, %v5311_v8 }
 0x7e7   :  { %v5320_v33 = vpop.f32.mrf.mxu1 }
 0x7e8   :  { %7649 = verf.f32 %v5397_v12  ;;  %v5400_v51 = vmul.f32 0.70710677, %v5326_v28  ;;  %v5321_v35 = vadd.f32 %v11444_v7, %v5320_v33  ;;  %v5384_v31 = vmul.f32 0.5, %v5326_v28 }
 0x7e9   :  { %v6982_v21 = vpop.f32.mrf.mxu1 }
 0x7ea   :  { %7651 = verf.f32 %v5400_v51  ;;  %v5399_v43 = vmul.f32 0.70710677, %v5321_v35  ;;  %v5336_v9 = vadd.f32 %v6982_v21, %v11444_v7  ;;  %v5383_v39 = vmul.f32 0.5, %v5321_v35 }
 0x7eb   :  { %v5330_v29 = vpop.f32.mrf.mxu1 }
 0x7ec   :  { %7653 = verf.f32 %v5399_v43  ;;  %v5402_v2 = vmul.f32 0.70710677, %v5336_v9  ;;  %v5331_v40 = vadd.f32 %v11444_v7, %v5330_v29  ;;  %v5386_v34 = vmul.f32 0.5, %v5336_v9 }
 0x7ee   :  { %7655 = verf.f32 %v5402_v2  ;;  %v5401_v25 = vmul.f32 0.70710677, %v5331_v40  ;;  %v5385_v58 = vmul.f32 0.5, %v5331_v40 }
 0x7ef   :  { %v7644_v59 = vpop.eup %7643 }
 0x7f0   :  { %7657 = verf.f32 %v5401_v25  ;;  %v5428_v55 = vadd.f32 1.0, %v7644_v59 }
 0x7f1   :  { %v7646_v45 = vpop.eup %7645 }
 0x7f2   :  { %v5427_v52 = vadd.f32 1.0, %v7646_v45  ;;  %v5444_v50 = vmul.f32 %v5428_v55, %v5380_v1 }
 0x7f3   :  { %v7648_v49 = vpop.eup %7647 }
 0x7f4   :  { %v5443_v53 = vmul.f32 %v5427_v52, %v5379_v32  ;;  %v5430_v63 = vadd.f32 1.0, %v7648_v49 }
 0x7f5   :  { %v7650_v19 = vpop.eup %7649 }
 0x7f6   :  { %7027 = vmatprep.mubr.f32.mxu0 %v5443_v53  ;;  %v5429_v37 = vadd.f32 1.0, %v7650_v19  ;;  %v5446_v61 = vmul.f32 %v5430_v63, %v5382_v4 }
 0x7f7   :  { %v7652_v13 = vpop.eup %7651  ;;  %7028 = vmatmul.mubr.f32.vlgmr.msra.gmra.mxu0 %v5444_v50 }
 0x7f8   :  { %v5445_v54 = vmul.f32 %v5429_v37, %v5381_v14  ;;  %v5432_v56 = vadd.f32 1.0, %v7652_v13 }
 0x7f9   :  { %v7654_v3 = vpop.eup %7653 }
 0x7fa   :  { %7030 = vmatprep.mubr.f32.mxu0 %v5445_v54  ;;  %v5431_v15 = vadd.f32 1.0, %v7654_v3  ;;  %v5448_v17 = vmul.f32 %v5432_v56, %v5384_v31 }
 0x7fb   :  { %v7656_v47 = vpop.eup %7655  ;;  %7031 = vmatmul.mubr.f32.gmra.mxu0 %v5446_v61 }
 0x7fc   :  { %v5447_v18 = vmul.f32 %v5431_v15, %v5383_v39  ;;  %v5434_v42 = vadd.f32 1.0, %v7656_v47 }
 0x7fd   :  { %v7658_v0 = vpop.eup %7657 }
 0x7fe   :  { %7033 = vmatprep.mubr.f32.mxu0 %v5447_v18  ;;  %v5433_v24 = vadd.f32 1.0, %v7658_v0  ;;  %v5450_v16 = vmul.f32 %v5434_v42, %v5386_v34 }
 0x7ff   :  { %7034 = vmatmul.mubr.f32.gmra.mxu0 %v5448_v17 }
 0x800   :  { %v5449_v44 = vmul.f32 %v5433_v24, %v5385_v58 }
 0x802   :  { %7036 = vmatprep.mubr.f32.mxu0 %v5449_v44 }
 0x803   :  { %7037 = vmatmul.mubr.f32.gmra.mxu0 %v5450_v16 }
 0x85b   :  { %v6985_v30 = vpop.f32.mrf.mxu1 }
 0x85c   :  { %v5346_v8 = vadd.f32 %v6985_v30, %v11444_v7 }
 0x85d   :  { %v5340_v48 = vpop.f32.mrf.mxu1 }
 0x85e   :  { %v5404_v12 = vmul.f32 0.70710677, %v5346_v8  ;;  %v5341_v28 = vadd.f32 %v11444_v7, %v5340_v48  ;;  %v5388_v54 = vmul.f32 0.5, %v5346_v8 }
 0x85f   :  { %v6988_v33 = vpop.f32.mrf.mxu1 }
 0x860   :  { %7659 = verf.f32 %v5404_v12  ;;  %v5403_v51 = vmul.f32 0.70710677, %v5341_v28  ;;  %v5356_v35 = vadd.f32 %v6988_v33, %v11444_v7  ;;  %v5387_v37 = vmul.f32 0.5, %v5341_v28 }
 0x861   :  { %v5350_v21 = vpop.f32.mrf.mxu1 }
 0x862   :  { %7661 = verf.f32 %v5403_v51  ;;  %v5406_v43 = vmul.f32 0.70710677, %v5356_v35  ;;  %v5351_v9 = vadd.f32 %v11444_v7, %v5350_v21  ;;  %v5390_v18 = vmul.f32 0.5, %v5356_v35  ;;  %v6018_v21 = vld [vmem:[%s11547_s4 + $0x5] ss:$0 sm:$0xff] }
 0x863   :  { %v6991_v29 = vpop.f32.mrf.mxu1 }
 0x864   :  { %7663 = verf.f32 %v5406_v43  ;;  %v5405_v2 = vmul.f32 0.70710677, %v5351_v9  ;;  %v5366_v40 = vadd.f32 %v6991_v29, %v11444_v7  ;;  %v5389_v15 = vmul.f32 0.5, %v5351_v9 }
 0x865   :  { %v5360_v25 = vpop.f32.mrf.mxu1 }
 0x866   :  { %7665 = verf.f32 %v5405_v2  ;;  %v5408_v59 = vmul.f32 0.70710677, %v5366_v40  ;;  %v5361_v45 = vadd.f32 %v11444_v7, %v5360_v25  ;;  %v5392_v44 = vmul.f32 0.5, %v5366_v40 }
 0x867   :  { %v6994_v55 = vpop.f32.mrf.mxu1 }
 0x868   :  { %7667 = verf.f32 %v5408_v59  ;;  %v5407_v32 = vmul.f32 0.70710677, %v5361_v45  ;;  %v5376_v52 = vadd.f32 %v6994_v55, %v11444_v7  ;;  %v5391_v58 = vmul.f32 0.5, %v5361_v45 }
 0x869   :  { %v5370_v49 = vpop.f32.mrf.mxu1 }
 0x86a   :  { %7669 = verf.f32 %v5407_v32  ;;  %v5410_v1 = vmul.f32 0.70710677, %v5376_v52  ;;  %v5371_v53 = vadd.f32 %v11444_v7, %v5370_v49  ;;  %v5394_v33 = vmul.f32 0.5, %v5376_v52 }
 0x86c   :  { %7671 = verf.f32 %v5410_v1  ;;  %v5409_v19 = vmul.f32 0.70710677, %v5371_v53  ;;  %v5393_v12 = vmul.f32 0.5, %v5371_v53 }
 0x86d   :  { %v7660_v50 = vpop.eup %7659 }
 0x86e   :  { %7673 = verf.f32 %v5409_v19  ;;  %v5436_v14 = vadd.f32 1.0, %v7660_v50 }
 0x86f   :  { %v7662_v63 = vpop.eup %7661 }
 0x870   :  { %v5435_v13 = vadd.f32 1.0, %v7662_v63  ;;  %v5452_v56 = vmul.f32 %v5436_v14, %v5388_v54 }
 0x871   :  { %v7664_v4 = vpop.eup %7663 }
 0x872   :  { %v5451_v3 = vmul.f32 %v5435_v13, %v5387_v37  ;;  %v5438_v39 = vadd.f32 1.0, %v7664_v4 }
 0x873   :  { %v7666_v61 = vpop.eup %7665 }
 0x874   :  { %7039 = vmatprep.mubr.f32.mxu0 %v5451_v3  ;;  %v5437_v47 = vadd.f32 1.0, %v7666_v61  ;;  %v5454_v17 = vmul.f32 %v5438_v39, %v5390_v18 }
 0x875   :  { %v7668_v31 = vpop.eup %7667  ;;  %7040 = vmatmul.mubr.f32.gmra.mxu0 %v5452_v56 }
 0x876   :  { %v5453_v7 = vmul.f32 %v5437_v47, %v5389_v15  ;;  %v5440_v42 = vadd.f32 1.0, %v7668_v31 }
 0x877   :  { %v7670_v0 = vpop.eup %7669 }
 0x878   :  { %7042 = vmatprep.mubr.f32.mxu0 %v5453_v7  ;;  %v5439_v24 = vadd.f32 1.0, %v7670_v0  ;;  %v5456_v8 = vmul.f32 %v5440_v42, %v5392_v44 }
 0x879   :  { %v7672_v34 = vpop.eup %7671  ;;  %7043 = vmatmul.mubr.f32.gmra.mxu0 %v5454_v17 }
 0x87a   :  { %v5455_v16 = vmul.f32 %v5439_v24, %v5391_v58  ;;  %v5442_v48 = vadd.f32 1.0, %v7672_v34 }
 0x87b   :  { %v7674_v30 = vpop.eup %7673 }
 0x87c   :  { %7045 = vmatprep.mubr.f32.mxu0 %v5455_v16  ;;  %v5441_v28 = vadd.f32 1.0, %v7674_v30  ;;  %v5458_v35 = vmul.f32 %v5442_v48, %v5394_v33 }
 0x87d   :  { %7046 = vmatmul.mubr.f32.gmra.mxu0 %v5456_v8 }
 0x87e   :  { %v5457_v51 = vmul.f32 %v5441_v28, %v5393_v12 }
 0x880   :  { %7048 = vmatprep.mubr.f32.mxu0 %v5457_v51 }
 0x881   :  { %7049 = vmatmul.mubr.f32.gmra.mxu0 %v5458_v35 }
 0x8b7   :  { %v7029_v43 = vpop.f32.mrf.mxu0 }
 0x8b8   :  { %v5551_v9 = vadd.f32 %v7029_v43, %v6018_v21 }
 0x8b9   :  { %v5545_v29 = vpop.f32.mrf.mxu0 }
 0x8ba   :  { %v5625_v2 = vadd.f32 %v5551_v9, %v11087_v22  ;;  %v5546_v40 = vadd.f32 %v6018_v21, %v5545_v29 }
 0x8bb   :  { %v7032_v25 = vpop.f32.mrf.mxu0 }
 0x8bc   :  { %5641 = vst.msk [vmem:[%s11553_s8 + $0x8] sm:$0xff] %vm51_vm0, %v5625_v2  ;;  %v5624_v59 = vadd.f32 %v5546_v40, %v11093_v26  ;;  %v5561_v45 = vadd.f32 %v7032_v25, %v6018_v21 }
 0x8bd   :  { %v5555_v55 = vpop.f32.mrf.mxu0 }
 0x8be   :  { %5640 = vst.msk [vmem:[%s11553_s8] sm:$0xff] %vm51_vm0, %v5624_v59  ;;  %v5627_v32 = vadd.f32 %v5561_v45, %v11101_v10  ;;  %v5556_v52 = vadd.f32 %v6018_v21, %v5555_v55 }
 0x8bf   :  { %v7035_v22 = vpop.f32.mrf.mxu0 }
 0x8c0   :  { %5643 = vst.msk [vmem:[%s11553_s8 + $0x18] sm:$0xff] %vm51_vm0, %v5627_v32  ;;  %v5626_v49 = vadd.f32 %v5556_v52, %v11109_v5  ;;  %v5571_v1 = vadd.f32 %v7035_v22, %v6018_v21 }
 0x8c1   :  { %v5565_v26 = vpop.f32.mrf.mxu0 }
 0x8c2   :  { %5642 = vst.msk [vmem:[%s11553_s8 + $0x10] sm:$0xff] %vm51_vm0, %v5626_v49  ;;  %v5629_v53 = vadd.f32 %v5571_v1, %v11117_v38  ;;  %v5566_v19 = vadd.f32 %v6018_v21, %v5565_v26 }
 0x8c3   :  { %v7038_v10 = vpop.f32.mrf.mxu0 }
 0x8c4   :  { %5645 = vst.msk [vmem:[%s11553_s8 + $0x28] sm:$0xff] %vm51_vm0, %v5629_v53  ;;  %v5628_v50 = vadd.f32 %v5566_v19, %v11125_v46  ;;  %v5581_v63 = vadd.f32 %v7038_v10, %v6018_v21 }
 0x8c5   :  { %v5575_v5 = vpop.f32.mrf.mxu0 }
 0x8c6   :  { %5644 = vst.msk [vmem:[%s11553_s8 + $0x20] sm:$0xff] %vm51_vm0, %v5628_v50  ;;  %v5631_v14 = vadd.f32 %v5581_v63, %v11133_v27  ;;  %v5576_v37 = vadd.f32 %v6018_v21, %v5575_v5 }
 0x8c8   :  { %5647 = vst.msk [vmem:[%s11553_s8 + $0x38] sm:$0xff] %vm51_vm0, %v5631_v14  ;;  %v5630_v38 = vadd.f32 %v5576_v37, %v11141_v60 }
 0x8ca   :  { %5646 = vst.msk [vmem:[%s11553_s8 + $0x30] sm:$0xff] %vm51_vm0, %v5630_v38 }
 0x935   :  { %v7041_v46 = vpop.f32.mrf.mxu0 }
 0x936   :  { %v5591_v13 = vadd.f32 %v7041_v46, %v6018_v21 }
 0x937   :  { %v5585_v4 = vpop.f32.mrf.mxu0 }
 0x938   :  { %v5633_v54 = vadd.f32 %v5591_v13, %v11151_v6  ;;  %v5586_v3 = vadd.f32 %v6018_v21, %v5585_v4 }
 0x939   :  { %v7044_v27 = vpop.f32.mrf.mxu0 }
 0x93a   :  { %5649 = vst.msk [vmem:[%s11553_s8 + $0x48] sm:$0xff] %vm51_vm0, %v5633_v54  ;;  %v5632_v61 = vadd.f32 %v5586_v3, %v11157_v62  ;;  %v5601_v60 = vadd.f32 %v7044_v27, %v6018_v21 }
 0x93b   :  { %v5595_v56 = vpop.f32.mrf.mxu0 }
 0x93c   :  { %5648 = vst.msk [vmem:[%s11553_s8 + $0x40] sm:$0xff] %vm51_vm0, %v5632_v61  ;;  %v5635_v39 = vadd.f32 %v5601_v60, %v11165_v57  ;;  %v5596_v15 = vadd.f32 %v6018_v21, %v5595_v56 }
 0x93d   :  { %v7047_v6 = vpop.f32.mrf.mxu0 }
 0x93e   :  { %5651 = vst.msk [vmem:[%s11553_s8 + $0x58] sm:$0xff] %vm51_vm0, %v5635_v39  ;;  %v5634_v47 = vadd.f32 %v5596_v15, %v11173_v36  ;;  %v5611_v31 = vadd.f32 %v7047_v6, %v6018_v21 }
 0x93f   :  { %v5605_v62 = vpop.f32.mrf.mxu0 }
 0x940   :  { %5650 = vst.msk [vmem:[%s11553_s8 + $0x50] sm:$0xff] %vm51_vm0, %v5634_v47  ;;  %v5637_v18 = vadd.f32 %v5611_v31, %v11181_v11  ;;  %v5606_v7 = vadd.f32 %v6018_v21, %v5605_v62 }
 0x941   :  { %v7050_v57 = vpop.f32.mrf.mxu0 }
 0x942   :  { %5653 = vst.msk [vmem:[%s11553_s8 + $0x68] sm:$0xff] %vm51_vm0, %v5637_v18  ;;  %v5636_v0 = vadd.f32 %v5606_v7, %v11189_v23  ;;  %v5621_v17 = vadd.f32 %v7050_v57, %v6018_v21 }
 0x943   :  { %v5615_v36 = vpop.f32.mrf.mxu0 }
 0x944   :  { %5652 = vst.msk [vmem:[%s11553_s8 + $0x60] sm:$0xff] %vm51_vm0, %v5636_v0  ;;  %v5639_v42 = vadd.f32 %v5621_v17, %v11197_v41  ;;  %v5616_v58 = vadd.f32 %v6018_v21, %v5615_v36 }
 0x946   :  { %5655 = vst.msk [vmem:[%s11553_s8 + $0x78] sm:$0xff] %vm51_vm0, %v5639_v42  ;;  %v5638_v11 = vadd.f32 %v5616_v58, %v11205_v20 }
 0x948   :  { %5654 = vst.msk [vmem:[%s11553_s8 + $0x70] sm:$0xff] %vm51_vm0, %v5638_v11 }

</bundles_post_ra>
